<compile_context>
chip_gen: v6e
topology: v6e:2x2x1
jax: 0.10.0
libtpu: 0.0.40
codegen_flags: <defaults>
</compile_context>

<pallas_src>
import functools

import jax
import jax.numpy as jnp
from jax import lax
from jax.experimental import pallas as pl
from jax.experimental.pallas import tpu as pltpu


# ----------------------------------------------------------------------------
# helpers
# ----------------------------------------------------------------------------
def _round_up(x, m):
    return (x + m - 1) // m * m


@functools.lru_cache(maxsize=None)
def _tn_pref():
    """Preferred N tile: 256 on 256-wide-MXU chips (v6e/v7x), else 128."""
    try:
        kind = jax.devices()[0].device_kind.lower()
    except Exception:
        return 128
    if "v6" in kind or "v7" in kind or "7x" in kind:
        return 256
    return 128


def _pick_tn(Np):
    tn = _tn_pref()
    return tn if Np % tn == 0 else 128


def _pick_tk(Kp):
    if Kp <= 512:
        return Kp
    for tk in (512, 384, 256, 128):
        if Kp % tk == 0:
            return tk
    return 128


# ----------------------------------------------------------------------------
# Pallas matmul kernel: bf16 A @ bf16 B, f32 accumulate, fused bias/residual/ReLU
# ----------------------------------------------------------------------------
def _matmul_kernel(*refs, relu, nk, has_res):
    if has_res:
        a_ref, b_ref, bias_ref, res_ref, o_ref, acc_ref = refs
    else:
        a_ref, b_ref, bias_ref, o_ref, acc_ref = refs
        res_ref = None
    k = pl.program_id(2)

    @pl.when(k == 0)
    def _init():
        acc_ref[...] = jnp.zeros_like(acc_ref)

    acc_ref[...] += jnp.dot(a_ref[...], b_ref[...],
                            preferred_element_type=jnp.float32)

    @pl.when(k == nk - 1)
    def _finalize():
        acc = acc_ref[...] + bias_ref[...]
        if has_res:
            acc = acc + res_ref[...].astype(jnp.float32)
        if relu:
            acc = jnp.maximum(acc, 0.0)
        o_ref[...] = acc.astype(o_ref.dtype)


@functools.lru_cache(maxsize=None)
def _build_matmul(Mp, Kp, Np, TM, TN, TK, relu, has_res, out_dtype_name):
    nk = Kp // TK
    kernel = functools.partial(_matmul_kernel, relu=relu, nk=nk, has_res=has_res)
    in_specs = [
        pl.BlockSpec((TM, TK), lambda i, j, k: (i, k)),   # A tile
        pl.BlockSpec((TK, TN), lambda i, j, k: (k, j)),   # B tile
        pl.BlockSpec((1, TN), lambda i, j, k: (0, j)),    # bias tile
    ]
    if has_res:
        in_specs.append(pl.BlockSpec((TM, TN), lambda i, j, k: (i, j)))  # residual tile
    return pl.pallas_call(
        kernel,
        out_shape=jax.ShapeDtypeStruct((Mp, Np), jnp.dtype(out_dtype_name)),
        grid_spec=pltpu.PrefetchScalarGridSpec(
            num_scalar_prefetch=0,
            grid=(Mp // TM, Np // TN, nk),
            in_specs=in_specs,
            out_specs=pl.BlockSpec((TM, TN), lambda i, j, k: (i, j)),
            scratch_shapes=[pltpu.VMEM((TM, TN), jnp.float32)],
        ),
        compiler_params=pltpu.CompilerParams(
            dimension_semantics=("parallel", "parallel", "arbitrary")),
    )


def pallas_matmul(a, w_pad, bias_pad, n_out, *, relu,
                  residual=None, out_dtype=jnp.bfloat16):
    """(M,K) @ pre-padded (Kp,Np) bf16 weights + bias, fused ReLU / residual."""
    M, K = a.shape
    Kp, Np = w_pad.shape
    TN = _pick_tn(Np)
    TK = _pick_tk(Kp)
    TM = min(256, _round_up(max(M, 8), 8))
    Mp = _round_up(M, TM)

    a_p = jnp.pad(a.astype(jnp.bfloat16), ((0, Mp - M), (0, Kp - K)))
    args = [a_p, w_pad, bias_pad]
    has_res = residual is not None
    if has_res:
        res_p = jnp.pad(residual.astype(jnp.bfloat16),
                        ((0, Mp - M), (0, Np - n_out)))
        args.append(res_p)

    fn = _build_matmul(Mp, Kp, Np, TM, TN, TK, bool(relu), has_res,
                       jnp.dtype(out_dtype).name)
    out = fn(*args)
    return out[:M, :n_out]


# ----------------------------------------------------------------------------
# L2 normalize (p=2, dim=1, keepdim, divide) — Pallas kernel
# ----------------------------------------------------------------------------
def _l2_norm_kernel(x_ref, o_ref):
    x = x_ref[...].astype(jnp.float32)
    ss = jnp.sum(x * x, axis=1, keepdims=True)
    inv = lax.rsqrt(jnp.maximum(ss, 1e-24))   # eps clamp: zero rows stay finite
    o_ref[...] = x * inv


@functools.lru_cache(maxsize=None)
def _build_l2_norm(B, E):
    return pl.pallas_call(
        _l2_norm_kernel,
        out_shape=jax.ShapeDtypeStruct((B, E), jnp.float32),
        grid=(1,),
        in_specs=[pl.BlockSpec((B, E), lambda i: (0, 0))],
        out_specs=pl.BlockSpec((B, E), lambda i: (0, 0)),
    )


def pallas_l2_normalize(x):
    B, E = x.shape
    return _build_l2_norm(B, E)(x)


# ----------------------------------------------------------------------------
# Conv via (im2col | reshape) + Pallas matmul (BN folded, ReLU/residual fused)
# ----------------------------------------------------------------------------
def _im2col(x, kh, kw, stride, pad):
    # TODO(synk): 3x3 patch construction is JAX glue (fused by XLA under the
    # outer jit) rather than being gathered inside the Pallas kernel.
    B, H, W, C = x.shape
    xp = jnp.pad(x, ((0, 0), (pad, pad), (pad, pad), (0, 0)))
    Ho = (H + 2 * pad - kh) // stride + 1
    Wo = (W + 2 * pad - kw) // stride + 1
    cols = []
    for i in range(kh):
        for j in range(kw):
            cols.append(xp[:, i:i + Ho * stride:stride, j:j + Wo * stride:stride, :])
    patches = jnp.concatenate(cols, axis=-1)  # (B, Ho, Wo, kh*kw*C)
    return patches.reshape(B * Ho * Wo, kh * kw * C), (B, Ho, Wo)


def conv2d_bn(x, layer, stride, pad, relu, residual=None,
              out_dtype=jnp.bfloat16):
    kh, kw, cout = layer["kh"], layer["kw"], layer["n"]
    if kh == 1 and kw == 1 and pad == 0:
        # 1x1 conv: no im2col copy, just (strided) reshape.
        if stride != 1:
            x = x[:, ::stride, ::stride, :]
        B, Ho, Wo, C = x.shape
        patches = x.reshape(B * Ho * Wo, C)
    else:
        patches, (B, Ho, Wo) = _im2col(x, kh, kw, stride, pad)

    res2d = None
    if residual is not None:
        res2d = residual.reshape(B * Ho * Wo, cout)

    out = pallas_matmul(patches, layer["w"], layer["b"], cout,
                        relu=relu, residual=res2d, out_dtype=out_dtype)
    return out.reshape(B, Ho, Wo, cout)


# ----------------------------------------------------------------------------
# Deterministic parameter construction (synthetic "pretrained" weights).
# All padding / reshaping / bf16 casting of weights happens HERE, once.
# ----------------------------------------------------------------------------
class ParamGen:
    def __init__(self, key):
        self.key = key
        self.count = 0

    def next(self):
        self.count += 1
        return jax.random.fold_in(self.key, self.count)


def _prep_matmul_weights(w_kxn, b_n):
    """Pad (K,N) weights / (N,) bias to tile-aligned, bf16 weight form."""
    K, N = w_kxn.shape
    Kp = _round_up(K, 128)
    TN = min(_tn_pref(), _round_up(max(N, 128), 128))
    Np = _round_up(N, TN)
    w_pad = jnp.zeros((Kp, Np), jnp.bfloat16).at[:K, :N].set(
        w_kxn.astype(jnp.bfloat16))
    b_pad = jnp.zeros((1, Np), jnp.float32).at[0, :N].set(b_n.astype(jnp.float32))
    return w_pad, b_pad


def init_conv_bn(pg, cin, cout, kh, kw, gamma_scale=1.0):
    """Conv (no bias) + BatchNorm(inference) folded, padded, bf16."""
    std = (2.0 / (cin * kh * kw)) ** 0.5
    w = jax.random.normal(pg.next(), (cout, cin, kh, kw), jnp.float32) * std
    gamma = gamma_scale * (1.0 + 0.1 * jax.random.normal(pg.next(), (cout,), jnp.float32))
    beta = 0.05 * jax.random.normal(pg.next(), (cout,), jnp.float32)
    mean = 0.05 * jax.random.normal(pg.next(), (cout,), jnp.float32)
    var = 1.0 + 0.1 * jax.random.uniform(pg.next(), (cout,), jnp.float32)
    scale = gamma / jnp.sqrt(var + 1e-5)
    w_fold = (w * scale[:, None, None, None]).transpose(2, 3, 1, 0)  # (kh,kw,cin,cout)
    b_fold = beta - mean * scale
    w_pad, b_pad = _prep_matmul_weights(w_fold.reshape(kh * kw * cin, cout), b_fold)
    return {"w": w_pad, "b": b_pad, "kh": kh, "kw": kw, "n": cout}


def init_bottleneck(pg, inplanes, planes, stride):
    p = {
        "conv1": init_conv_bn(pg, inplanes, planes, 1, 1),
        "conv2": init_conv_bn(pg, planes, planes, 3, 3),
        # small last-BN gamma keeps the 50-block residual stack numerically tame
        "conv3": init_conv_bn(pg, planes, planes * 4, 1, 1, gamma_scale=0.1),
        "stride": stride,
    }
    if stride != 1 or inplanes != planes * 4:
        p["down"] = init_conv_bn(pg, inplanes, planes * 4, 1, 1)
    return p


LAYERS = (3, 8, 36, 3)  # torchvision resnet152 bottleneck counts


def init_resnet152(key, base, embed_size):
    pg = ParamGen(key)
    params = {"conv1": init_conv_bn(pg, 3, base, 7, 7)}
    inplanes = base
    for li, (blocks, stride) in enumerate(zip(LAYERS, (1, 2, 2, 2))):
        planes = base * (2 ** li)
        layer = []
        for bi in range(blocks):
            s = stride if bi == 0 else 1
            layer.append(init_bottleneck(pg, inplanes, planes, s))
            inplanes = planes * 4
        params[f"layer{li + 1}"] = layer
    in_features = inplanes  # = base * 8 * 4  (model.fc.in_features)
    std = (1.0 / in_features) ** 0.5
    fc_w = jax.random.normal(pg.next(), (embed_size, in_features), jnp.float32) * std
    fc_b = 0.01 * jax.random.normal(pg.next(), (embed_size,), jnp.float32)
    w_pad, b_pad = _prep_matmul_weights(fc_w.T, fc_b)
    params["fc"] = {"w": w_pad, "b": b_pad, "n": embed_size}
    return params


# ----------------------------------------------------------------------------
# Forward pass (== ImgEncoder_ResNet.forward, inference semantics)
# ----------------------------------------------------------------------------
def bottleneck_forward(x, p):
    if "down" in p:
        identity = conv2d_bn(x, p["down"], stride=p["stride"], pad=0, relu=False)
    else:
        identity = x
    out = conv2d_bn(x, p["conv1"], stride=1, pad=0, relu=True)
    out = conv2d_bn(out, p["conv2"], stride=p["stride"], pad=1, relu=True)
    # residual add + final ReLU fused into the conv3 matmul epilogue
    out = conv2d_bn(out, p["conv3"], stride=1, pad=0, relu=True, residual=identity)
    return out


def img_encoder_resnet_forward(image_nchw, params):
    # PyTorch conv input convention is NCHW; convert to NHWC + bf16 internally.
    x = jnp.transpose(image_nchw, (0, 2, 3, 1)).astype(jnp.bfloat16)

    x = conv2d_bn(x, params["conv1"], stride=2, pad=3, relu=True)

    # maxpool 3x3, stride 2, pad 1
    # TODO(synk): pooling done with lax.reduce_window, not a Pallas kernel
    x = lax.reduce_window(x, jnp.asarray(-jnp.inf, x.dtype), lax.max,
                          (1, 3, 3, 1), (1, 2, 2, 1),
                          ((0, 0), (1, 1), (1, 1), (0, 0)))

    for li in range(4):
        for blk in params[f"layer{li + 1}"]:
            x = bottleneck_forward(x, blk)

    # AdaptiveAvgPool2d((1,1)) -> flatten  (f32 accumulation)
    x = jnp.mean(x.astype(jnp.float32), axis=(1, 2))  # (B, in_features)

    # new fc: Linear(in_features, embed_size)  (Pallas matmul + bias, f32 out)
    fc = params["fc"]
    feat = pallas_matmul(x, fc["w"], fc["b"], fc["n"], relu=False,
                         out_dtype=jnp.float32)

    # l2_norm over dim=1, keepdim; divide  (Pallas kernel)
    return pallas_l2_normalize(feat)


# ----------------------------------------------------------------------------
if __name__ == "__main__":
    key = jax.random.PRNGKey(0)
    base = 8          # scaled-down width (real resnet152 uses 64)
    embed_size = 32   # ImgEncoder embed_size

    params = init_resnet152(jax.random.fold_in(key, 1), base, embed_size)
    image = jax.random.normal(jax.random.fold_in(key, 2), (2, 3, 32, 32), jnp.float32)

    # jit the whole forward once; params are closed over (static ints stay static)
    forward = jax.jit(functools.partial(img_encoder_resnet_forward, params=params))

    out = forward(image)
    out = jax.block_until_ready(out)

    assert out.shape == (2, embed_size), out.shape
    assert bool(jnp.all(jnp.isfinite(out)))
    # rows are L2-normalized
    assert bool(jnp.allclose(jnp.sum(out * out, axis=1), 1.0, atol=1e-4))
    print("KERNEL_OK")
</pallas_src>

<mosaic_0001>
module attributes {stable_mosaic.version = 11 : i64} {
  func.func @_matmul_kernel(%arg0: i32, %arg1: i32, %arg2: i32, %arg3: memref<256x256xbf16, #tpu.memory_space<vmem>>, %arg4: memref<256x128xbf16, #tpu.memory_space<vmem>>, %arg5: memref<1x128xf32, #tpu.memory_space<vmem>>, %arg6: memref<256x128xbf16, #tpu.memory_space<vmem>>, %arg7: memref<256x128xf32, #tpu.memory_space<vmem>>) attributes {dimension_semantics = [#tpu.dimension_semantics<parallel>, #tpu.dimension_semantics<parallel>, #tpu.dimension_semantics<arbitrary>], iteration_bounds = array<i64: 2, 1, 1>, scalar_prefetch = 0 : i64, scratch_operands = 1 : i64, tpu.core_type = #tpu.core_type<tc>, window_params = [{transform_indices = @transform_0, window_bounds = array<i64: 256, 256>}, {transform_indices = @transform_1, window_bounds = array<i64: 256, 128>}, {transform_indices = @transform_2, window_bounds = array<i64: 1, 128>}, {transform_indices = @transform_3, window_bounds = array<i64: 256, 128>}]} {
    %c0_i32 = arith.constant 0 : i32
    %0 = arith.cmpi eq, %arg2, %c0_i32 : i32
    %1 = arith.extui %0 : i1 to i32
    %c0_i32_0 = arith.constant 0 : i32
    %2 = arith.cmpi ne, %1, %c0_i32_0 : i32
    scf.if %2 {
      %cst_10 = arith.constant 0.000000e+00 : f32
      %12 = vector.broadcast %cst_10 : f32 to vector<256x128xf32>
      %c0_11 = arith.constant 0 : index
      %c0_12 = arith.constant 0 : index
      %13 = vector.load %arg7[%c0_11, %c0_12] : memref<256x128xf32, #tpu.memory_space<vmem>>, vector<256x128xf32>
      tpu.vector_store %arg7[%c0_11, %c0_12], %12 {strides = array<i32>} : memref<256x128xf32, #tpu.memory_space<vmem>>, vector<256x128xf32>,
    } else {
    }
    %c0 = arith.constant 0 : index
    %c0_1 = arith.constant 0 : index
    %3 = vector.load %arg7[%c0, %c0_1] : memref<256x128xf32, #tpu.memory_space<vmem>>, vector<256x128xf32>
    %c0_2 = arith.constant 0 : index
    %c0_3 = arith.constant 0 : index
    %4 = vector.load %arg3[%c0_2, %c0_3] : memref<256x256xbf16, #tpu.memory_space<vmem>>, vector<256x256xbf16>
    %c0_4 = arith.constant 0 : index
    %c0_5 = arith.constant 0 : index
    %5 = vector.load %arg4[%c0_4, %c0_5] : memref<256x128xbf16, #tpu.memory_space<vmem>>, vector<256x128xbf16>
    %cst = arith.constant dense<0.000000e+00> : vector<256x128xf32>
    %6 = tpu.matmul %4, %5, %cst {dimension_numbers = #tpu.dot_dimension_numbers<[1], [0], [0], [1], [0, 0, 1, 1], [], []>} : vector<256x256xbf16>, vector<256x128xbf16>, vector<256x128xf32> -> vector<256x128xf32>
    %7 = arith.addf %3, %6 : vector<256x128xf32>
    %c0_6 = arith.constant 0 : index
    %c0_7 = arith.constant 0 : index
    %8 = vector.load %arg7[%c0_6, %c0_7] : memref<256x128xf32, #tpu.memory_space<vmem>>, vector<256x128xf32>
    tpu.vector_store %arg7[%c0_6, %c0_7], %7 {strides = array<i32>} : memref<256x128xf32, #tpu.memory_space<vmem>>, vector<256x128xf32>,
    %c0_i32_8 = arith.constant 0 : i32
    %9 = arith.cmpi eq, %arg2, %c0_i32_8 : i32
    %10 = arith.extui %9 : i1 to i32
    %c0_i32_9 = arith.constant 0 : i32
    %11 = arith.cmpi ne, %10, %c0_i32_9 : i32
    scf.if %11 {
      %c0_10 = arith.constant 0 : index
      %c0_11 = arith.constant 0 : index
      %12 = vector.load %arg7[%c0_10, %c0_11] : memref<256x128xf32, #tpu.memory_space<vmem>>, vector<256x128xf32>
      %c0_12 = arith.constant 0 : index
      %c0_13 = arith.constant 0 : index
      %13 = vector.load %arg5[%c0_12, %c0_13] : memref<1x128xf32, #tpu.memory_space<vmem>>, vector<1x128xf32>
      %14 = vector.broadcast %13 : vector<1x128xf32> to vector<256x128xf32>
      %15 = arith.addf %12, %14 : vector<256x128xf32>
      %cst_14 = arith.constant 0.000000e+00 : f32
      %16 = vector.broadcast %cst_14 : f32 to vector<256x128xf32>
      %17 = arith.maximumf %15, %16 : vector<256x128xf32>
      %18 = arith.truncf %17 : vector<256x128xf32> to vector<256x128xbf16>
      %c0_15 = arith.constant 0 : index
      %c0_16 = arith.constant 0 : index
      %19 = vector.load %arg6[%c0_15, %c0_16] : memref<256x128xbf16, #tpu.memory_space<vmem>>, vector<256x128xbf16>
      tpu.vector_store %arg6[%c0_15, %c0_16], %18 {strides = array<i32>} : memref<256x128xbf16, #tpu.memory_space<vmem>>, vector<256x128xbf16>,
    } else {
    }
    return
  }
  func.func @transform_0(%arg0: i32, %arg1: i32, %arg2: i32) -> (i32, i32) {
    %c0_i32 = arith.constant 0 : i32
    return %arg0, %arg2 : i32, i32
  }
  func.func @transform_1(%arg0: i32, %arg1: i32, %arg2: i32) -> (i32, i32) {
    %c0_i32 = arith.constant 0 : i32
    return %arg2, %arg1 : i32, i32
  }
  func.func @transform_2(%arg0: i32, %arg1: i32, %arg2: i32) -> (i32, i32) {
    %c0_i32 = arith.constant 0 : i32
    %c0_i32_0 = arith.constant 0 : i32
    return %c0_i32, %arg1 : i32, i32
  }
  func.func @transform_3(%arg0: i32, %arg1: i32, %arg2: i32) -> (i32, i32) {
    %c0_i32 = arith.constant 0 : i32
    return %arg0, %arg1 : i32, i32
  }
}

module attributes {stable_mosaic.version = 11 : i64} {
  func.func @_matmul_kernel(%arg0: i32, %arg1: i32, %arg2: i32, %arg3: memref<128x128xbf16, #tpu.memory_space<vmem>>, %arg4: memref<128x128xbf16, #tpu.memory_space<vmem>>, %arg5: memref<1x128xf32, #tpu.memory_space<vmem>>, %arg6: memref<128x128xbf16, #tpu.memory_space<vmem>>, %arg7: memref<128x128xf32, #tpu.memory_space<vmem>>) attributes {dimension_semantics = [#tpu.dimension_semantics<parallel>, #tpu.dimension_semantics<parallel>, #tpu.dimension_semantics<arbitrary>], iteration_bounds = array<i64: 1, 1, 1>, scalar_prefetch = 0 : i64, scratch_operands = 1 : i64, tpu.core_type = #tpu.core_type<tc>, window_params = [{transform_indices = @transform_0, window_bounds = array<i64: 128, 128>}, {transform_indices = @transform_1, window_bounds = array<i64: 128, 128>}, {transform_indices = @transform_2, window_bounds = array<i64: 1, 128>}, {transform_indices = @transform_3, window_bounds = array<i64: 128, 128>}]} {
    %c0_i32 = arith.constant 0 : i32
    %0 = arith.cmpi eq, %arg2, %c0_i32 : i32
    %1 = arith.extui %0 : i1 to i32
    %c0_i32_0 = arith.constant 0 : i32
    %2 = arith.cmpi ne, %1, %c0_i32_0 : i32
    scf.if %2 {
      %cst_10 = arith.constant 0.000000e+00 : f32
      %12 = vector.broadcast %cst_10 : f32 to vector<128x128xf32>
      %c0_11 = arith.constant 0 : index
      %c0_12 = arith.constant 0 : index
      %13 = vector.load %arg7[%c0_11, %c0_12] : memref<128x128xf32, #tpu.memory_space<vmem>>, vector<128x128xf32>
      tpu.vector_store %arg7[%c0_11, %c0_12], %12 {strides = array<i32>} : memref<128x128xf32, #tpu.memory_space<vmem>>, vector<128x128xf32>,
    } else {
    }
    %c0 = arith.constant 0 : index
    %c0_1 = arith.constant 0 : index
    %3 = vector.load %arg7[%c0, %c0_1] : memref<128x128xf32, #tpu.memory_space<vmem>>, vector<128x128xf32>
    %c0_2 = arith.constant 0 : index
    %c0_3 = arith.constant 0 : index
    %4 = vector.load %arg3[%c0_2, %c0_3] : memref<128x128xbf16, #tpu.memory_space<vmem>>, vector<128x128xbf16>
    %c0_4 = arith.constant 0 : index
    %c0_5 = arith.constant 0 : index
    %5 = vector.load %arg4[%c0_4, %c0_5] : memref<128x128xbf16, #tpu.memory_space<vmem>>, vector<128x128xbf16>
    %cst = arith.constant dense<0.000000e+00> : vector<128x128xf32>
    %6 = tpu.matmul %4, %5, %cst {dimension_numbers = #tpu.dot_dimension_numbers<[1], [0], [0], [1], [0, 0, 1, 1], [], []>} : vector<128x128xbf16>, vector<128x128xbf16>, vector<128x128xf32> -> vector<128x128xf32>
    %7 = arith.addf %3, %6 : vector<128x128xf32>
    %c0_6 = arith.constant 0 : index
    %c0_7 = arith.constant 0 : index
    %8 = vector.load %arg7[%c0_6, %c0_7] : memref<128x128xf32, #tpu.memory_space<vmem>>, vector<128x128xf32>
    tpu.vector_store %arg7[%c0_6, %c0_7], %7 {strides = array<i32>} : memref<128x128xf32, #tpu.memory_space<vmem>>, vector<128x128xf32>,
    %c0_i32_8 = arith.constant 0 : i32
    %9 = arith.cmpi eq, %arg2, %c0_i32_8 : i32
    %10 = arith.extui %9 : i1 to i32
    %c0_i32_9 = arith.constant 0 : i32
    %11 = arith.cmpi ne, %10, %c0_i32_9 : i32
    scf.if %11 {
      %c0_10 = arith.constant 0 : index
      %c0_11 = arith.constant 0 : index
      %12 = vector.load %arg7[%c0_10, %c0_11] : memref<128x128xf32, #tpu.memory_space<vmem>>, vector<128x128xf32>
      %c0_12 = arith.constant 0 : index
      %c0_13 = arith.constant 0 : index
      %13 = vector.load %arg5[%c0_12, %c0_13] : memref<1x128xf32, #tpu.memory_space<vmem>>, vector<1x128xf32>
      %14 = vector.broadcast %13 : vector<1x128xf32> to vector<128x128xf32>
      %15 = arith.addf %12, %14 : vector<128x128xf32>
      %cst_14 = arith.constant 0.000000e+00 : f32
      %16 = vector.broadcast %cst_14 : f32 to vector<128x128xf32>
      %17 = arith.maximumf %15, %16 : vector<128x128xf32>
      %18 = arith.truncf %17 : vector<128x128xf32> to vector<128x128xbf16>
      %c0_15 = arith.constant 0 : index
      %c0_16 = arith.constant 0 : index
      %19 = vector.load %arg6[%c0_15, %c0_16] : memref<128x128xbf16, #tpu.memory_space<vmem>>, vector<128x128xbf16>
      tpu.vector_store %arg6[%c0_15, %c0_16], %18 {strides = array<i32>} : memref<128x128xbf16, #tpu.memory_space<vmem>>, vector<128x128xbf16>,
    } else {
    }
    return
  }
  func.func @transform_0(%arg0: i32, %arg1: i32, %arg2: i32) -> (i32, i32) {
    %c0_i32 = arith.constant 0 : i32
    return %arg0, %arg2 : i32, i32
  }
  func.func @transform_1(%arg0: i32, %arg1: i32, %arg2: i32) -> (i32, i32) {
    %c0_i32 = arith.constant 0 : i32
    return %arg2, %arg1 : i32, i32
  }
  func.func @transform_2(%arg0: i32, %arg1: i32, %arg2: i32) -> (i32, i32) {
    %c0_i32 = arith.constant 0 : i32
    %c0_i32_0 = arith.constant 0 : i32
    return %c0_i32, %arg1 : i32, i32
  }
  func.func @transform_3(%arg0: i32, %arg1: i32, %arg2: i32) -> (i32, i32) {
    %c0_i32 = arith.constant 0 : i32
    return %arg0, %arg1 : i32, i32
  }
}

module attributes {stable_mosaic.version = 11 : i64} {
  func.func @_matmul_kernel(%arg0: i32, %arg1: i32, %arg2: i32, %arg3: memref<128x128xbf16, #tpu.memory_space<vmem>>, %arg4: memref<128x128xbf16, #tpu.memory_space<vmem>>, %arg5: memref<1x128xf32, #tpu.memory_space<vmem>>, %arg6: memref<128x128xbf16, #tpu.memory_space<vmem>>, %arg7: memref<128x128xf32, #tpu.memory_space<vmem>>) attributes {dimension_semantics = [#tpu.dimension_semantics<parallel>, #tpu.dimension_semantics<parallel>, #tpu.dimension_semantics<arbitrary>], iteration_bounds = array<i64: 1, 1, 1>, scalar_prefetch = 0 : i64, scratch_operands = 1 : i64, tpu.core_type = #tpu.core_type<tc>, window_params = [{transform_indices = @transform_0, window_bounds = array<i64: 128, 128>}, {transform_indices = @transform_1, window_bounds = array<i64: 128, 128>}, {transform_indices = @transform_2, window_bounds = array<i64: 1, 128>}, {transform_indices = @transform_3, window_bounds = array<i64: 128, 128>}]} {
    %c0_i32 = arith.constant 0 : i32
    %0 = arith.cmpi eq, %arg2, %c0_i32 : i32
    %1 = arith.extui %0 : i1 to i32
    %c0_i32_0 = arith.constant 0 : i32
    %2 = arith.cmpi ne, %1, %c0_i32_0 : i32
    scf.if %2 {
      %cst_10 = arith.constant 0.000000e+00 : f32
      %12 = vector.broadcast %cst_10 : f32 to vector<128x128xf32>
      %c0_11 = arith.constant 0 : index
      %c0_12 = arith.constant 0 : index
      %13 = vector.load %arg7[%c0_11, %c0_12] : memref<128x128xf32, #tpu.memory_space<vmem>>, vector<128x128xf32>
      tpu.vector_store %arg7[%c0_11, %c0_12], %12 {strides = array<i32>} : memref<128x128xf32, #tpu.memory_space<vmem>>, vector<128x128xf32>,
    } else {
    }
    %c0 = arith.constant 0 : index
    %c0_1 = arith.constant 0 : index
    %3 = vector.load %arg7[%c0, %c0_1] : memref<128x128xf32, #tpu.memory_space<vmem>>, vector<128x128xf32>
    %c0_2 = arith.constant 0 : index
    %c0_3 = arith.constant 0 : index
    %4 = vector.load %arg3[%c0_2, %c0_3] : memref<128x128xbf16, #tpu.memory_space<vmem>>, vector<128x128xbf16>
    %c0_4 = arith.constant 0 : index
    %c0_5 = arith.constant 0 : index
    %5 = vector.load %arg4[%c0_4, %c0_5] : memref<128x128xbf16, #tpu.memory_space<vmem>>, vector<128x128xbf16>
    %cst = arith.constant dense<0.000000e+00> : vector<128x128xf32>
    %6 = tpu.matmul %4, %5, %cst {dimension_numbers = #tpu.dot_dimension_numbers<[1], [0], [0], [1], [0, 0, 1, 1], [], []>} : vector<128x128xbf16>, vector<128x128xbf16>, vector<128x128xf32> -> vector<128x128xf32>
    %7 = arith.addf %3, %6 : vector<128x128xf32>
    %c0_6 = arith.constant 0 : index
    %c0_7 = arith.constant 0 : index
    %8 = vector.load %arg7[%c0_6, %c0_7] : memref<128x128xf32, #tpu.memory_space<vmem>>, vector<128x128xf32>
    tpu.vector_store %arg7[%c0_6, %c0_7], %7 {strides = array<i32>} : memref<128x128xf32, #tpu.memory_space<vmem>>, vector<128x128xf32>,
    %c0_i32_8 = arith.constant 0 : i32
    %9 = arith.cmpi eq, %arg2, %c0_i32_8 : i32
    %10 = arith.extui %9 : i1 to i32
    %c0_i32_9 = arith.constant 0 : i32
    %11 = arith.cmpi ne, %10, %c0_i32_9 : i32
    scf.if %11 {
      %c0_10 = arith.constant 0 : index
      %c0_11 = arith.constant 0 : index
      %12 = vector.load %arg7[%c0_10, %c0_11] : memref<128x128xf32, #tpu.memory_space<vmem>>, vector<128x128xf32>
      %c0_12 = arith.constant 0 : index
      %c0_13 = arith.constant 0 : index
      %13 = vector.load %arg5[%c0_12, %c0_13] : memref<1x128xf32, #tpu.memory_space<vmem>>, vector<1x128xf32>
      %14 = vector.broadcast %13 : vector<1x128xf32> to vector<128x128xf32>
      %15 = arith.addf %12, %14 : vector<128x128xf32>
      %16 = arith.truncf %15 : vector<128x128xf32> to vector<128x128xbf16>
      %c0_14 = arith.constant 0 : index
      %c0_15 = arith.constant 0 : index
      %17 = vector.load %arg6[%c0_14, %c0_15] : memref<128x128xbf16, #tpu.memory_space<vmem>>, vector<128x128xbf16>
      tpu.vector_store %arg6[%c0_14, %c0_15], %16 {strides = array<i32>} : memref<128x128xbf16, #tpu.memory_space<vmem>>, vector<128x128xbf16>,
    } else {
    }
    return
  }
  func.func @transform_0(%arg0: i32, %arg1: i32, %arg2: i32) -> (i32, i32) {
    %c0_i32 = arith.constant 0 : i32
    return %arg0, %arg2 : i32, i32
  }
  func.func @transform_1(%arg0: i32, %arg1: i32, %arg2: i32) -> (i32, i32) {
    %c0_i32 = arith.constant 0 : i32
    return %arg2, %arg1 : i32, i32
  }
  func.func @transform_2(%arg0: i32, %arg1: i32, %arg2: i32) -> (i32, i32) {
    %c0_i32 = arith.constant 0 : i32
    %c0_i32_0 = arith.constant 0 : i32
    return %c0_i32, %arg1 : i32, i32
  }
  func.func @transform_3(%arg0: i32, %arg1: i32, %arg2: i32) -> (i32, i32) {
    %c0_i32 = arith.constant 0 : i32
    return %arg0, %arg1 : i32, i32
  }
}

module attributes {stable_mosaic.version = 11 : i64} {
  func.func @_matmul_kernel(%arg0: i32, %arg1: i32, %arg2: i32, %arg3: memref<128x128xbf16, #tpu.memory_space<vmem>>, %arg4: memref<128x128xbf16, #tpu.memory_space<vmem>>, %arg5: memref<1x128xf32, #tpu.memory_space<vmem>>, %arg6: memref<128x128xbf16, #tpu.memory_space<vmem>>, %arg7: memref<128x128xbf16, #tpu.memory_space<vmem>>, %arg8: memref<128x128xf32, #tpu.memory_space<vmem>>) attributes {dimension_semantics = [#tpu.dimension_semantics<parallel>, #tpu.dimension_semantics<parallel>, #tpu.dimension_semantics<arbitrary>], iteration_bounds = array<i64: 1, 1, 1>, scalar_prefetch = 0 : i64, scratch_operands = 1 : i64, tpu.core_type = #tpu.core_type<tc>, window_params = [{transform_indices = @transform_0, window_bounds = array<i64: 128, 128>}, {transform_indices = @transform_1, window_bounds = array<i64: 128, 128>}, {transform_indices = @transform_2, window_bounds = array<i64: 1, 128>}, {transform_indices = @transform_3, window_bounds = array<i64: 128, 128>}, {transform_indices = @transform_4, window_bounds = array<i64: 128, 128>}]} {
    %c0_i32 = arith.constant 0 : i32
    %0 = arith.cmpi eq, %arg2, %c0_i32 : i32
    %1 = arith.extui %0 : i1 to i32
    %c0_i32_0 = arith.constant 0 : i32
    %2 = arith.cmpi ne, %1, %c0_i32_0 : i32
    scf.if %2 {
      %cst_10 = arith.constant 0.000000e+00 : f32
      %12 = vector.broadcast %cst_10 : f32 to vector<128x128xf32>
      %c0_11 = arith.constant 0 : index
      %c0_12 = arith.constant 0 : index
      %13 = vector.load %arg8[%c0_11, %c0_12] : memref<128x128xf32, #tpu.memory_space<vmem>>, vector<128x128xf32>
      tpu.vector_store %arg8[%c0_11, %c0_12], %12 {strides = array<i32>} : memref<128x128xf32, #tpu.memory_space<vmem>>, vector<128x128xf32>,
    } else {
    }
    %c0 = arith.constant 0 : index
    %c0_1 = arith.constant 0 : index
    %3 = vector.load %arg8[%c0, %c0_1] : memref<128x128xf32, #tpu.memory_space<vmem>>, vector<128x128xf32>
    %c0_2 = arith.constant 0 : index
    %c0_3 = arith.constant 0 : index
    %4 = vector.load %arg3[%c0_2, %c0_3] : memref<128x128xbf16, #tpu.memory_space<vmem>>, vector<128x128xbf16>
    %c0_4 = arith.constant 0 : index
    %c0_5 = arith.constant 0 : index
    %5 = vector.load %arg4[%c0_4, %c0_5] : memref<128x128xbf16, #tpu.memory_space<vmem>>, vector<128x128xbf16>
    %cst = arith.constant dense<0.000000e+00> : vector<128x128xf32>
    %6 = tpu.matmul %4, %5, %cst {dimension_numbers = #tpu.dot_dimension_numbers<[1], [0], [0], [1], [0, 0, 1, 1], [], []>} : vector<128x128xbf16>, vector<128x128xbf16>, vector<128x128xf32> -> vector<128x128xf32>
    %7 = arith.addf %3, %6 : vector<128x128xf32>
    %c0_6 = arith.constant 0 : index
    %c0_7 = arith.constant 0 : index
    %8 = vector.load %arg8[%c0_6, %c0_7] : memref<128x128xf32, #tpu.memory_space<vmem>>, vector<128x128xf32>
    tpu.vector_store %arg8[%c0_6, %c0_7], %7 {strides = array<i32>} : memref<128x128xf32, #tpu.memory_space<vmem>>, vector<128x128xf32>,
    %c0_i32_8 = arith.constant 0 : i32
    %9 = arith.cmpi eq, %arg2, %c0_i32_8 : i32
    %10 = arith.extui %9 : i1 to i32
    %c0_i32_9 = arith.constant 0 : i32
    %11 = arith.cmpi ne, %10, %c0_i32_9 : i32
    scf.if %11 {
      %c0_10 = arith.constant 0 : index
      %c0_11 = arith.constant 0 : index
      %12 = vector.load %arg8[%c0_10, %c0_11] : memref<128x128xf32, #tpu.memory_space<vmem>>, vector<128x128xf32>
      %c0_12 = arith.constant 0 : index
      %c0_13 = arith.constant 0 : index
      %13 = vector.load %arg5[%c0_12, %c0_13] : memref<1x128xf32, #tpu.memory_space<vmem>>, vector<1x128xf32>
      %14 = vector.broadcast %13 : vector<1x128xf32> to vector<128x128xf32>
      %15 = arith.addf %12, %14 : vector<128x128xf32>
      %c0_14 = arith.constant 0 : index
      %c0_15 = arith.constant 0 : index
      %16 = vector.load %arg6[%c0_14, %c0_15] : memref<128x128xbf16, #tpu.memory_space<vmem>>, vector<128x128xbf16>
      %17 = arith.extf %16 : vector<128x128xbf16> to vector<128x128xf32>
      %18 = arith.addf %15, %17 : vector<128x128xf32>
      %cst_16 = arith.constant 0.000000e+00 : f32
      %19 = vector.broadcast %cst_16 : f32 to vector<128x128xf32>
      %20 = arith.maximumf %18, %19 : vector<128x128xf32>
      %21 = arith.truncf %20 : vector<128x128xf32> to vector<128x128xbf16>
      %c0_17 = arith.constant 0 : index
      %c0_18 = arith.constant 0 : index
      %22 = vector.load %arg7[%c0_17, %c0_18] : memref<128x128xbf16, #tpu.memory_space<vmem>>, vector<128x128xbf16>
      tpu.vector_store %arg7[%c0_17, %c0_18], %21 {strides = array<i32>} : memref<128x128xbf16, #tpu.memory_space<vmem>>, vector<128x128xbf16>,
    } else {
    }
    return
  }
  func.func @transform_0(%arg0: i32, %arg1: i32, %arg2: i32) -> (i32, i32) {
    %c0_i32 = arith.constant 0 : i32
    return %arg0, %arg2 : i32, i32
  }
  func.func @transform_1(%arg0: i32, %arg1: i32, %arg2: i32) -> (i32, i32) {
    %c0_i32 = arith.constant 0 : i32
    return %arg2, %arg1 : i32, i32
  }
  func.func @transform_2(%arg0: i32, %arg1: i32, %arg2: i32) -> (i32, i32) {
    %c0_i32 = arith.constant 0 : i32
    %c0_i32_0 = arith.constant 0 : i32
    return %c0_i32, %arg1 : i32, i32
  }
  func.func @transform_3(%arg0: i32, %arg1: i32, %arg2: i32) -> (i32, i32) {
    %c0_i32 = arith.constant 0 : i32
    return %arg0, %arg1 : i32, i32
  }
  func.func @transform_4(%arg0: i32, %arg1: i32, %arg2: i32) -> (i32, i32) {
    %c0_i32 = arith.constant 0 : i32
    return %arg0, %arg1 : i32, i32
  }
}

module attributes {stable_mosaic.version = 11 : i64} {
  func.func @_matmul_kernel(%arg0: i32, %arg1: i32, %arg2: i32, %arg3: memref<32x256xbf16, #tpu.memory_space<vmem>>, %arg4: memref<256x128xbf16, #tpu.memory_space<vmem>>, %arg5: memref<1x128xf32, #tpu.memory_space<vmem>>, %arg6: memref<32x128xbf16, #tpu.memory_space<vmem>>, %arg7: memref<32x128xf32, #tpu.memory_space<vmem>>) attributes {dimension_semantics = [#tpu.dimension_semantics<parallel>, #tpu.dimension_semantics<parallel>, #tpu.dimension_semantics<arbitrary>], iteration_bounds = array<i64: 1, 1, 1>, scalar_prefetch = 0 : i64, scratch_operands = 1 : i64, tpu.core_type = #tpu.core_type<tc>, window_params = [{transform_indices = @transform_0, window_bounds = array<i64: 32, 256>}, {transform_indices = @transform_1, window_bounds = array<i64: 256, 128>}, {transform_indices = @transform_2, window_bounds = array<i64: 1, 128>}, {transform_indices = @transform_3, window_bounds = array<i64: 32, 128>}]} {
    %c0_i32 = arith.constant 0 : i32
    %0 = arith.cmpi eq, %arg2, %c0_i32 : i32
    %1 = arith.extui %0 : i1 to i32
    %c0_i32_0 = arith.constant 0 : i32
    %2 = arith.cmpi ne, %1, %c0_i32_0 : i32
    scf.if %2 {
      %cst_10 = arith.constant 0.000000e+00 : f32
      %12 = vector.broadcast %cst_10 : f32 to vector<32x128xf32>
      %c0_11 = arith.constant 0 : index
      %c0_12 = arith.constant 0 : index
      %13 = vector.load %arg7[%c0_11, %c0_12] : memref<32x128xf32, #tpu.memory_space<vmem>>, vector<32x128xf32>
      tpu.vector_store %arg7[%c0_11, %c0_12], %12 {strides = array<i32>} : memref<32x128xf32, #tpu.memory_space<vmem>>, vector<32x128xf32>,
    } else {
    }
    %c0 = arith.constant 0 : index
    %c0_1 = arith.constant 0 : index
    %3 = vector.load %arg7[%c0, %c0_1] : memref<32x128xf32, #tpu.memory_space<vmem>>, vector<32x128xf32>
    %c0_2 = arith.constant 0 : index
    %c0_3 = arith.constant 0 : index
    %4 = vector.load %arg3[%c0_2, %c0_3] : memref<32x256xbf16, #tpu.memory_space<vmem>>, vector<32x256xbf16>
    %c0_4 = arith.constant 0 : index
    %c0_5 = arith.constant 0 : index
    %5 = vector.load %arg4[%c0_4, %c0_5] : memref<256x128xbf16, #tpu.memory_space<vmem>>, vector<256x128xbf16>
    %cst = arith.constant dense<0.000000e+00> : vector<32x128xf32>
    %6 = tpu.matmul %4, %5, %cst {dimension_numbers = #tpu.dot_dimension_numbers<[1], [0], [0], [1], [0, 0, 1, 1], [], []>} : vector<32x256xbf16>, vector<256x128xbf16>, vector<32x128xf32> -> vector<32x128xf32>
    %7 = arith.addf %3, %6 : vector<32x128xf32>
    %c0_6 = arith.constant 0 : index
    %c0_7 = arith.constant 0 : index
    %8 = vector.load %arg7[%c0_6, %c0_7] : memref<32x128xf32, #tpu.memory_space<vmem>>, vector<32x128xf32>
    tpu.vector_store %arg7[%c0_6, %c0_7], %7 {strides = array<i32>} : memref<32x128xf32, #tpu.memory_space<vmem>>, vector<32x128xf32>,
    %c0_i32_8 = arith.constant 0 : i32
    %9 = arith.cmpi eq, %arg2, %c0_i32_8 : i32
    %10 = arith.extui %9 : i1 to i32
    %c0_i32_9 = arith.constant 0 : i32
    %11 = arith.cmpi ne, %10, %c0_i32_9 : i32
    scf.if %11 {
      %c0_10 = arith.constant 0 : index
      %c0_11 = arith.constant 0 : index
      %12 = vector.load %arg7[%c0_10, %c0_11] : memref<32x128xf32, #tpu.memory_space<vmem>>, vector<32x128xf32>
      %c0_12 = arith.constant 0 : index
      %c0_13 = arith.constant 0 : index
      %13 = vector.load %arg5[%c0_12, %c0_13] : memref<1x128xf32, #tpu.memory_space<vmem>>, vector<1x128xf32>
      %14 = vector.broadcast %13 : vector<1x128xf32> to vector<32x128xf32>
      %15 = arith.addf %12, %14 : vector<32x128xf32>
      %cst_14 = arith.constant 0.000000e+00 : f32
      %16 = vector.broadcast %cst_14 : f32 to vector<32x128xf32>
      %17 = arith.maximumf %15, %16 : vector<32x128xf32>
      %18 = arith.truncf %17 : vector<32x128xf32> to vector<32x128xbf16>
      %c0_15 = arith.constant 0 : index
      %c0_16 = arith.constant 0 : index
      %19 = vector.load %arg6[%c0_15, %c0_16] : memref<32x128xbf16, #tpu.memory_space<vmem>>, vector<32x128xbf16>
      tpu.vector_store %arg6[%c0_15, %c0_16], %18 {strides = array<i32>} : memref<32x128xbf16, #tpu.memory_space<vmem>>, vector<32x128xbf16>,
    } else {
    }
    return
  }
  func.func @transform_0(%arg0: i32, %arg1: i32, %arg2: i32) -> (i32, i32) {
    %c0_i32 = arith.constant 0 : i32
    return %arg0, %arg2 : i32, i32
  }
  func.func @transform_1(%arg0: i32, %arg1: i32, %arg2: i32) -> (i32, i32) {
    %c0_i32 = arith.constant 0 : i32
    return %arg2, %arg1 : i32, i32
  }
  func.func @transform_2(%arg0: i32, %arg1: i32, %arg2: i32) -> (i32, i32) {
    %c0_i32 = arith.constant 0 : i32
    %c0_i32_0 = arith.constant 0 : i32
    return %c0_i32, %arg1 : i32, i32
  }
  func.func @transform_3(%arg0: i32, %arg1: i32, %arg2: i32) -> (i32, i32) {
    %c0_i32 = arith.constant 0 : i32
    return %arg0, %arg1 : i32, i32
  }
}

module attributes {stable_mosaic.version = 11 : i64} {
  func.func @_matmul_kernel(%arg0: i32, %arg1: i32, %arg2: i32, %arg3: memref<32x128xbf16, #tpu.memory_space<vmem>>, %arg4: memref<128x128xbf16, #tpu.memory_space<vmem>>, %arg5: memref<1x128xf32, #tpu.memory_space<vmem>>, %arg6: memref<32x128xbf16, #tpu.memory_space<vmem>>, %arg7: memref<32x128xf32, #tpu.memory_space<vmem>>) attributes {dimension_semantics = [#tpu.dimension_semantics<parallel>, #tpu.dimension_semantics<parallel>, #tpu.dimension_semantics<arbitrary>], iteration_bounds = array<i64: 1, 1, 1>, scalar_prefetch = 0 : i64, scratch_operands = 1 : i64, tpu.core_type = #tpu.core_type<tc>, window_params = [{transform_indices = @transform_0, window_bounds = array<i64: 32, 128>}, {transform_indices = @transform_1, window_bounds = array<i64: 128, 128>}, {transform_indices = @transform_2, window_bounds = array<i64: 1, 128>}, {transform_indices = @transform_3, window_bounds = array<i64: 32, 128>}]} {
    %c0_i32 = arith.constant 0 : i32
    %0 = arith.cmpi eq, %arg2, %c0_i32 : i32
    %1 = arith.extui %0 : i1 to i32
    %c0_i32_0 = arith.constant 0 : i32
    %2 = arith.cmpi ne, %1, %c0_i32_0 : i32
    scf.if %2 {
      %cst_10 = arith.constant 0.000000e+00 : f32
      %12 = vector.broadcast %cst_10 : f32 to vector<32x128xf32>
      %c0_11 = arith.constant 0 : index
      %c0_12 = arith.constant 0 : index
      %13 = vector.load %arg7[%c0_11, %c0_12] : memref<32x128xf32, #tpu.memory_space<vmem>>, vector<32x128xf32>
      tpu.vector_store %arg7[%c0_11, %c0_12], %12 {strides = array<i32>} : memref<32x128xf32, #tpu.memory_space<vmem>>, vector<32x128xf32>,
    } else {
    }
    %c0 = arith.constant 0 : index
    %c0_1 = arith.constant 0 : index
    %3 = vector.load %arg7[%c0, %c0_1] : memref<32x128xf32, #tpu.memory_space<vmem>>, vector<32x128xf32>
    %c0_2 = arith.constant 0 : index
    %c0_3 = arith.constant 0 : index
    %4 = vector.load %arg3[%c0_2, %c0_3] : memref<32x128xbf16, #tpu.memory_space<vmem>>, vector<32x128xbf16>
    %c0_4 = arith.constant 0 : index
    %c0_5 = arith.constant 0 : index
    %5 = vector.load %arg4[%c0_4, %c0_5] : memref<128x128xbf16, #tpu.memory_space<vmem>>, vector<128x128xbf16>
    %cst = arith.constant dense<0.000000e+00> : vector<32x128xf32>
    %6 = tpu.matmul %4, %5, %cst {dimension_numbers = #tpu.dot_dimension_numbers<[1], [0], [0], [1], [0, 0, 1, 1], [], []>} : vector<32x128xbf16>, vector<128x128xbf16>, vector<32x128xf32> -> vector<32x128xf32>
    %7 = arith.addf %3, %6 : vector<32x128xf32>
    %c0_6 = arith.constant 0 : index
    %c0_7 = arith.constant 0 : index
    %8 = vector.load %arg7[%c0_6, %c0_7] : memref<32x128xf32, #tpu.memory_space<vmem>>, vector<32x128xf32>
    tpu.vector_store %arg7[%c0_6, %c0_7], %7 {strides = array<i32>} : memref<32x128xf32, #tpu.memory_space<vmem>>, vector<32x128xf32>,
    %c0_i32_8 = arith.constant 0 : i32
    %9 = arith.cmpi eq, %arg2, %c0_i32_8 : i32
    %10 = arith.extui %9 : i1 to i32
    %c0_i32_9 = arith.constant 0 : i32
    %11 = arith.cmpi ne, %10, %c0_i32_9 : i32
    scf.if %11 {
      %c0_10 = arith.constant 0 : index
      %c0_11 = arith.constant 0 : index
      %12 = vector.load %arg7[%c0_10, %c0_11] : memref<32x128xf32, #tpu.memory_space<vmem>>, vector<32x128xf32>
      %c0_12 = arith.constant 0 : index
      %c0_13 = arith.constant 0 : index
      %13 = vector.load %arg5[%c0_12, %c0_13] : memref<1x128xf32, #tpu.memory_space<vmem>>, vector<1x128xf32>
      %14 = vector.broadcast %13 : vector<1x128xf32> to vector<32x128xf32>
      %15 = arith.addf %12, %14 : vector<32x128xf32>
      %16 = arith.truncf %15 : vector<32x128xf32> to vector<32x128xbf16>
      %c0_14 = arith.constant 0 : index
      %c0_15 = arith.constant 0 : index
      %17 = vector.load %arg6[%c0_14, %c0_15] : memref<32x128xbf16, #tpu.memory_space<vmem>>, vector<32x128xbf16>
      tpu.vector_store %arg6[%c0_14, %c0_15], %16 {strides = array<i32>} : memref<32x128xbf16, #tpu.memory_space<vmem>>, vector<32x128xbf16>,
    } else {
    }
    return
  }
  func.func @transform_0(%arg0: i32, %arg1: i32, %arg2: i32) -> (i32, i32) {
    %c0_i32 = arith.constant 0 : i32
    return %arg0, %arg2 : i32, i32
  }
  func.func @transform_1(%arg0: i32, %arg1: i32, %arg2: i32) -> (i32, i32) {
    %c0_i32 = arith.constant 0 : i32
    return %arg2, %arg1 : i32, i32
  }
  func.func @transform_2(%arg0: i32, %arg1: i32, %arg2: i32) -> (i32, i32) {
    %c0_i32 = arith.constant 0 : i32
    %c0_i32_0 = arith.constant 0 : i32
    return %c0_i32, %arg1 : i32, i32
  }
  func.func @transform_3(%arg0: i32, %arg1: i32, %arg2: i32) -> (i32, i32) {
    %c0_i32 = arith.constant 0 : i32
    return %arg0, %arg1 : i32, i32
  }
}

module attributes {stable_mosaic.version = 11 : i64} {
  func.func @_matmul_kernel(%arg0: i32, %arg1: i32, %arg2: i32, %arg3: memref<32x128xbf16, #tpu.memory_space<vmem>>, %arg4: memref<128x128xbf16, #tpu.memory_space<vmem>>, %arg5: memref<1x128xf32, #tpu.memory_space<vmem>>, %arg6: memref<32x128xbf16, #tpu.memory_space<vmem>>, %arg7: memref<32x128xf32, #tpu.memory_space<vmem>>) attributes {dimension_semantics = [#tpu.dimension_semantics<parallel>, #tpu.dimension_semantics<parallel>, #tpu.dimension_semantics<arbitrary>], iteration_bounds = array<i64: 1, 1, 1>, scalar_prefetch = 0 : i64, scratch_operands = 1 : i64, tpu.core_type = #tpu.core_type<tc>, window_params = [{transform_indices = @transform_0, window_bounds = array<i64: 32, 128>}, {transform_indices = @transform_1, window_bounds = array<i64: 128, 128>}, {transform_indices = @transform_2, window_bounds = array<i64: 1, 128>}, {transform_indices = @transform_3, window_bounds = array<i64: 32, 128>}]} {
    %c0_i32 = arith.constant 0 : i32
    %0 = arith.cmpi eq, %arg2, %c0_i32 : i32
    %1 = arith.extui %0 : i1 to i32
    %c0_i32_0 = arith.constant 0 : i32
    %2 = arith.cmpi ne, %1, %c0_i32_0 : i32
    scf.if %2 {
      %cst_10 = arith.constant 0.000000e+00 : f32
      %12 = vector.broadcast %cst_10 : f32 to vector<32x128xf32>
      %c0_11 = arith.constant 0 : index
      %c0_12 = arith.constant 0 : index
      %13 = vector.load %arg7[%c0_11, %c0_12] : memref<32x128xf32, #tpu.memory_space<vmem>>, vector<32x128xf32>
      tpu.vector_store %arg7[%c0_11, %c0_12], %12 {strides = array<i32>} : memref<32x128xf32, #tpu.memory_space<vmem>>, vector<32x128xf32>,
    } else {
    }
    %c0 = arith.constant 0 : index
    %c0_1 = arith.constant 0 : index
    %3 = vector.load %arg7[%c0, %c0_1] : memref<32x128xf32, #tpu.memory_space<vmem>>, vector<32x128xf32>
    %c0_2 = arith.constant 0 : index
    %c0_3 = arith.constant 0 : index
    %4 = vector.load %arg3[%c0_2, %c0_3] : memref<32x128xbf16, #tpu.memory_space<vmem>>, vector<32x128xbf16>
    %c0_4 = arith.constant 0 : index
    %c0_5 = arith.constant 0 : index
    %5 = vector.load %arg4[%c0_4, %c0_5] : memref<128x128xbf16, #tpu.memory_space<vmem>>, vector<128x128xbf16>
    %cst = arith.constant dense<0.000000e+00> : vector<32x128xf32>
    %6 = tpu.matmul %4, %5, %cst {dimension_numbers = #tpu.dot_dimension_numbers<[1], [0], [0], [1], [0, 0, 1, 1], [], []>} : vector<32x128xbf16>, vector<128x128xbf16>, vector<32x128xf32> -> vector<32x128xf32>
    %7 = arith.addf %3, %6 : vector<32x128xf32>
    %c0_6 = arith.constant 0 : index
    %c0_7 = arith.constant 0 : index
    %8 = vector.load %arg7[%c0_6, %c0_7] : memref<32x128xf32, #tpu.memory_space<vmem>>, vector<32x128xf32>
    tpu.vector_store %arg7[%c0_6, %c0_7], %7 {strides = array<i32>} : memref<32x128xf32, #tpu.memory_space<vmem>>, vector<32x128xf32>,
    %c0_i32_8 = arith.constant 0 : i32
    %9 = arith.cmpi eq, %arg2, %c0_i32_8 : i32
    %10 = arith.extui %9 : i1 to i32
    %c0_i32_9 = arith.constant 0 : i32
    %11 = arith.cmpi ne, %10, %c0_i32_9 : i32
    scf.if %11 {
      %c0_10 = arith.constant 0 : index
      %c0_11 = arith.constant 0 : index
      %12 = vector.load %arg7[%c0_10, %c0_11] : memref<32x128xf32, #tpu.memory_space<vmem>>, vector<32x128xf32>
      %c0_12 = arith.constant 0 : index
      %c0_13 = arith.constant 0 : index
      %13 = vector.load %arg5[%c0_12, %c0_13] : memref<1x128xf32, #tpu.memory_space<vmem>>, vector<1x128xf32>
      %14 = vector.broadcast %13 : vector<1x128xf32> to vector<32x128xf32>
      %15 = arith.addf %12, %14 : vector<32x128xf32>
      %cst_14 = arith.constant 0.000000e+00 : f32
      %16 = vector.broadcast %cst_14 : f32 to vector<32x128xf32>
      %17 = arith.maximumf %15, %16 : vector<32x128xf32>
      %18 = arith.truncf %17 : vector<32x128xf32> to vector<32x128xbf16>
      %c0_15 = arith.constant 0 : index
      %c0_16 = arith.constant 0 : index
      %19 = vector.load %arg6[%c0_15, %c0_16] : memref<32x128xbf16, #tpu.memory_space<vmem>>, vector<32x128xbf16>
      tpu.vector_store %arg6[%c0_15, %c0_16], %18 {strides = array<i32>} : memref<32x128xbf16, #tpu.memory_space<vmem>>, vector<32x128xbf16>,
    } else {
    }
    return
  }
  func.func @transform_0(%arg0: i32, %arg1: i32, %arg2: i32) -> (i32, i32) {
    %c0_i32 = arith.constant 0 : i32
    return %arg0, %arg2 : i32, i32
  }
  func.func @transform_1(%arg0: i32, %arg1: i32, %arg2: i32) -> (i32, i32) {
    %c0_i32 = arith.constant 0 : i32
    return %arg2, %arg1 : i32, i32
  }
  func.func @transform_2(%arg0: i32, %arg1: i32, %arg2: i32) -> (i32, i32) {
    %c0_i32 = arith.constant 0 : i32
    %c0_i32_0 = arith.constant 0 : i32
    return %c0_i32, %arg1 : i32, i32
  }
  func.func @transform_3(%arg0: i32, %arg1: i32, %arg2: i32) -> (i32, i32) {
    %c0_i32 = arith.constant 0 : i32
    return %arg0, %arg1 : i32, i32
  }
}

module attributes {stable_mosaic.version = 11 : i64} {
  func.func @_matmul_kernel(%arg0: i32, %arg1: i32, %arg2: i32, %arg3: memref<32x128xbf16, #tpu.memory_space<vmem>>, %arg4: memref<128x128xbf16, #tpu.memory_space<vmem>>, %arg5: memref<1x128xf32, #tpu.memory_space<vmem>>, %arg6: memref<32x128xbf16, #tpu.memory_space<vmem>>, %arg7: memref<32x128xbf16, #tpu.memory_space<vmem>>, %arg8: memref<32x128xf32, #tpu.memory_space<vmem>>) attributes {dimension_semantics = [#tpu.dimension_semantics<parallel>, #tpu.dimension_semantics<parallel>, #tpu.dimension_semantics<arbitrary>], iteration_bounds = array<i64: 1, 1, 1>, scalar_prefetch = 0 : i64, scratch_operands = 1 : i64, tpu.core_type = #tpu.core_type<tc>, window_params = [{transform_indices = @transform_0, window_bounds = array<i64: 32, 128>}, {transform_indices = @transform_1, window_bounds = array<i64: 128, 128>}, {transform_indices = @transform_2, window_bounds = array<i64: 1, 128>}, {transform_indices = @transform_3, window_bounds = array<i64: 32, 128>}, {transform_indices = @transform_4, window_bounds = array<i64: 32, 128>}]} {
    %c0_i32 = arith.constant 0 : i32
    %0 = arith.cmpi eq, %arg2, %c0_i32 : i32
    %1 = arith.extui %0 : i1 to i32
    %c0_i32_0 = arith.constant 0 : i32
    %2 = arith.cmpi ne, %1, %c0_i32_0 : i32
    scf.if %2 {
      %cst_10 = arith.constant 0.000000e+00 : f32
      %12 = vector.broadcast %cst_10 : f32 to vector<32x128xf32>
      %c0_11 = arith.constant 0 : index
      %c0_12 = arith.constant 0 : index
      %13 = vector.load %arg8[%c0_11, %c0_12] : memref<32x128xf32, #tpu.memory_space<vmem>>, vector<32x128xf32>
      tpu.vector_store %arg8[%c0_11, %c0_12], %12 {strides = array<i32>} : memref<32x128xf32, #tpu.memory_space<vmem>>, vector<32x128xf32>,
    } else {
    }
    %c0 = arith.constant 0 : index
    %c0_1 = arith.constant 0 : index
    %3 = vector.load %arg8[%c0, %c0_1] : memref<32x128xf32, #tpu.memory_space<vmem>>, vector<32x128xf32>
    %c0_2 = arith.constant 0 : index
    %c0_3 = arith.constant 0 : index
    %4 = vector.load %arg3[%c0_2, %c0_3] : memref<32x128xbf16, #tpu.memory_space<vmem>>, vector<32x128xbf16>
    %c0_4 = arith.constant 0 : index
    %c0_5 = arith.constant 0 : index
    %5 = vector.load %arg4[%c0_4, %c0_5] : memref<128x128xbf16, #tpu.memory_space<vmem>>, vector<128x128xbf16>
    %cst = arith.constant dense<0.000000e+00> : vector<32x128xf32>
    %6 = tpu.matmul %4, %5, %cst {dimension_numbers = #tpu.dot_dimension_numbers<[1], [0], [0], [1], [0, 0, 1, 1], [], []>} : vector<32x128xbf16>, vector<128x128xbf16>, vector<32x128xf32> -> vector<32x128xf32>
    %7 = arith.addf %3, %6 : vector<32x128xf32>
    %c0_6 = arith.constant 0 : index
    %c0_7 = arith.constant 0 : index
    %8 = vector.load %arg8[%c0_6, %c0_7] : memref<32x128xf32, #tpu.memory_space<vmem>>, vector<32x128xf32>
    tpu.vector_store %arg8[%c0_6, %c0_7], %7 {strides = array<i32>} : memref<32x128xf32, #tpu.memory_space<vmem>>, vector<32x128xf32>,
    %c0_i32_8 = arith.constant 0 : i32
    %9 = arith.cmpi eq, %arg2, %c0_i32_8 : i32
    %10 = arith.extui %9 : i1 to i32
    %c0_i32_9 = arith.constant 0 : i32
    %11 = arith.cmpi ne, %10, %c0_i32_9 : i32
    scf.if %11 {
      %c0_10 = arith.constant 0 : index
      %c0_11 = arith.constant 0 : index
      %12 = vector.load %arg8[%c0_10, %c0_11] : memref<32x128xf32, #tpu.memory_space<vmem>>, vector<32x128xf32>
      %c0_12 = arith.constant 0 : index
      %c0_13 = arith.constant 0 : index
      %13 = vector.load %arg5[%c0_12, %c0_13] : memref<1x128xf32, #tpu.memory_space<vmem>>, vector<1x128xf32>
      %14 = vector.broadcast %13 : vector<1x128xf32> to vector<32x128xf32>
      %15 = arith.addf %12, %14 : vector<32x128xf32>
      %c0_14 = arith.constant 0 : index
      %c0_15 = arith.constant 0 : index
      %16 = vector.load %arg6[%c0_14, %c0_15] : memref<32x128xbf16, #tpu.memory_space<vmem>>, vector<32x128xbf16>
      %17 = arith.extf %16 : vector<32x128xbf16> to vector<32x128xf32>
      %18 = arith.addf %15, %17 : vector<32x128xf32>
      %cst_16 = arith.constant 0.000000e+00 : f32
      %19 = vector.broadcast %cst_16 : f32 to vector<32x128xf32>
      %20 = arith.maximumf %18, %19 : vector<32x128xf32>
      %21 = arith.truncf %20 : vector<32x128xf32> to vector<32x128xbf16>
      %c0_17 = arith.constant 0 : index
      %c0_18 = arith.constant 0 : index
      %22 = vector.load %arg7[%c0_17, %c0_18] : memref<32x128xbf16, #tpu.memory_space<vmem>>, vector<32x128xbf16>
      tpu.vector_store %arg7[%c0_17, %c0_18], %21 {strides = array<i32>} : memref<32x128xbf16, #tpu.memory_space<vmem>>, vector<32x128xbf16>,
    } else {
    }
    return
  }
  func.func @transform_0(%arg0: i32, %arg1: i32, %arg2: i32) -> (i32, i32) {
    %c0_i32 = arith.constant 0 : i32
    return %arg0, %arg2 : i32, i32
  }
  func.func @transform_1(%arg0: i32, %arg1: i32, %arg2: i32) -> (i32, i32) {
    %c0_i32 = arith.constant 0 : i32
    return %arg2, %arg1 : i32, i32
  }
  func.func @transform_2(%arg0: i32, %arg1: i32, %arg2: i32) -> (i32, i32) {
    %c0_i32 = arith.constant 0 : i32
    %c0_i32_0 = arith.constant 0 : i32
    return %c0_i32, %arg1 : i32, i32
  }
  func.func @transform_3(%arg0: i32, %arg1: i32, %arg2: i32) -> (i32, i32) {
    %c0_i32 = arith.constant 0 : i32
    return %arg0, %arg1 : i32, i32
  }
  func.func @transform_4(%arg0: i32, %arg1: i32, %arg2: i32) -> (i32, i32) {
    %c0_i32 = arith.constant 0 : i32
    return %arg0, %arg1 : i32, i32
  }
}

module attributes {stable_mosaic.version = 11 : i64} {
  func.func @_matmul_kernel(%arg0: i32, %arg1: i32, %arg2: i32, %arg3: memref<8x384xbf16, #tpu.memory_space<vmem>>, %arg4: memref<384x128xbf16, #tpu.memory_space<vmem>>, %arg5: memref<1x128xf32, #tpu.memory_space<vmem>>, %arg6: memref<8x128xbf16, #tpu.memory_space<vmem>>, %arg7: memref<8x128xf32, #tpu.memory_space<vmem>>) attributes {dimension_semantics = [#tpu.dimension_semantics<parallel>, #tpu.dimension_semantics<parallel>, #tpu.dimension_semantics<arbitrary>], iteration_bounds = array<i64: 1, 1, 1>, scalar_prefetch = 0 : i64, scratch_operands = 1 : i64, tpu.core_type = #tpu.core_type<tc>, window_params = [{transform_indices = @transform_0, window_bounds = array<i64: 8, 384>}, {transform_indices = @transform_1, window_bounds = array<i64: 384, 128>}, {transform_indices = @transform_2, window_bounds = array<i64: 1, 128>}, {transform_indices = @transform_3, window_bounds = array<i64: 8, 128>}]} {
    %c0_i32 = arith.constant 0 : i32
    %0 = arith.cmpi eq, %arg2, %c0_i32 : i32
    %1 = arith.extui %0 : i1 to i32
    %c0_i32_0 = arith.constant 0 : i32
    %2 = arith.cmpi ne, %1, %c0_i32_0 : i32
    scf.if %2 {
      %cst_10 = arith.constant 0.000000e+00 : f32
      %12 = vector.broadcast %cst_10 : f32 to vector<8x128xf32>
      %c0_11 = arith.constant 0 : index
      %c0_12 = arith.constant 0 : index
      %13 = vector.load %arg7[%c0_11, %c0_12] : memref<8x128xf32, #tpu.memory_space<vmem>>, vector<8x128xf32>
      tpu.vector_store %arg7[%c0_11, %c0_12], %12 {strides = array<i32>} : memref<8x128xf32, #tpu.memory_space<vmem>>, vector<8x128xf32>,
    } else {
    }
    %c0 = arith.constant 0 : index
    %c0_1 = arith.constant 0 : index
    %3 = vector.load %arg7[%c0, %c0_1] : memref<8x128xf32, #tpu.memory_space<vmem>>, vector<8x128xf32>
    %c0_2 = arith.constant 0 : index
    %c0_3 = arith.constant 0 : index
    %4 = vector.load %arg3[%c0_2, %c0_3] : memref<8x384xbf16, #tpu.memory_space<vmem>>, vector<8x384xbf16>
    %c0_4 = arith.constant 0 : index
    %c0_5 = arith.constant 0 : index
    %5 = vector.load %arg4[%c0_4, %c0_5] : memref<384x128xbf16, #tpu.memory_space<vmem>>, vector<384x128xbf16>
    %cst = arith.constant dense<0.000000e+00> : vector<8x128xf32>
    %6 = tpu.matmul %4, %5, %cst {dimension_numbers = #tpu.dot_dimension_numbers<[1], [0], [0], [1], [0, 0, 1, 1], [], []>} : vector<8x384xbf16>, vector<384x128xbf16>, vector<8x128xf32> -> vector<8x128xf32>
    %7 = arith.addf %3, %6 : vector<8x128xf32>
    %c0_6 = arith.constant 0 : index
    %c0_7 = arith.constant 0 : index
    %8 = vector.load %arg7[%c0_6, %c0_7] : memref<8x128xf32, #tpu.memory_space<vmem>>, vector<8x128xf32>
    tpu.vector_store %arg7[%c0_6, %c0_7], %7 {strides = array<i32>} : memref<8x128xf32, #tpu.memory_space<vmem>>, vector<8x128xf32>,
    %c0_i32_8 = arith.constant 0 : i32
    %9 = arith.cmpi eq, %arg2, %c0_i32_8 : i32
    %10 = arith.extui %9 : i1 to i32
    %c0_i32_9 = arith.constant 0 : i32
    %11 = arith.cmpi ne, %10, %c0_i32_9 : i32
    scf.if %11 {
      %c0_10 = arith.constant 0 : index
      %c0_11 = arith.constant 0 : index
      %12 = vector.load %arg7[%c0_10, %c0_11] : memref<8x128xf32, #tpu.memory_space<vmem>>, vector<8x128xf32>
      %c0_12 = arith.constant 0 : index
      %c0_13 = arith.constant 0 : index
      %13 = vector.load %arg5[%c0_12, %c0_13] : memref<1x128xf32, #tpu.memory_space<vmem>>, vector<1x128xf32>
      %14 = vector.broadcast %13 : vector<1x128xf32> to vector<8x128xf32>
      %15 = arith.addf %12, %14 : vector<8x128xf32>
      %cst_14 = arith.constant 0.000000e+00 : f32
      %16 = vector.broadcast %cst_14 : f32 to vector<8x128xf32>
      %17 = arith.maximumf %15, %16 : vector<8x128xf32>
      %18 = arith.truncf %17 : vector<8x128xf32> to vector<8x128xbf16>
      %c0_15 = arith.constant 0 : index
      %c0_16 = arith.constant 0 : index
      %19 = vector.load %arg6[%c0_15, %c0_16] : memref<8x128xbf16, #tpu.memory_space<vmem>>, vector<8x128xbf16>
      tpu.vector_store %arg6[%c0_15, %c0_16], %18 {strides = array<i32>} : memref<8x128xbf16, #tpu.memory_space<vmem>>, vector<8x128xbf16>,
    } else {
    }
    return
  }
  func.func @transform_0(%arg0: i32, %arg1: i32, %arg2: i32) -> (i32, i32) {
    %c0_i32 = arith.constant 0 : i32
    return %arg0, %arg2 : i32, i32
  }
  func.func @transform_1(%arg0: i32, %arg1: i32, %arg2: i32) -> (i32, i32) {
    %c0_i32 = arith.constant 0 : i32
    return %arg2, %arg1 : i32, i32
  }
  func.func @transform_2(%arg0: i32, %arg1: i32, %arg2: i32) -> (i32, i32) {
    %c0_i32 = arith.constant 0 : i32
    %c0_i32_0 = arith.constant 0 : i32
    return %c0_i32, %arg1 : i32, i32
  }
  func.func @transform_3(%arg0: i32, %arg1: i32, %arg2: i32) -> (i32, i32) {
    %c0_i32 = arith.constant 0 : i32
    return %arg0, %arg1 : i32, i32
  }
}

module attributes {stable_mosaic.version = 11 : i64} {
  func.func @_matmul_kernel(%arg0: i32, %arg1: i32, %arg2: i32, %arg3: memref<8x128xbf16, #tpu.memory_space<vmem>>, %arg4: memref<128x128xbf16, #tpu.memory_space<vmem>>, %arg5: memref<1x128xf32, #tpu.memory_space<vmem>>, %arg6: memref<8x128xbf16, #tpu.memory_space<vmem>>, %arg7: memref<8x128xf32, #tpu.memory_space<vmem>>) attributes {dimension_semantics = [#tpu.dimension_semantics<parallel>, #tpu.dimension_semantics<parallel>, #tpu.dimension_semantics<arbitrary>], iteration_bounds = array<i64: 1, 1, 1>, scalar_prefetch = 0 : i64, scratch_operands = 1 : i64, tpu.core_type = #tpu.core_type<tc>, window_params = [{transform_indices = @transform_0, window_bounds = array<i64: 8, 128>}, {transform_indices = @transform_1, window_bounds = array<i64: 128, 128>}, {transform_indices = @transform_2, window_bounds = array<i64: 1, 128>}, {transform_indices = @transform_3, window_bounds = array<i64: 8, 128>}]} {
    %c0_i32 = arith.constant 0 : i32
    %0 = arith.cmpi eq, %arg2, %c0_i32 : i32
    %1 = arith.extui %0 : i1 to i32
    %c0_i32_0 = arith.constant 0 : i32
    %2 = arith.cmpi ne, %1, %c0_i32_0 : i32
    scf.if %2 {
      %cst_10 = arith.constant 0.000000e+00 : f32
      %12 = vector.broadcast %cst_10 : f32 to vector<8x128xf32>
      %c0_11 = arith.constant 0 : index
      %c0_12 = arith.constant 0 : index
      %13 = vector.load %arg7[%c0_11, %c0_12] : memref<8x128xf32, #tpu.memory_space<vmem>>, vector<8x128xf32>
      tpu.vector_store %arg7[%c0_11, %c0_12], %12 {strides = array<i32>} : memref<8x128xf32, #tpu.memory_space<vmem>>, vector<8x128xf32>,
    } else {
    }
    %c0 = arith.constant 0 : index
    %c0_1 = arith.constant 0 : index
    %3 = vector.load %arg7[%c0, %c0_1] : memref<8x128xf32, #tpu.memory_space<vmem>>, vector<8x128xf32>
    %c0_2 = arith.constant 0 : index
    %c0_3 = arith.constant 0 : index
    %4 = vector.load %arg3[%c0_2, %c0_3] : memref<8x128xbf16, #tpu.memory_space<vmem>>, vector<8x128xbf16>
    %c0_4 = arith.constant 0 : index
    %c0_5 = arith.constant 0 : index
    %5 = vector.load %arg4[%c0_4, %c0_5] : memref<128x128xbf16, #tpu.memory_space<vmem>>, vector<128x128xbf16>
    %cst = arith.constant dense<0.000000e+00> : vector<8x128xf32>
    %6 = tpu.matmul %4, %5, %cst {dimension_numbers = #tpu.dot_dimension_numbers<[1], [0], [0], [1], [0, 0, 1, 1], [], []>} : vector<8x128xbf16>, vector<128x128xbf16>, vector<8x128xf32> -> vector<8x128xf32>
    %7 = arith.addf %3, %6 : vector<8x128xf32>
    %c0_6 = arith.constant 0 : index
    %c0_7 = arith.constant 0 : index
    %8 = vector.load %arg7[%c0_6, %c0_7] : memref<8x128xf32, #tpu.memory_space<vmem>>, vector<8x128xf32>
    tpu.vector_store %arg7[%c0_6, %c0_7], %7 {strides = array<i32>} : memref<8x128xf32, #tpu.memory_space<vmem>>, vector<8x128xf32>,
    %c0_i32_8 = arith.constant 0 : i32
    %9 = arith.cmpi eq, %arg2, %c0_i32_8 : i32
    %10 = arith.extui %9 : i1 to i32
    %c0_i32_9 = arith.constant 0 : i32
    %11 = arith.cmpi ne, %10, %c0_i32_9 : i32
    scf.if %11 {
      %c0_10 = arith.constant 0 : index
      %c0_11 = arith.constant 0 : index
      %12 = vector.load %arg7[%c0_10, %c0_11] : memref<8x128xf32, #tpu.memory_space<vmem>>, vector<8x128xf32>
      %c0_12 = arith.constant 0 : index
      %c0_13 = arith.constant 0 : index
      %13 = vector.load %arg5[%c0_12, %c0_13] : memref<1x128xf32, #tpu.memory_space<vmem>>, vector<1x128xf32>
      %14 = vector.broadcast %13 : vector<1x128xf32> to vector<8x128xf32>
      %15 = arith.addf %12, %14 : vector<8x128xf32>
      %16 = arith.truncf %15 : vector<8x128xf32> to vector<8x128xbf16>
      %c0_14 = arith.constant 0 : index
      %c0_15 = arith.constant 0 : index
      %17 = vector.load %arg6[%c0_14, %c0_15] : memref<8x128xbf16, #tpu.memory_space<vmem>>, vector<8x128xbf16>
      tpu.vector_store %arg6[%c0_14, %c0_15], %16 {strides = array<i32>} : memref<8x128xbf16, #tpu.memory_space<vmem>>, vector<8x128xbf16>,
    } else {
    }
    return
  }
  func.func @transform_0(%arg0: i32, %arg1: i32, %arg2: i32) -> (i32, i32) {
    %c0_i32 = arith.constant 0 : i32
    return %arg0, %arg2 : i32, i32
  }
  func.func @transform_1(%arg0: i32, %arg1: i32, %arg2: i32) -> (i32, i32) {
    %c0_i32 = arith.constant 0 : i32
    return %arg2, %arg1 : i32, i32
  }
  func.func @transform_2(%arg0: i32, %arg1: i32, %arg2: i32) -> (i32, i32) {
    %c0_i32 = arith.constant 0 : i32
    %c0_i32_0 = arith.constant 0 : i32
    return %c0_i32, %arg1 : i32, i32
  }
  func.func @transform_3(%arg0: i32, %arg1: i32, %arg2: i32) -> (i32, i32) {
    %c0_i32 = arith.constant 0 : i32
    return %arg0, %arg1 : i32, i32
  }
}

module attributes {stable_mosaic.version = 11 : i64} {
  func.func @_matmul_kernel(%arg0: i32, %arg1: i32, %arg2: i32, %arg3: memref<8x128xbf16, #tpu.memory_space<vmem>>, %arg4: memref<128x128xbf16, #tpu.memory_space<vmem>>, %arg5: memref<1x128xf32, #tpu.memory_space<vmem>>, %arg6: memref<8x128xbf16, #tpu.memory_space<vmem>>, %arg7: memref<8x128xbf16, #tpu.memory_space<vmem>>, %arg8: memref<8x128xf32, #tpu.memory_space<vmem>>) attributes {dimension_semantics = [#tpu.dimension_semantics<parallel>, #tpu.dimension_semantics<parallel>, #tpu.dimension_semantics<arbitrary>], iteration_bounds = array<i64: 1, 1, 1>, scalar_prefetch = 0 : i64, scratch_operands = 1 : i64, tpu.core_type = #tpu.core_type<tc>, window_params = [{transform_indices = @transform_0, window_bounds = array<i64: 8, 128>}, {transform_indices = @transform_1, window_bounds = array<i64: 128, 128>}, {transform_indices = @transform_2, window_bounds = array<i64: 1, 128>}, {transform_indices = @transform_3, window_bounds = array<i64: 8, 128>}, {transform_indices = @transform_4, window_bounds = array<i64: 8, 128>}]} {
    %c0_i32 = arith.constant 0 : i32
    %0 = arith.cmpi eq, %arg2, %c0_i32 : i32
    %1 = arith.extui %0 : i1 to i32
    %c0_i32_0 = arith.constant 0 : i32
    %2 = arith.cmpi ne, %1, %c0_i32_0 : i32
    scf.if %2 {
      %cst_10 = arith.constant 0.000000e+00 : f32
      %12 = vector.broadcast %cst_10 : f32 to vector<8x128xf32>
      %c0_11 = arith.constant 0 : index
      %c0_12 = arith.constant 0 : index
      %13 = vector.load %arg8[%c0_11, %c0_12] : memref<8x128xf32, #tpu.memory_space<vmem>>, vector<8x128xf32>
      tpu.vector_store %arg8[%c0_11, %c0_12], %12 {strides = array<i32>} : memref<8x128xf32, #tpu.memory_space<vmem>>, vector<8x128xf32>,
    } else {
    }
    %c0 = arith.constant 0 : index
    %c0_1 = arith.constant 0 : index
    %3 = vector.load %arg8[%c0, %c0_1] : memref<8x128xf32, #tpu.memory_space<vmem>>, vector<8x128xf32>
    %c0_2 = arith.constant 0 : index
    %c0_3 = arith.constant 0 : index
    %4 = vector.load %arg3[%c0_2, %c0_3] : memref<8x128xbf16, #tpu.memory_space<vmem>>, vector<8x128xbf16>
    %c0_4 = arith.constant 0 : index
    %c0_5 = arith.constant 0 : index
    %5 = vector.load %arg4[%c0_4, %c0_5] : memref<128x128xbf16, #tpu.memory_space<vmem>>, vector<128x128xbf16>
    %cst = arith.constant dense<0.000000e+00> : vector<8x128xf32>
    %6 = tpu.matmul %4, %5, %cst {dimension_numbers = #tpu.dot_dimension_numbers<[1], [0], [0], [1], [0, 0, 1, 1], [], []>} : vector<8x128xbf16>, vector<128x128xbf16>, vector<8x128xf32> -> vector<8x128xf32>
    %7 = arith.addf %3, %6 : vector<8x128xf32>
    %c0_6 = arith.constant 0 : index
    %c0_7 = arith.constant 0 : index
    %8 = vector.load %arg8[%c0_6, %c0_7] : memref<8x128xf32, #tpu.memory_space<vmem>>, vector<8x128xf32>
    tpu.vector_store %arg8[%c0_6, %c0_7], %7 {strides = array<i32>} : memref<8x128xf32, #tpu.memory_space<vmem>>, vector<8x128xf32>,
    %c0_i32_8 = arith.constant 0 : i32
    %9 = arith.cmpi eq, %arg2, %c0_i32_8 : i32
    %10 = arith.extui %9 : i1 to i32
    %c0_i32_9 = arith.constant 0 : i32
    %11 = arith.cmpi ne, %10, %c0_i32_9 : i32
    scf.if %11 {
      %c0_10 = arith.constant 0 : index
      %c0_11 = arith.constant 0 : index
      %12 = vector.load %arg8[%c0_10, %c0_11] : memref<8x128xf32, #tpu.memory_space<vmem>>, vector<8x128xf32>
      %c0_12 = arith.constant 0 : index
      %c0_13 = arith.constant 0 : index
      %13 = vector.load %arg5[%c0_12, %c0_13] : memref<1x128xf32, #tpu.memory_space<vmem>>, vector<1x128xf32>
      %14 = vector.broadcast %13 : vector<1x128xf32> to vector<8x128xf32>
      %15 = arith.addf %12, %14 : vector<8x128xf32>
      %c0_14 = arith.constant 0 : index
      %c0_15 = arith.constant 0 : index
      %16 = vector.load %arg6[%c0_14, %c0_15] : memref<8x128xbf16, #tpu.memory_space<vmem>>, vector<8x128xbf16>
      %17 = arith.extf %16 : vector<8x128xbf16> to vector<8x128xf32>
      %18 = arith.addf %15, %17 : vector<8x128xf32>
      %cst_16 = arith.constant 0.000000e+00 : f32
      %19 = vector.broadcast %cst_16 : f32 to vector<8x128xf32>
      %20 = arith.maximumf %18, %19 : vector<8x128xf32>
      %21 = arith.truncf %20 : vector<8x128xf32> to vector<8x128xbf16>
      %c0_17 = arith.constant 0 : index
      %c0_18 = arith.constant 0 : index
      %22 = vector.load %arg7[%c0_17, %c0_18] : memref<8x128xbf16, #tpu.memory_space<vmem>>, vector<8x128xbf16>
      tpu.vector_store %arg7[%c0_17, %c0_18], %21 {strides = array<i32>} : memref<8x128xbf16, #tpu.memory_space<vmem>>, vector<8x128xbf16>,
    } else {
    }
    return
  }
  func.func @transform_0(%arg0: i32, %arg1: i32, %arg2: i32) -> (i32, i32) {
    %c0_i32 = arith.constant 0 : i32
    return %arg0, %arg2 : i32, i32
  }
  func.func @transform_1(%arg0: i32, %arg1: i32, %arg2: i32) -> (i32, i32) {
    %c0_i32 = arith.constant 0 : i32
    return %arg2, %arg1 : i32, i32
  }
  func.func @transform_2(%arg0: i32, %arg1: i32, %arg2: i32) -> (i32, i32) {
    %c0_i32 = arith.constant 0 : i32
    %c0_i32_0 = arith.constant 0 : i32
    return %c0_i32, %arg1 : i32, i32
  }
  func.func @transform_3(%arg0: i32, %arg1: i32, %arg2: i32) -> (i32, i32) {
    %c0_i32 = arith.constant 0 : i32
    return %arg0, %arg1 : i32, i32
  }
  func.func @transform_4(%arg0: i32, %arg1: i32, %arg2: i32) -> (i32, i32) {
    %c0_i32 = arith.constant 0 : i32
    return %arg0, %arg1 : i32, i32
  }
}

module attributes {stable_mosaic.version = 11 : i64} {
  func.func @_matmul_kernel(%arg0: i32, %arg1: i32, %arg2: i32, %arg3: memref<8x128xbf16, #tpu.memory_space<vmem>>, %arg4: memref<128x128xbf16, #tpu.memory_space<vmem>>, %arg5: memref<1x128xf32, #tpu.memory_space<vmem>>, %arg6: memref<8x128xbf16, #tpu.memory_space<vmem>>, %arg7: memref<8x128xf32, #tpu.memory_space<vmem>>) attributes {dimension_semantics = [#tpu.dimension_semantics<parallel>, #tpu.dimension_semantics<parallel>, #tpu.dimension_semantics<arbitrary>], iteration_bounds = array<i64: 1, 1, 1>, scalar_prefetch = 0 : i64, scratch_operands = 1 : i64, tpu.core_type = #tpu.core_type<tc>, window_params = [{transform_indices = @transform_0, window_bounds = array<i64: 8, 128>}, {transform_indices = @transform_1, window_bounds = array<i64: 128, 128>}, {transform_indices = @transform_2, window_bounds = array<i64: 1, 128>}, {transform_indices = @transform_3, window_bounds = array<i64: 8, 128>}]} {
    %c0_i32 = arith.constant 0 : i32
    %0 = arith.cmpi eq, %arg2, %c0_i32 : i32
    %1 = arith.extui %0 : i1 to i32
    %c0_i32_0 = arith.constant 0 : i32
    %2 = arith.cmpi ne, %1, %c0_i32_0 : i32
    scf.if %2 {
      %cst_10 = arith.constant 0.000000e+00 : f32
      %12 = vector.broadcast %cst_10 : f32 to vector<8x128xf32>
      %c0_11 = arith.constant 0 : index
      %c0_12 = arith.constant 0 : index
      %13 = vector.load %arg7[%c0_11, %c0_12] : memref<8x128xf32, #tpu.memory_space<vmem>>, vector<8x128xf32>
      tpu.vector_store %arg7[%c0_11, %c0_12], %12 {strides = array<i32>} : memref<8x128xf32, #tpu.memory_space<vmem>>, vector<8x128xf32>,
    } else {
    }
    %c0 = arith.constant 0 : index
    %c0_1 = arith.constant 0 : index
    %3 = vector.load %arg7[%c0, %c0_1] : memref<8x128xf32, #tpu.memory_space<vmem>>, vector<8x128xf32>
    %c0_2 = arith.constant 0 : index
    %c0_3 = arith.constant 0 : index
    %4 = vector.load %arg3[%c0_2, %c0_3] : memref<8x128xbf16, #tpu.memory_space<vmem>>, vector<8x128xbf16>
    %c0_4 = arith.constant 0 : index
    %c0_5 = arith.constant 0 : index
    %5 = vector.load %arg4[%c0_4, %c0_5] : memref<128x128xbf16, #tpu.memory_space<vmem>>, vector<128x128xbf16>
    %cst = arith.constant dense<0.000000e+00> : vector<8x128xf32>
    %6 = tpu.matmul %4, %5, %cst {dimension_numbers = #tpu.dot_dimension_numbers<[1], [0], [0], [1], [0, 0, 1, 1], [], []>} : vector<8x128xbf16>, vector<128x128xbf16>, vector<8x128xf32> -> vector<8x128xf32>
    %7 = arith.addf %3, %6 : vector<8x128xf32>
    %c0_6 = arith.constant 0 : index
    %c0_7 = arith.constant 0 : index
    %8 = vector.load %arg7[%c0_6, %c0_7] : memref<8x128xf32, #tpu.memory_space<vmem>>, vector<8x128xf32>
    tpu.vector_store %arg7[%c0_6, %c0_7], %7 {strides = array<i32>} : memref<8x128xf32, #tpu.memory_space<vmem>>, vector<8x128xf32>,
    %c0_i32_8 = arith.constant 0 : i32
    %9 = arith.cmpi eq, %arg2, %c0_i32_8 : i32
    %10 = arith.extui %9 : i1 to i32
    %c0_i32_9 = arith.constant 0 : i32
    %11 = arith.cmpi ne, %10, %c0_i32_9 : i32
    scf.if %11 {
      %c0_10 = arith.constant 0 : index
      %c0_11 = arith.constant 0 : index
      %12 = vector.load %arg7[%c0_10, %c0_11] : memref<8x128xf32, #tpu.memory_space<vmem>>, vector<8x128xf32>
      %c0_12 = arith.constant 0 : index
      %c0_13 = arith.constant 0 : index
      %13 = vector.load %arg5[%c0_12, %c0_13] : memref<1x128xf32, #tpu.memory_space<vmem>>, vector<1x128xf32>
      %14 = vector.broadcast %13 : vector<1x128xf32> to vector<8x128xf32>
      %15 = arith.addf %12, %14 : vector<8x128xf32>
      %cst_14 = arith.constant 0.000000e+00 : f32
      %16 = vector.broadcast %cst_14 : f32 to vector<8x128xf32>
      %17 = arith.maximumf %15, %16 : vector<8x128xf32>
      %18 = arith.truncf %17 : vector<8x128xf32> to vector<8x128xbf16>
      %c0_15 = arith.constant 0 : index
      %c0_16 = arith.constant 0 : index
      %19 = vector.load %arg6[%c0_15, %c0_16] : memref<8x128xbf16, #tpu.memory_space<vmem>>, vector<8x128xbf16>
      tpu.vector_store %arg6[%c0_15, %c0_16], %18 {strides = array<i32>} : memref<8x128xbf16, #tpu.memory_space<vmem>>, vector<8x128xbf16>,
    } else {
    }
    return
  }
  func.func @transform_0(%arg0: i32, %arg1: i32, %arg2: i32) -> (i32, i32) {
    %c0_i32 = arith.constant 0 : i32
    return %arg0, %arg2 : i32, i32
  }
  func.func @transform_1(%arg0: i32, %arg1: i32, %arg2: i32) -> (i32, i32) {
    %c0_i32 = arith.constant 0 : i32
    return %arg2, %arg1 : i32, i32
  }
  func.func @transform_2(%arg0: i32, %arg1: i32, %arg2: i32) -> (i32, i32) {
    %c0_i32 = arith.constant 0 : i32
    %c0_i32_0 = arith.constant 0 : i32
    return %c0_i32, %arg1 : i32, i32
  }
  func.func @transform_3(%arg0: i32, %arg1: i32, %arg2: i32) -> (i32, i32) {
    %c0_i32 = arith.constant 0 : i32
    return %arg0, %arg1 : i32, i32
  }
}

module attributes {stable_mosaic.version = 11 : i64} {
  func.func @_matmul_kernel(%arg0: i32, %arg1: i32, %arg2: i32, %arg3: memref<8x128xbf16, #tpu.memory_space<vmem>>, %arg4: memref<128x128xbf16, #tpu.memory_space<vmem>>, %arg5: memref<1x128xf32, #tpu.memory_space<vmem>>, %arg6: memref<8x128xbf16, #tpu.memory_space<vmem>>, %arg7: memref<8x128xf32, #tpu.memory_space<vmem>>) attributes {dimension_semantics = [#tpu.dimension_semantics<parallel>, #tpu.dimension_semantics<parallel>, #tpu.dimension_semantics<arbitrary>], iteration_bounds = array<i64: 1, 1, 5>, scalar_prefetch = 0 : i64, scratch_operands = 1 : i64, tpu.core_type = #tpu.core_type<tc>, window_params = [{transform_indices = @transform_0, window_bounds = array<i64: 8, 128>}, {transform_indices = @transform_1, window_bounds = array<i64: 128, 128>}, {transform_indices = @transform_2, window_bounds = array<i64: 1, 128>}, {transform_indices = @transform_3, window_bounds = array<i64: 8, 128>}]} {
    %c0_i32 = arith.constant 0 : i32
    %0 = arith.cmpi eq, %arg2, %c0_i32 : i32
    %1 = arith.extui %0 : i1 to i32
    %c0_i32_0 = arith.constant 0 : i32
    %2 = arith.cmpi ne, %1, %c0_i32_0 : i32
    scf.if %2 {
      %cst_9 = arith.constant 0.000000e+00 : f32
      %12 = vector.broadcast %cst_9 : f32 to vector<8x128xf32>
      %c0_10 = arith.constant 0 : index
      %c0_11 = arith.constant 0 : index
      %13 = vector.load %arg7[%c0_10, %c0_11] : memref<8x128xf32, #tpu.memory_space<vmem>>, vector<8x128xf32>
      tpu.vector_store %arg7[%c0_10, %c0_11], %12 {strides = array<i32>} : memref<8x128xf32, #tpu.memory_space<vmem>>, vector<8x128xf32>,
    } else {
    }
    %c0 = arith.constant 0 : index
    %c0_1 = arith.constant 0 : index
    %3 = vector.load %arg7[%c0, %c0_1] : memref<8x128xf32, #tpu.memory_space<vmem>>, vector<8x128xf32>
    %c0_2 = arith.constant 0 : index
    %c0_3 = arith.constant 0 : index
    %4 = vector.load %arg3[%c0_2, %c0_3] : memref<8x128xbf16, #tpu.memory_space<vmem>>, vector<8x128xbf16>
    %c0_4 = arith.constant 0 : index
    %c0_5 = arith.constant 0 : index
    %5 = vector.load %arg4[%c0_4, %c0_5] : memref<128x128xbf16, #tpu.memory_space<vmem>>, vector<128x128xbf16>
    %cst = arith.constant dense<0.000000e+00> : vector<8x128xf32>
    %6 = tpu.matmul %4, %5, %cst {dimension_numbers = #tpu.dot_dimension_numbers<[1], [0], [0], [1], [0, 0, 1, 1], [], []>} : vector<8x128xbf16>, vector<128x128xbf16>, vector<8x128xf32> -> vector<8x128xf32>
    %7 = arith.addf %3, %6 : vector<8x128xf32>
    %c0_6 = arith.constant 0 : index
    %c0_7 = arith.constant 0 : index
    %8 = vector.load %arg7[%c0_6, %c0_7] : memref<8x128xf32, #tpu.memory_space<vmem>>, vector<8x128xf32>
    tpu.vector_store %arg7[%c0_6, %c0_7], %7 {strides = array<i32>} : memref<8x128xf32, #tpu.memory_space<vmem>>, vector<8x128xf32>,
    %c4_i32 = arith.constant 4 : i32
    %9 = arith.cmpi eq, %arg2, %c4_i32 : i32
    %10 = arith.extui %9 : i1 to i32
    %c0_i32_8 = arith.constant 0 : i32
    %11 = arith.cmpi ne, %10, %c0_i32_8 : i32
    scf.if %11 {
      %c0_9 = arith.constant 0 : index
      %c0_10 = arith.constant 0 : index
      %12 = vector.load %arg7[%c0_9, %c0_10] : memref<8x128xf32, #tpu.memory_space<vmem>>, vector<8x128xf32>
      %c0_11 = arith.constant 0 : index
      %c0_12 = arith.constant 0 : index
      %13 = vector.load %arg5[%c0_11, %c0_12] : memref<1x128xf32, #tpu.memory_space<vmem>>, vector<1x128xf32>
      %14 = vector.broadcast %13 : vector<1x128xf32> to vector<8x128xf32>
      %15 = arith.addf %12, %14 : vector<8x128xf32>
      %cst_13 = arith.constant 0.000000e+00 : f32
      %16 = vector.broadcast %cst_13 : f32 to vector<8x128xf32>
      %17 = arith.maximumf %15, %16 : vector<8x128xf32>
      %18 = arith.truncf %17 : vector<8x128xf32> to vector<8x128xbf16>
      %c0_14 = arith.constant 0 : index
      %c0_15 = arith.constant 0 : index
      %19 = vector.load %arg6[%c0_14, %c0_15] : memref<8x128xbf16, #tpu.memory_space<vmem>>, vector<8x128xbf16>
      tpu.vector_store %arg6[%c0_14, %c0_15], %18 {strides = array<i32>} : memref<8x128xbf16, #tpu.memory_space<vmem>>, vector<8x128xbf16>,
    } else {
    }
    return
  }
  func.func @transform_0(%arg0: i32, %arg1: i32, %arg2: i32) -> (i32, i32) {
    %c0_i32 = arith.constant 0 : i32
    return %arg0, %arg2 : i32, i32
  }
  func.func @transform_1(%arg0: i32, %arg1: i32, %arg2: i32) -> (i32, i32) {
    %c0_i32 = arith.constant 0 : i32
    return %arg2, %arg1 : i32, i32
  }
  func.func @transform_2(%arg0: i32, %arg1: i32, %arg2: i32) -> (i32, i32) {
    %c0_i32 = arith.constant 0 : i32
    %c0_i32_0 = arith.constant 0 : i32
    return %c0_i32, %arg1 : i32, i32
  }
  func.func @transform_3(%arg0: i32, %arg1: i32, %arg2: i32) -> (i32, i32) {
    %c0_i32 = arith.constant 0 : i32
    return %arg0, %arg1 : i32, i32
  }
}

module attributes {stable_mosaic.version = 11 : i64} {
  func.func @_matmul_kernel(%arg0: i32, %arg1: i32, %arg2: i32, %arg3: memref<8x128xbf16, #tpu.memory_space<vmem>>, %arg4: memref<128x128xbf16, #tpu.memory_space<vmem>>, %arg5: memref<1x128xf32, #tpu.memory_space<vmem>>, %arg6: memref<8x128xbf16, #tpu.memory_space<vmem>>, %arg7: memref<8x128xbf16, #tpu.memory_space<vmem>>, %arg8: memref<8x128xf32, #tpu.memory_space<vmem>>) attributes {dimension_semantics = [#tpu.dimension_semantics<parallel>, #tpu.dimension_semantics<parallel>, #tpu.dimension_semantics<arbitrary>], iteration_bounds = array<i64: 1, 2, 1>, scalar_prefetch = 0 : i64, scratch_operands = 1 : i64, tpu.core_type = #tpu.core_type<tc>, window_params = [{transform_indices = @transform_0, window_bounds = array<i64: 8, 128>}, {transform_indices = @transform_1, window_bounds = array<i64: 128, 128>}, {transform_indices = @transform_2, window_bounds = array<i64: 1, 128>}, {transform_indices = @transform_3, window_bounds = array<i64: 8, 128>}, {transform_indices = @transform_4, window_bounds = array<i64: 8, 128>}]} {
    %c0_i32 = arith.constant 0 : i32
    %0 = arith.cmpi eq, %arg2, %c0_i32 : i32
    %1 = arith.extui %0 : i1 to i32
    %c0_i32_0 = arith.constant 0 : i32
    %2 = arith.cmpi ne, %1, %c0_i32_0 : i32
    scf.if %2 {
      %cst_10 = arith.constant 0.000000e+00 : f32
      %12 = vector.broadcast %cst_10 : f32 to vector<8x128xf32>
      %c0_11 = arith.constant 0 : index
      %c0_12 = arith.constant 0 : index
      %13 = vector.load %arg8[%c0_11, %c0_12] : memref<8x128xf32, #tpu.memory_space<vmem>>, vector<8x128xf32>
      tpu.vector_store %arg8[%c0_11, %c0_12], %12 {strides = array<i32>} : memref<8x128xf32, #tpu.memory_space<vmem>>, vector<8x128xf32>,
    } else {
    }
    %c0 = arith.constant 0 : index
    %c0_1 = arith.constant 0 : index
    %3 = vector.load %arg8[%c0, %c0_1] : memref<8x128xf32, #tpu.memory_space<vmem>>, vector<8x128xf32>
    %c0_2 = arith.constant 0 : index
    %c0_3 = arith.constant 0 : index
    %4 = vector.load %arg3[%c0_2, %c0_3] : memref<8x128xbf16, #tpu.memory_space<vmem>>, vector<8x128xbf16>
    %c0_4 = arith.constant 0 : index
    %c0_5 = arith.constant 0 : index
    %5 = vector.load %arg4[%c0_4, %c0_5] : memref<128x128xbf16, #tpu.memory_space<vmem>>, vector<128x128xbf16>
    %cst = arith.constant dense<0.000000e+00> : vector<8x128xf32>
    %6 = tpu.matmul %4, %5, %cst {dimension_numbers = #tpu.dot_dimension_numbers<[1], [0], [0], [1], [0, 0, 1, 1], [], []>} : vector<8x128xbf16>, vector<128x128xbf16>, vector<8x128xf32> -> vector<8x128xf32>
    %7 = arith.addf %3, %6 : vector<8x128xf32>
    %c0_6 = arith.constant 0 : index
    %c0_7 = arith.constant 0 : index
    %8 = vector.load %arg8[%c0_6, %c0_7] : memref<8x128xf32, #tpu.memory_space<vmem>>, vector<8x128xf32>
    tpu.vector_store %arg8[%c0_6, %c0_7], %7 {strides = array<i32>} : memref<8x128xf32, #tpu.memory_space<vmem>>, vector<8x128xf32>,
    %c0_i32_8 = arith.constant 0 : i32
    %9 = arith.cmpi eq, %arg2, %c0_i32_8 : i32
    %10 = arith.extui %9 : i1 to i32
    %c0_i32_9 = arith.constant 0 : i32
    %11 = arith.cmpi ne, %10, %c0_i32_9 : i32
    scf.if %11 {
      %c0_10 = arith.constant 0 : index
      %c0_11 = arith.constant 0 : index
      %12 = vector.load %arg8[%c0_10, %c0_11] : memref<8x128xf32, #tpu.memory_space<vmem>>, vector<8x128xf32>
      %c0_12 = arith.constant 0 : index
      %c0_13 = arith.constant 0 : index
      %13 = vector.load %arg5[%c0_12, %c0_13] : memref<1x128xf32, #tpu.memory_space<vmem>>, vector<1x128xf32>
      %14 = vector.broadcast %13 : vector<1x128xf32> to vector<8x128xf32>
      %15 = arith.addf %12, %14 : vector<8x128xf32>
      %c0_14 = arith.constant 0 : index
      %c0_15 = arith.constant 0 : index
      %16 = vector.load %arg6[%c0_14, %c0_15] : memref<8x128xbf16, #tpu.memory_space<vmem>>, vector<8x128xbf16>
      %17 = arith.extf %16 : vector<8x128xbf16> to vector<8x128xf32>
      %18 = arith.addf %15, %17 : vector<8x128xf32>
      %cst_16 = arith.constant 0.000000e+00 : f32
      %19 = vector.broadcast %cst_16 : f32 to vector<8x128xf32>
      %20 = arith.maximumf %18, %19 : vector<8x128xf32>
      %21 = arith.truncf %20 : vector<8x128xf32> to vector<8x128xbf16>
      %c0_17 = arith.constant 0 : index
      %c0_18 = arith.constant 0 : index
      %22 = vector.load %arg7[%c0_17, %c0_18] : memref<8x128xbf16, #tpu.memory_space<vmem>>, vector<8x128xbf16>
      tpu.vector_store %arg7[%c0_17, %c0_18], %21 {strides = array<i32>} : memref<8x128xbf16, #tpu.memory_space<vmem>>, vector<8x128xbf16>,
    } else {
    }
    return
  }
  func.func @transform_0(%arg0: i32, %arg1: i32, %arg2: i32) -> (i32, i32) {
    %c0_i32 = arith.constant 0 : i32
    return %arg0, %arg2 : i32, i32
  }
  func.func @transform_1(%arg0: i32, %arg1: i32, %arg2: i32) -> (i32, i32) {
    %c0_i32 = arith.constant 0 : i32
    return %arg2, %arg1 : i32, i32
  }
  func.func @transform_2(%arg0: i32, %arg1: i32, %arg2: i32) -> (i32, i32) {
    %c0_i32 = arith.constant 0 : i32
    %c0_i32_0 = arith.constant 0 : i32
    return %c0_i32, %arg1 : i32, i32
  }
  func.func @transform_3(%arg0: i32, %arg1: i32, %arg2: i32) -> (i32, i32) {
    %c0_i32 = arith.constant 0 : i32
    return %arg0, %arg1 : i32, i32
  }
  func.func @transform_4(%arg0: i32, %arg1: i32, %arg2: i32) -> (i32, i32) {
    %c0_i32 = arith.constant 0 : i32
    return %arg0, %arg1 : i32, i32
  }
}

module attributes {stable_mosaic.version = 11 : i64} {
  func.func @_matmul_kernel(%arg0: i32, %arg1: i32, %arg2: i32, %arg3: memref<8x128xbf16, #tpu.memory_space<vmem>>, %arg4: memref<128x128xbf16, #tpu.memory_space<vmem>>, %arg5: memref<1x128xf32, #tpu.memory_space<vmem>>, %arg6: memref<8x128xbf16, #tpu.memory_space<vmem>>, %arg7: memref<8x128xf32, #tpu.memory_space<vmem>>) attributes {dimension_semantics = [#tpu.dimension_semantics<parallel>, #tpu.dimension_semantics<parallel>, #tpu.dimension_semantics<arbitrary>], iteration_bounds = array<i64: 1, 2, 1>, scalar_prefetch = 0 : i64, scratch_operands = 1 : i64, tpu.core_type = #tpu.core_type<tc>, window_params = [{transform_indices = @transform_0, window_bounds = array<i64: 8, 128>}, {transform_indices = @transform_1, window_bounds = array<i64: 128, 128>}, {transform_indices = @transform_2, window_bounds = array<i64: 1, 128>}, {transform_indices = @transform_3, window_bounds = array<i64: 8, 128>}]} {
    %c0_i32 = arith.constant 0 : i32
    %0 = arith.cmpi eq, %arg2, %c0_i32 : i32
    %1 = arith.extui %0 : i1 to i32
    %c0_i32_0 = arith.constant 0 : i32
    %2 = arith.cmpi ne, %1, %c0_i32_0 : i32
    scf.if %2 {
      %cst_10 = arith.constant 0.000000e+00 : f32
      %12 = vector.broadcast %cst_10 : f32 to vector<8x128xf32>
      %c0_11 = arith.constant 0 : index
      %c0_12 = arith.constant 0 : index
      %13 = vector.load %arg7[%c0_11, %c0_12] : memref<8x128xf32, #tpu.memory_space<vmem>>, vector<8x128xf32>
      tpu.vector_store %arg7[%c0_11, %c0_12], %12 {strides = array<i32>} : memref<8x128xf32, #tpu.memory_space<vmem>>, vector<8x128xf32>,
    } else {
    }
    %c0 = arith.constant 0 : index
    %c0_1 = arith.constant 0 : index
    %3 = vector.load %arg7[%c0, %c0_1] : memref<8x128xf32, #tpu.memory_space<vmem>>, vector<8x128xf32>
    %c0_2 = arith.constant 0 : index
    %c0_3 = arith.constant 0 : index
    %4 = vector.load %arg3[%c0_2, %c0_3] : memref<8x128xbf16, #tpu.memory_space<vmem>>, vector<8x128xbf16>
    %c0_4 = arith.constant 0 : index
    %c0_5 = arith.constant 0 : index
    %5 = vector.load %arg4[%c0_4, %c0_5] : memref<128x128xbf16, #tpu.memory_space<vmem>>, vector<128x128xbf16>
    %cst = arith.constant dense<0.000000e+00> : vector<8x128xf32>
    %6 = tpu.matmul %4, %5, %cst {dimension_numbers = #tpu.dot_dimension_numbers<[1], [0], [0], [1], [0, 0, 1, 1], [], []>} : vector<8x128xbf16>, vector<128x128xbf16>, vector<8x128xf32> -> vector<8x128xf32>
    %7 = arith.addf %3, %6 : vector<8x128xf32>
    %c0_6 = arith.constant 0 : index
    %c0_7 = arith.constant 0 : index
    %8 = vector.load %arg7[%c0_6, %c0_7] : memref<8x128xf32, #tpu.memory_space<vmem>>, vector<8x128xf32>
    tpu.vector_store %arg7[%c0_6, %c0_7], %7 {strides = array<i32>} : memref<8x128xf32, #tpu.memory_space<vmem>>, vector<8x128xf32>,
    %c0_i32_8 = arith.constant 0 : i32
    %9 = arith.cmpi eq, %arg2, %c0_i32_8 : i32
    %10 = arith.extui %9 : i1 to i32
    %c0_i32_9 = arith.constant 0 : i32
    %11 = arith.cmpi ne, %10, %c0_i32_9 : i32
    scf.if %11 {
      %c0_10 = arith.constant 0 : index
      %c0_11 = arith.constant 0 : index
      %12 = vector.load %arg7[%c0_10, %c0_11] : memref<8x128xf32, #tpu.memory_space<vmem>>, vector<8x128xf32>
      %c0_12 = arith.constant 0 : index
      %c0_13 = arith.constant 0 : index
      %13 = vector.load %arg5[%c0_12, %c0_13] : memref<1x128xf32, #tpu.memory_space<vmem>>, vector<1x128xf32>
      %14 = vector.broadcast %13 : vector<1x128xf32> to vector<8x128xf32>
      %15 = arith.addf %12, %14 : vector<8x128xf32>
      %16 = arith.truncf %15 : vector<8x128xf32> to vector<8x128xbf16>
      %c0_14 = arith.constant 0 : index
      %c0_15 = arith.constant 0 : index
      %17 = vector.load %arg6[%c0_14, %c0_15] : memref<8x128xbf16, #tpu.memory_space<vmem>>, vector<8x128xbf16>
      tpu.vector_store %arg6[%c0_14, %c0_15], %16 {strides = array<i32>} : memref<8x128xbf16, #tpu.memory_space<vmem>>, vector<8x128xbf16>,
    } else {
    }
    return
  }
  func.func @transform_0(%arg0: i32, %arg1: i32, %arg2: i32) -> (i32, i32) {
    %c0_i32 = arith.constant 0 : i32
    return %arg0, %arg2 : i32, i32
  }
  func.func @transform_1(%arg0: i32, %arg1: i32, %arg2: i32) -> (i32, i32) {
    %c0_i32 = arith.constant 0 : i32
    return %arg2, %arg1 : i32, i32
  }
  func.func @transform_2(%arg0: i32, %arg1: i32, %arg2: i32) -> (i32, i32) {
    %c0_i32 = arith.constant 0 : i32
    %c0_i32_0 = arith.constant 0 : i32
    return %c0_i32, %arg1 : i32, i32
  }
  func.func @transform_3(%arg0: i32, %arg1: i32, %arg2: i32) -> (i32, i32) {
    %c0_i32 = arith.constant 0 : i32
    return %arg0, %arg1 : i32, i32
  }
}

module attributes {stable_mosaic.version = 11 : i64} {
  func.func @_matmul_kernel(%arg0: i32, %arg1: i32, %arg2: i32, %arg3: memref<8x256xbf16, #tpu.memory_space<vmem>>, %arg4: memref<256x128xbf16, #tpu.memory_space<vmem>>, %arg5: memref<1x128xf32, #tpu.memory_space<vmem>>, %arg6: memref<8x128xbf16, #tpu.memory_space<vmem>>, %arg7: memref<8x128xf32, #tpu.memory_space<vmem>>) attributes {dimension_semantics = [#tpu.dimension_semantics<parallel>, #tpu.dimension_semantics<parallel>, #tpu.dimension_semantics<arbitrary>], iteration_bounds = array<i64: 1, 1, 1>, scalar_prefetch = 0 : i64, scratch_operands = 1 : i64, tpu.core_type = #tpu.core_type<tc>, window_params = [{transform_indices = @transform_0, window_bounds = array<i64: 8, 256>}, {transform_indices = @transform_1, window_bounds = array<i64: 256, 128>}, {transform_indices = @transform_2, window_bounds = array<i64: 1, 128>}, {transform_indices = @transform_3, window_bounds = array<i64: 8, 128>}]} {
    %c0_i32 = arith.constant 0 : i32
    %0 = arith.cmpi eq, %arg2, %c0_i32 : i32
    %1 = arith.extui %0 : i1 to i32
    %c0_i32_0 = arith.constant 0 : i32
    %2 = arith.cmpi ne, %1, %c0_i32_0 : i32
    scf.if %2 {
      %cst_10 = arith.constant 0.000000e+00 : f32
      %12 = vector.broadcast %cst_10 : f32 to vector<8x128xf32>
      %c0_11 = arith.constant 0 : index
      %c0_12 = arith.constant 0 : index
      %13 = vector.load %arg7[%c0_11, %c0_12] : memref<8x128xf32, #tpu.memory_space<vmem>>, vector<8x128xf32>
      tpu.vector_store %arg7[%c0_11, %c0_12], %12 {strides = array<i32>} : memref<8x128xf32, #tpu.memory_space<vmem>>, vector<8x128xf32>,
    } else {
    }
    %c0 = arith.constant 0 : index
    %c0_1 = arith.constant 0 : index
    %3 = vector.load %arg7[%c0, %c0_1] : memref<8x128xf32, #tpu.memory_space<vmem>>, vector<8x128xf32>
    %c0_2 = arith.constant 0 : index
    %c0_3 = arith.constant 0 : index
    %4 = vector.load %arg3[%c0_2, %c0_3] : memref<8x256xbf16, #tpu.memory_space<vmem>>, vector<8x256xbf16>
    %c0_4 = arith.constant 0 : index
    %c0_5 = arith.constant 0 : index
    %5 = vector.load %arg4[%c0_4, %c0_5] : memref<256x128xbf16, #tpu.memory_space<vmem>>, vector<256x128xbf16>
    %cst = arith.constant dense<0.000000e+00> : vector<8x128xf32>
    %6 = tpu.matmul %4, %5, %cst {dimension_numbers = #tpu.dot_dimension_numbers<[1], [0], [0], [1], [0, 0, 1, 1], [], []>} : vector<8x256xbf16>, vector<256x128xbf16>, vector<8x128xf32> -> vector<8x128xf32>
    %7 = arith.addf %3, %6 : vector<8x128xf32>
    %c0_6 = arith.constant 0 : index
    %c0_7 = arith.constant 0 : index
    %8 = vector.load %arg7[%c0_6, %c0_7] : memref<8x128xf32, #tpu.memory_space<vmem>>, vector<8x128xf32>
    tpu.vector_store %arg7[%c0_6, %c0_7], %7 {strides = array<i32>} : memref<8x128xf32, #tpu.memory_space<vmem>>, vector<8x128xf32>,
    %c0_i32_8 = arith.constant 0 : i32
    %9 = arith.cmpi eq, %arg2, %c0_i32_8 : i32
    %10 = arith.extui %9 : i1 to i32
    %c0_i32_9 = arith.constant 0 : i32
    %11 = arith.cmpi ne, %10, %c0_i32_9 : i32
    scf.if %11 {
      %c0_10 = arith.constant 0 : index
      %c0_11 = arith.constant 0 : index
      %12 = vector.load %arg7[%c0_10, %c0_11] : memref<8x128xf32, #tpu.memory_space<vmem>>, vector<8x128xf32>
      %c0_12 = arith.constant 0 : index
      %c0_13 = arith.constant 0 : index
      %13 = vector.load %arg5[%c0_12, %c0_13] : memref<1x128xf32, #tpu.memory_space<vmem>>, vector<1x128xf32>
      %14 = vector.broadcast %13 : vector<1x128xf32> to vector<8x128xf32>
      %15 = arith.addf %12, %14 : vector<8x128xf32>
      %cst_14 = arith.constant 0.000000e+00 : f32
      %16 = vector.broadcast %cst_14 : f32 to vector<8x128xf32>
      %17 = arith.maximumf %15, %16 : vector<8x128xf32>
      %18 = arith.truncf %17 : vector<8x128xf32> to vector<8x128xbf16>
      %c0_15 = arith.constant 0 : index
      %c0_16 = arith.constant 0 : index
      %19 = vector.load %arg6[%c0_15, %c0_16] : memref<8x128xbf16, #tpu.memory_space<vmem>>, vector<8x128xbf16>
      tpu.vector_store %arg6[%c0_15, %c0_16], %18 {strides = array<i32>} : memref<8x128xbf16, #tpu.memory_space<vmem>>, vector<8x128xbf16>,
    } else {
    }
    return
  }
  func.func @transform_0(%arg0: i32, %arg1: i32, %arg2: i32) -> (i32, i32) {
    %c0_i32 = arith.constant 0 : i32
    return %arg0, %arg2 : i32, i32
  }
  func.func @transform_1(%arg0: i32, %arg1: i32, %arg2: i32) -> (i32, i32) {
    %c0_i32 = arith.constant 0 : i32
    return %arg2, %arg1 : i32, i32
  }
  func.func @transform_2(%arg0: i32, %arg1: i32, %arg2: i32) -> (i32, i32) {
    %c0_i32 = arith.constant 0 : i32
    %c0_i32_0 = arith.constant 0 : i32
    return %c0_i32, %arg1 : i32, i32
  }
  func.func @transform_3(%arg0: i32, %arg1: i32, %arg2: i32) -> (i32, i32) {
    %c0_i32 = arith.constant 0 : i32
    return %arg0, %arg1 : i32, i32
  }
}

module attributes {stable_mosaic.version = 11 : i64} {
  func.func @_matmul_kernel(%arg0: i32, %arg1: i32, %arg2: i32, %arg3: memref<8x256xbf16, #tpu.memory_space<vmem>>, %arg4: memref<256x128xbf16, #tpu.memory_space<vmem>>, %arg5: memref<1x128xf32, #tpu.memory_space<vmem>>, %arg6: memref<8x128xf32, #tpu.memory_space<vmem>>, %arg7: memref<8x128xf32, #tpu.memory_space<vmem>>) attributes {dimension_semantics = [#tpu.dimension_semantics<parallel>, #tpu.dimension_semantics<parallel>, #tpu.dimension_semantics<arbitrary>], iteration_bounds = array<i64: 1, 1, 1>, scalar_prefetch = 0 : i64, scratch_operands = 1 : i64, tpu.core_type = #tpu.core_type<tc>, window_params = [{transform_indices = @transform_0, window_bounds = array<i64: 8, 256>}, {transform_indices = @transform_1, window_bounds = array<i64: 256, 128>}, {transform_indices = @transform_2, window_bounds = array<i64: 1, 128>}, {transform_indices = @transform_3, window_bounds = array<i64: 8, 128>}]} {
    %c0_i32 = arith.constant 0 : i32
    %0 = arith.cmpi eq, %arg2, %c0_i32 : i32
    %1 = arith.extui %0 : i1 to i32
    %c0_i32_0 = arith.constant 0 : i32
    %2 = arith.cmpi ne, %1, %c0_i32_0 : i32
    scf.if %2 {
      %cst_10 = arith.constant 0.000000e+00 : f32
      %12 = vector.broadcast %cst_10 : f32 to vector<8x128xf32>
      %c0_11 = arith.constant 0 : index
      %c0_12 = arith.constant 0 : index
      %13 = vector.load %arg7[%c0_11, %c0_12] : memref<8x128xf32, #tpu.memory_space<vmem>>, vector<8x128xf32>
      tpu.vector_store %arg7[%c0_11, %c0_12], %12 {strides = array<i32>} : memref<8x128xf32, #tpu.memory_space<vmem>>, vector<8x128xf32>,
    } else {
    }
    %c0 = arith.constant 0 : index
    %c0_1 = arith.constant 0 : index
    %3 = vector.load %arg7[%c0, %c0_1] : memref<8x128xf32, #tpu.memory_space<vmem>>, vector<8x128xf32>
    %c0_2 = arith.constant 0 : index
    %c0_3 = arith.constant 0 : index
    %4 = vector.load %arg3[%c0_2, %c0_3] : memref<8x256xbf16, #tpu.memory_space<vmem>>, vector<8x256xbf16>
    %c0_4 = arith.constant 0 : index
    %c0_5 = arith.constant 0 : index
    %5 = vector.load %arg4[%c0_4, %c0_5] : memref<256x128xbf16, #tpu.memory_space<vmem>>, vector<256x128xbf16>
    %cst = arith.constant dense<0.000000e+00> : vector<8x128xf32>
    %6 = tpu.matmul %4, %5, %cst {dimension_numbers = #tpu.dot_dimension_numbers<[1], [0], [0], [1], [0, 0, 1, 1], [], []>} : vector<8x256xbf16>, vector<256x128xbf16>, vector<8x128xf32> -> vector<8x128xf32>
    %7 = arith.addf %3, %6 : vector<8x128xf32>
    %c0_6 = arith.constant 0 : index
    %c0_7 = arith.constant 0 : index
    %8 = vector.load %arg7[%c0_6, %c0_7] : memref<8x128xf32, #tpu.memory_space<vmem>>, vector<8x128xf32>
    tpu.vector_store %arg7[%c0_6, %c0_7], %7 {strides = array<i32>} : memref<8x128xf32, #tpu.memory_space<vmem>>, vector<8x128xf32>,
    %c0_i32_8 = arith.constant 0 : i32
    %9 = arith.cmpi eq, %arg2, %c0_i32_8 : i32
    %10 = arith.extui %9 : i1 to i32
    %c0_i32_9 = arith.constant 0 : i32
    %11 = arith.cmpi ne, %10, %c0_i32_9 : i32
    scf.if %11 {
      %c0_10 = arith.constant 0 : index
      %c0_11 = arith.constant 0 : index
      %12 = vector.load %arg7[%c0_10, %c0_11] : memref<8x128xf32, #tpu.memory_space<vmem>>, vector<8x128xf32>
      %c0_12 = arith.constant 0 : index
      %c0_13 = arith.constant 0 : index
      %13 = vector.load %arg5[%c0_12, %c0_13] : memref<1x128xf32, #tpu.memory_space<vmem>>, vector<1x128xf32>
      %14 = vector.broadcast %13 : vector<1x128xf32> to vector<8x128xf32>
      %15 = arith.addf %12, %14 : vector<8x128xf32>
      %c0_14 = arith.constant 0 : index
      %c0_15 = arith.constant 0 : index
      %16 = vector.load %arg6[%c0_14, %c0_15] : memref<8x128xf32, #tpu.memory_space<vmem>>, vector<8x128xf32>
      tpu.vector_store %arg6[%c0_14, %c0_15], %15 {strides = array<i32>} : memref<8x128xf32, #tpu.memory_space<vmem>>, vector<8x128xf32>,
    } else {
    }
    return
  }
  func.func @transform_0(%arg0: i32, %arg1: i32, %arg2: i32) -> (i32, i32) {
    %c0_i32 = arith.constant 0 : i32
    return %arg0, %arg2 : i32, i32
  }
  func.func @transform_1(%arg0: i32, %arg1: i32, %arg2: i32) -> (i32, i32) {
    %c0_i32 = arith.constant 0 : i32
    return %arg2, %arg1 : i32, i32
  }
  func.func @transform_2(%arg0: i32, %arg1: i32, %arg2: i32) -> (i32, i32) {
    %c0_i32 = arith.constant 0 : i32
    %c0_i32_0 = arith.constant 0 : i32
    return %c0_i32, %arg1 : i32, i32
  }
  func.func @transform_3(%arg0: i32, %arg1: i32, %arg2: i32) -> (i32, i32) {
    %c0_i32 = arith.constant 0 : i32
    return %arg0, %arg1 : i32, i32
  }
}

module attributes {stable_mosaic.version = 11 : i64} {
  func.func @_l2_norm_kernel(%arg0: i32, %arg1: memref<2x32xf32, #tpu.memory_space<vmem>>, %arg2: memref<2x32xf32, #tpu.memory_space<vmem>>) attributes {dimension_semantics = [#tpu.dimension_semantics<arbitrary>], iteration_bounds = array<i64: 1>, scalar_prefetch = 0 : i64, scratch_operands = 0 : i64, tpu.core_type = #tpu.core_type<tc>, window_params = [{pipeline_mode = #tpu.pipeline_mode<synchronous>, transform_indices = @transform_0, window_bounds = array<i64: 2, 32>}, {pipeline_mode = #tpu.pipeline_mode<synchronous>, transform_indices = @transform_1, window_bounds = array<i64: 2, 32>}]} {
    %c0 = arith.constant 0 : index
    %c0_0 = arith.constant 0 : index
    %0 = vector.load %arg1[%c0, %c0_0] : memref<2x32xf32, #tpu.memory_space<vmem>>, vector<2x32xf32>
    %1 = arith.mulf %0, %0 : vector<2x32xf32>
    %cst = arith.constant dense<0.000000e+00> : vector<2xf32>
    %2 = vector.multi_reduction <add>, %1, %cst [1] : vector<2x32xf32> to vector<2xf32>
    %3 = vector.shape_cast %2 : vector<2xf32> to vector<2x1xf32>
    %cst_1 = arith.constant 1.000000e-24 : f32
    %4 = vector.broadcast %cst_1 : f32 to vector<2x1xf32>
    %5 = arith.maximumf %3, %4 : vector<2x1xf32>
    %6 = math.rsqrt %5 : vector<2x1xf32>
    %7 = vector.broadcast %6 : vector<2x1xf32> to vector<2x32xf32>
    %8 = arith.mulf %0, %7 : vector<2x32xf32>
    %c0_2 = arith.constant 0 : index
    %c0_3 = arith.constant 0 : index
    %9 = vector.load %arg2[%c0_2, %c0_3] : memref<2x32xf32, #tpu.memory_space<vmem>>, vector<2x32xf32>
    tpu.vector_store %arg2[%c0_2, %c0_3], %8 {strides = array<i32>} : memref<2x32xf32, #tpu.memory_space<vmem>>, vector<2x32xf32>,
    return
  }
  func.func @transform_0(%arg0: i32) -> (i32, i32) {
    %c0_i32 = arith.constant 0 : i32
    %c0_i32_0 = arith.constant 0 : i32
    %c0_i32_1 = arith.constant 0 : i32
    return %c0_i32, %c0_i32_0 : i32, i32
  }
  func.func @transform_1(%arg0: i32) -> (i32, i32) {
    %c0_i32 = arith.constant 0 : i32
    %c0_i32_0 = arith.constant 0 : i32
    %c0_i32_1 = arith.constant 0 : i32
    return %c0_i32, %c0_i32_0 : i32, i32
  }
}

</mosaic_0001>

<bundles_post_ra>
// kernel: img_encoder_resnet_forward.159
= control target key start
LH: loop header
LB: loop body
LE: loop exit
PB: predicated region body
PF: predicated region fallthrough
CT: control target
= control target key end

     0   :  { %s721_s1 = inlined_call_operand.vmem [shape: bf16[128,128], index: 1, kind: input, shape index: {}]   ;;  %s722_s0 = inlined_call_operand.vmem [shape: bf16[128,128], index: 0, kind: input, shape index: {}]   ;;  %s723_s2 = inlined_call_operand.vmem [shape: f32[1,128], index: 2, kind: input, shape index: {}]   ;;  %s724_s3 = inlined_call_operand.vmem [shape: bf16[128,128], index: 3, kind: output, shape index: {}]  }
   0x1   :  { %v610_v0 = vld [vmem:[%s721_s1 + $0x38] sm:$0xff]   ;;  %v611_v1 = vld [vmem:[%s721_s1 + $0x30] sm:$0xff]   ;;  %v612_v2 = vld [vmem:[%s721_s1 + $0x28] sm:$0xff]  }
   0x2   :  { %562 = vmatprep.subr.bf16.mxu0 %v610_v0  ;;  %594 = vmatprep.subr.bf16.mxu1 %v610_v0  ;;  %v613_v3 = vld [vmem:[%s721_s1 + $0x20] sm:$0xff]   ;;  %v614_v6 = vld [vmem:[%s721_s1 + $0x18] sm:$0xff]   ;;  %v615_v7 = vld [vmem:[%s721_s1 + $0x10] sm:$0xff]  }
   0x3   :  { %563 = vmatpush3.bf16.msra.mxu0 %v610_v0  ;;  %602 = vmatpush3.bf16.msra.mxu1 %v610_v0  ;;  %v618_v4 = vld [vmem:[%s722_s0] sm:$0xff]   ;;  %v616_v8 = vld [vmem:[%s721_s1 + $0x8] sm:$0xff]   ;;  %v622_v12 = vld [vmem:[%s722_s0 + $0x10] sm:$0xff]  }
   0x4   :  { %564 = vmatprep.subr.bf16.mxu0 %v611_v1  ;;  %595 = vmatprep.subr.bf16.mxu1 %v611_v1  ;;  %v619_v5 = vld [vmem:[%s722_s0 + $0x20] sm:$0xff]   ;;  %v620_v10 = vld [vmem:[%s722_s0 + $0x8] sm:$0xff]   ;;  %v623_v13 = vld [vmem:[%s722_s0 + $0x30] sm:$0xff]  }
   0x5   :  { %578 = vmatprep.mubr.bf16.mxu0 %v618_v4  ;;  %586 = vmatprep.mubr.bf16.mxu1 %v619_v5  ;;  %v617_v9 = vld [vmem:[%s721_s1] sm:$0xff]   ;;  %v621_v11 = vld [vmem:[%s722_s0 + $0x28] sm:$0xff]   ;;  %v624_v14 = vld [vmem:[%s722_s0 + $0x18] sm:$0xff]  }
   0x6   :  { %v625_v15 = vld [vmem:[%s722_s0 + $0x38] sm:$0xff]   ;;  %v466_v16 = vld [vmem:[%s723_s2] ss:$0 sm:$0xff] }
   0x7   :  { %565 = vmatpush3.bf16.msra.mxu0 %v611_v1  ;;  %603 = vmatpush3.bf16.msra.mxu1 %v611_v1 }
   0x8   :  { %566 = vmatprep.subr.bf16.mxu0 %v612_v2  ;;  %596 = vmatprep.subr.bf16.mxu1 %v612_v2 }
   0xb   :  { %567 = vmatpush3.bf16.msra.mxu0 %v612_v2  ;;  %604 = vmatpush3.bf16.msra.mxu1 %v612_v2 }
   0xc   :  { %568 = vmatprep.subr.bf16.mxu0 %v613_v3  ;;  %597 = vmatprep.subr.bf16.mxu1 %v613_v3 }
   0xf   :  { %569 = vmatpush3.bf16.msra.mxu0 %v613_v3  ;;  %605 = vmatpush3.bf16.msra.mxu1 %v613_v3 }
  0x10   :  { %570 = vmatprep.subr.bf16.mxu0 %v614_v6  ;;  %598 = vmatprep.subr.bf16.mxu1 %v614_v6 }
  0x13   :  { %571 = vmatpush3.bf16.msra.mxu0 %v614_v6  ;;  %606 = vmatpush3.bf16.msra.mxu1 %v614_v6 }
  0x14   :  { %572 = vmatprep.subr.bf16.mxu0 %v615_v7  ;;  %599 = vmatprep.subr.bf16.mxu1 %v615_v7 }
  0x17   :  { %573 = vmatpush3.bf16.msra.mxu0 %v615_v7  ;;  %607 = vmatpush3.bf16.msra.mxu1 %v615_v7 }
  0x18   :  { %574 = vmatprep.subr.bf16.mxu0 %v616_v8  ;;  %600 = vmatprep.subr.bf16.mxu1 %v616_v8 }
  0x1b   :  { %575 = vmatpush3.bf16.msra.mxu0 %v616_v8  ;;  %608 = vmatpush3.bf16.msra.mxu1 %v616_v8 }
  0x1c   :  { %576 = vmatprep.subr.bf16.mxu0 %v617_v9  ;;  %601 = vmatprep.subr.bf16.mxu1 %v617_v9 }
  0x1f   :  { %577 = vmatpush3.bf16.msra.mxu0 %v617_v9  ;;  %609 = vmatpush3.bf16.msra.mxu1 %v617_v9 }
  0x22   :  { %579 = vmatmul.mubr.bf16.vlgmr.msra.gmra.mxu0 %v620_v10  ;;  %587 = vmatmul.mubr.bf16.vlgmr.msra.gmra.mxu1 %v621_v11 }
  0x23   :  { %582 = vmatprep.mubr.bf16.mxu0 %v622_v12  ;;  %590 = vmatprep.mubr.bf16.mxu1 %v623_v13 }
  0x2a   :  { %583 = vmatmul.mubr.bf16.gmra.mxu0 %v624_v14  ;;  %591 = vmatmul.mubr.bf16.gmra.mxu1 %v625_v15 }
  0xe2   :  { %v580_v17 = vpop.f32.mrf.mxu0  ;;  %v588_v18 = vpop.f32.mrf.mxu1 }
  0xe3   :  { %v336_v19 = vadd.f32 %v580_v17, %v466_v16  ;;  %v344_v20 = vadd.f32 %v588_v18, %v466_v16 }
  0xe4   :  { %v213_v21 = vpop.f32.mrf.mxu0  ;;  %v245_v22 = vpop.f32.mrf.mxu1 }
  0xe5   :  { %v334_v23 = vadd.f32 %v466_v16, %v213_v21  ;;  %v342_v24 = vadd.f32 %v466_v16, %v245_v22  ;;  %v352_v29 = vmax.f32 %v336_v19, 0.0  ;;  %v360_v30 = vmax.f32 %v344_v20, 0.0 }
  0xe6   :  { %v581_v25 = vpop.f32.mrf.mxu0  ;;  %v589_v26 = vpop.f32.mrf.mxu1 }
  0xe7   :  { %v337_v27 = vadd.f32 %v581_v25, %v466_v16  ;;  %v345_v28 = vadd.f32 %v589_v26, %v466_v16  ;;  %v350_v37 = vmax.f32 %v334_v23, 0.0  ;;  %v358_v38 = vmax.f32 %v342_v24, 0.0 }
  0xe8   :  { %v216_v31 = vpop.f32.mrf.mxu0  ;;  %v248_v32 = vpop.f32.mrf.mxu1 }
  0xe9   :  { %v353_v33 = vmax.f32 %v337_v27, 0.0  ;;  %v361_v34 = vmax.f32 %v345_v28, 0.0  ;;  %v335_v35 = vadd.f32 %v466_v16, %v216_v31  ;;  %v343_v36 = vadd.f32 %v466_v16, %v248_v32 }
  0xea   :  { %v584_v39 = vpop.f32.mrf.mxu0  ;;  %v592_v40 = vpop.f32.mrf.mxu1 }
  0xeb   :  { %v507_v41 = vpack.c.bf16 %v353_v33, %v352_v29  ;;  %v527_v42 = vpack.c.bf16 %v361_v34, %v360_v30  ;;  %v351_v43 = vmax.f32 %v335_v35, 0.0  ;;  %v359_v44 = vmax.f32 %v343_v36, 0.0 }
  0xec   :  { %v340_v45 = vadd.f32 %v584_v39, %v466_v16  ;;  %v348_v46 = vadd.f32 %v592_v40, %v466_v16  ;;  %v229_v47 = vpop.f32.mrf.mxu0  ;;  %v261_v48 = vpop.f32.mrf.mxu1 }
  0xed   :  { %539 = vst [vmem:[%s724_s3 + $0x8] sm:$0xff] %v507_v41   ;;  %543 = vst [vmem:[%s724_s3 + $0x28] sm:$0xff] %v527_v42   ;;  %v502_v49 = vpack.c.bf16 %v351_v43, %v350_v37  ;;  %v522_v50 = vpack.c.bf16 %v359_v44, %v358_v38  ;;  %v338_v51 = vadd.f32 %v466_v16, %v229_v47 }
  0xee   :  { %v346_v52 = vadd.f32 %v466_v16, %v261_v48  ;;  %v585_v53 = vpop.f32.mrf.mxu0  ;;  %v593_v54 = vpop.f32.mrf.mxu1  ;;  %v356_v57 = vmax.f32 %v340_v45, 0.0  ;;  %v364_v58 = vmax.f32 %v348_v46, 0.0 }
  0xef   :  { %503 = vst [vmem:[%s724_s3] sm:$0xff] %v502_v49   ;;  %542 = vst [vmem:[%s724_s3 + $0x20] sm:$0xff] %v522_v50   ;;  %v341_v55 = vadd.f32 %v585_v53, %v466_v16  ;;  %v349_v56 = vadd.f32 %v593_v54, %v466_v16  ;;  %v354_v1 = vmax.f32 %v338_v51, 0.0 }
  0xf0   :  { %v232_v59 = vpop.f32.mrf.mxu0  ;;  %v264_v60 = vpop.f32.mrf.mxu1  ;;  %v362_v2 = vmax.f32 %v346_v52, 0.0 }
  0xf1   :  { %v357_v61 = vmax.f32 %v341_v55, 0.0  ;;  %v365_v62 = vmax.f32 %v349_v56, 0.0  ;;  %v339_v63 = vadd.f32 %v466_v16, %v232_v59  ;;  %v347_v0 = vadd.f32 %v466_v16, %v264_v60 }
  0xf3   :  { %v517_v3 = vpack.c.bf16 %v357_v61, %v356_v57  ;;  %v537_v4 = vpack.c.bf16 %v365_v62, %v364_v58  ;;  %v355_v5 = vmax.f32 %v339_v63, 0.0  ;;  %v363_v6 = vmax.f32 %v347_v0, 0.0 }
  0xf5   :  { %541 = vst [vmem:[%s724_s3 + $0x18] sm:$0xff] %v517_v3   ;;  %545 = vst [vmem:[%s724_s3 + $0x38] sm:$0xff] %v537_v4   ;;  %v512_v7 = vpack.c.bf16 %v355_v5, %v354_v1  ;;  %v532_v8 = vpack.c.bf16 %v363_v6, %v362_v2 }
  0xf7   :  { %540 = vst [vmem:[%s724_s3 + $0x10] sm:$0xff] %v512_v7   ;;  %544 = vst [vmem:[%s724_s3 + $0x30] sm:$0xff] %v532_v8  }

// kernel: img_encoder_resnet_forward.157
= control target key start
LH: loop header
LB: loop body
LE: loop exit
PB: predicated region body
PF: predicated region fallthrough
CT: control target
= control target key end

     0   :  { %s1744_s12 = smov 0   ;;  %s1746_s13 = smov 0   ;;  %s1918_s0 = inlined_call_operand.vmem [shape: bf16[512,256], index: 0, kind: input, shape index: {}]   ;;  %s1919_s1 = inlined_call_operand.vmem [shape: bf16[256,128], index: 1, kind: input, shape index: {}]   ;;  %s1920_s2 = inlined_call_operand.vmem [shape: f32[1,128], index: 2, kind: input, shape index: {}]   ;;  %s1921_s3 = inlined_call_operand.vmem [shape: bf16[512,128], index: 3, kind: output, shape index: {}]  }
   0x1   :  { %s1748_s14 = smov 0  }
   0x2 LB: > { %s32_s15 = sadd.s32 1, %s1718_s13  ;;  %p1267_p0 = scmp.ge.s32.totalorder %s1722_s14, 1  ;;  %s1722_s14 = sphi %s1748_s14, %s13_s14   ;;  %s1718_s13 = sphi %s1746_s13, %s1923_s13   ;;  %s1714_s12 = sphi %s1744_s12, %s1922_s12  }
   0x3   : > { %p34_p1 = scmp.ge.s32.totalorder %s32_s15, 2  ;;  %p191_p2 = scmp.lt.s32.totalorder %s1722_s14, 3 }
   0x5   : > { %s1925_s15 = smov (%p34_p1, %s32_s15), 0  ;;  %p192_p3 = pnand %p1267_p0, %p191_p2 }
   0x6   : > { %s1268_s18 = sshll.u32 (!%p192_p3), %s1714_s12, 5 }
   0x7   : > { %195 = sbr.rel (%p192_p3) target bundleno = 309 (0x135), region = 32  ;;  %p236_p4 = scmp.lt.s32.totalorder (!%p192_p3), %s1268_s18, 63 }
   0xc   : > { %v1636_v0 = vld [vmem:[%s1919_s1 + $0x78] sm:$0xff]   ;;  %v1638_v2 = vld [vmem:[%s1919_s1 + $0x70] sm:$0xff]   ;;  %v1640_v4 = vld [vmem:[%s1919_s1 + $0x68] sm:$0xff]   ;;  %s1927_s18 = smov (!%p236_p4, %s1268_s18), 63 }
   0xd   : > { %v1637_v1 = vld [vmem:[%s1919_s1 + $0x38] sm:$0xff]   ;;  %1484 = vmatprep.subr.bf16.mxu0 %v1636_v0  ;;  %1596 = vmatprep.subr.bf16.mxu1 %v1636_v0  ;;  %v1639_v3 = vld [vmem:[%s1919_s1 + $0x30] sm:$0xff]   ;;  %v1641_v5 = vld [vmem:[%s1919_s1 + $0x28] sm:$0xff]   ;;  %s1356_s6 = sshll.u32 %s1927_s18, 3  ;;  %s1272_s5 = sshll.u32 %s1927_s18, 2 }
   0xe   : > { %1485 = vmatpush3.bf16.msra.mxu0 %v1637_v1  ;;  %1604 = vmatpush3.bf16.msra.mxu1 %v1637_v1  ;;  %v1642_v6 = vld [vmem:[%s1919_s1 + $0x60] sm:$0xff]   ;;  %v1644_v8 = vld [vmem:[%s1919_s1 + $0x58] sm:$0xff]   ;;  %s1795_s11 = scalar_lea.vmem %s1918_s0, %s1356_s6  ;;  %v1646_v10 = vld [vmem:[%s1919_s1 + $0x50] sm:$0xff]   ;;  %s1863_s8 = scalar_lea.vmem %s1921_s3, %s1272_s5 }
   0xf   : > { %1486 = vmatprep.subr.bf16.mxu0 %v1638_v2  ;;  %1597 = vmatprep.subr.bf16.mxu1 %v1638_v2  ;;  %v1643_v7 = vld [vmem:[%s1919_s1 + $0x20] sm:$0xff]   ;;  %v1645_v9 = vld [vmem:[%s1919_s1 + $0x18] sm:$0xff]   ;;  %v1647_v13 = vld [vmem:[%s1919_s1 + $0x10] sm:$0xff]  }
  0x10   : > { %v1654_v11 = vld [vmem:[%s1795_s11 + $0x4] ss:$8 sps:$4 sm:$0xff]   ;;  %v1652_v18 = vld [vmem:[%s1795_s11] ss:$8 sps:$4 sm:$0xff]   ;;  %v1658_v20 = vld [vmem:[%s1795_s11 + $0x14] ss:$8 sps:$4 sm:$0xff]  }
  0x11   : > { %v1657_v12 = vld [vmem:[%s1795_s11 + $0x84] ss:$8 sps:$4 sm:$0xff]   ;;  %688 = vmatprep.mubr.bf16.mxu0 %v1654_v11  ;;  %v1655_v19 = vld [vmem:[%s1795_s11 + $0x80] ss:$8 sps:$4 sm:$0xff]   ;;  %v1660_v21 = vld [vmem:[%s1795_s11 + $0x94] ss:$8 sps:$4 sm:$0xff]  }
  0x12   : > { %1487 = vmatpush3.bf16.msra.mxu0 %v1639_v3  ;;  %1605 = vmatpush3.bf16.msra.mxu1 %v1639_v3  ;;  %v1648_v14 = vld [vmem:[%s1919_s1 + $0x48] sm:$0xff]   ;;  %v1650_v16 = vld [vmem:[%s1919_s1 + $0x40] sm:$0xff]   ;;  %v1662_v22 = vld [vmem:[%s1795_s11 + $0x10] ss:$8 sps:$4 sm:$0xff]  }
  0x13   : > { %1488 = vmatprep.subr.bf16.mxu0 %v1640_v4  ;;  %1598 = vmatprep.subr.bf16.mxu1 %v1640_v4  ;;  %v1649_v15 = vld [vmem:[%s1919_s1 + $0x8] sm:$0xff]   ;;  %v1651_v17 = vld [vmem:[%s1919_s1] sm:$0xff]   ;;  %v1663_v23 = vld [vmem:[%s1795_s11 + $0x90] ss:$8 sps:$4 sm:$0xff]  }
  0x14   : > { %752 = vmatprep.mubr.bf16.mxu1 %v1657_v12  ;;  %v1664_v24 = vld [vmem:[%s1795_s11 + $0x24] ss:$8 sps:$4 sm:$0xff]   ;;  %v1668_v26 = vld [vmem:[%s1795_s11 + $0x20] ss:$8 sps:$4 sm:$0xff]   ;;  %v1670_v28 = vld [vmem:[%s1795_s11 + $0x34] ss:$8 sps:$4 sm:$0xff]  }
  0x15   : > { %v1666_v25 = vld [vmem:[%s1795_s11 + $0xa4] ss:$8 sps:$4 sm:$0xff]   ;;  %v1669_v27 = vld [vmem:[%s1795_s11 + $0xa0] ss:$8 sps:$4 sm:$0xff]   ;;  %v1672_v29 = vld [vmem:[%s1795_s11 + $0xb4] ss:$8 sps:$4 sm:$0xff]  }
  0x16   : > { %1489 = vmatpush3.bf16.msra.mxu0 %v1641_v5  ;;  %1606 = vmatpush3.bf16.msra.mxu1 %v1641_v5  ;;  %v1674_v30 = vld [vmem:[%s1795_s11 + $0x30] ss:$8 sps:$4 sm:$0xff]   ;;  %v1676_v32 = vld [vmem:[%s1795_s11 + $0x44] ss:$8 sps:$4 sm:$0xff]   ;;  %v1680_v34 = vld [vmem:[%s1795_s11 + $0x40] ss:$8 sps:$4 sm:$0xff]  }
  0x17   : > { %1490 = vmatprep.subr.bf16.mxu0 %v1642_v6  ;;  %1599 = vmatprep.subr.bf16.mxu1 %v1642_v6  ;;  %v1675_v31 = vld [vmem:[%s1795_s11 + $0xb0] ss:$8 sps:$4 sm:$0xff]   ;;  %v1678_v33 = vld [vmem:[%s1795_s11 + $0xc4] ss:$8 sps:$4 sm:$0xff]   ;;  %v1681_v35 = vld [vmem:[%s1795_s11 + $0xc0] ss:$8 sps:$4 sm:$0xff]  }
  0x18   : > { %v1682_v36 = vld [vmem:[%s1795_s11 + $0x54] ss:$8 sps:$4 sm:$0xff]   ;;  %v1686_v38 = vld [vmem:[%s1795_s11 + $0x50] ss:$8 sps:$4 sm:$0xff]   ;;  %v1688_v40 = vld [vmem:[%s1795_s11 + $0x64] ss:$8 sps:$4 sm:$0xff]  }
  0x19   : > { %v1684_v37 = vld [vmem:[%s1795_s11 + $0xd4] ss:$8 sps:$4 sm:$0xff]   ;;  %v1687_v39 = vld [vmem:[%s1795_s11 + $0xd0] ss:$8 sps:$4 sm:$0xff]   ;;  %v1690_v41 = vld [vmem:[%s1795_s11 + $0xe4] ss:$8 sps:$4 sm:$0xff]  }
  0x1a   : > { %1491 = vmatpush3.bf16.msra.mxu0 %v1643_v7  ;;  %1607 = vmatpush3.bf16.msra.mxu1 %v1643_v7  ;;  %v1692_v42 = vld [vmem:[%s1795_s11 + $0x60] ss:$8 sps:$4 sm:$0xff]   ;;  %v1694_v44 = vld [vmem:[%s1795_s11 + $0x74] ss:$8 sps:$4 sm:$0xff]   ;;  %v1698_v46 = vld [vmem:[%s1795_s11 + $0x70] ss:$8 sps:$4 sm:$0xff]  }
  0x1b   : > { %1492 = vmatprep.subr.bf16.mxu0 %v1644_v8  ;;  %1600 = vmatprep.subr.bf16.mxu1 %v1644_v8  ;;  %v1693_v43 = vld [vmem:[%s1795_s11 + $0xe0] ss:$8 sps:$4 sm:$0xff]   ;;  %v1696_v45 = vld [vmem:[%s1795_s11 + $0xf4] ss:$8 sps:$4 sm:$0xff]   ;;  %v1699_v47 = vld [vmem:[%s1795_s11 + $0xf0] ss:$8 sps:$4 sm:$0xff]  }
  0x1c   : > { %v1853_v53 = vld [vmem:[%s1920_s2] ss:$0 sm:$0xff] }
  0x1e   : > { %1493 = vmatpush3.bf16.msra.mxu0 %v1645_v9  ;;  %1608 = vmatpush3.bf16.msra.mxu1 %v1645_v9 }
  0x1f   : > { %1494 = vmatprep.subr.bf16.mxu0 %v1646_v10  ;;  %1601 = vmatprep.subr.bf16.mxu1 %v1646_v10 }
  0x22   : > { %1495 = vmatpush3.bf16.msra.mxu0 %v1647_v13  ;;  %1609 = vmatpush3.bf16.msra.mxu1 %v1647_v13 }
  0x23   : > { %1496 = vmatprep.subr.bf16.mxu0 %v1648_v14  ;;  %1602 = vmatprep.subr.bf16.mxu1 %v1648_v14 }
  0x26   : > { %1497 = vmatpush3.bf16.msra.mxu0 %v1649_v15  ;;  %1610 = vmatpush3.bf16.msra.mxu1 %v1649_v15 }
  0x27   : > { %1498 = vmatprep.subr.bf16.mxu0 %v1650_v16  ;;  %1603 = vmatprep.subr.bf16.mxu1 %v1650_v16 }
  0x2a   : > { %1499 = vmatpush3.bf16.msra.mxu0 %v1651_v17  ;;  %1611 = vmatpush3.bf16.msra.mxu1 %v1651_v17 }
  0x2d   : > { %689 = vmatmul.mubr.bf16.vlgmr.msra.gmra.mxu0 %v1652_v18  ;;  %753 = vmatmul.mubr.bf16.vlgmr.msra.gmra.mxu1 %v1655_v19 }
  0x2e   : > { %696 = vmatprep.mubr.bf16.mxu0 %v1658_v20  ;;  %760 = vmatprep.mubr.bf16.mxu1 %v1660_v21 }
  0x35   : > { %697 = vmatmul.mubr.bf16.gmra.mxu0 %v1662_v22  ;;  %761 = vmatmul.mubr.bf16.gmra.mxu1 %v1663_v23 }
  0x36   : > { %704 = vmatprep.mubr.bf16.mxu0 %v1664_v24  ;;  %768 = vmatprep.mubr.bf16.mxu1 %v1666_v25 }
  0x3d   : > { %705 = vmatmul.mubr.bf16.gmra.mxu0 %v1668_v26  ;;  %769 = vmatmul.mubr.bf16.gmra.mxu1 %v1669_v27 }
  0x3e   : > { %712 = vmatprep.mubr.bf16.mxu0 %v1670_v28  ;;  %776 = vmatprep.mubr.bf16.mxu1 %v1672_v29 }
  0x45   : > { %713 = vmatmul.mubr.bf16.gmra.mxu0 %v1674_v30  ;;  %777 = vmatmul.mubr.bf16.gmra.mxu1 %v1675_v31 }
  0x46   : > { %720 = vmatprep.mubr.bf16.mxu0 %v1676_v32  ;;  %784 = vmatprep.mubr.bf16.mxu1 %v1678_v33 }
  0x4d   : > { %721 = vmatmul.mubr.bf16.gmra.mxu0 %v1680_v34  ;;  %785 = vmatmul.mubr.bf16.gmra.mxu1 %v1681_v35 }
  0x4e   : > { %728 = vmatprep.mubr.bf16.mxu0 %v1682_v36  ;;  %792 = vmatprep.mubr.bf16.mxu1 %v1684_v37 }
  0x55   : > { %729 = vmatmul.mubr.bf16.gmra.mxu0 %v1686_v38  ;;  %793 = vmatmul.mubr.bf16.gmra.mxu1 %v1687_v39 }
  0x56   : > { %736 = vmatprep.mubr.bf16.mxu0 %v1688_v40  ;;  %800 = vmatprep.mubr.bf16.mxu1 %v1690_v41 }
  0x5d   : > { %737 = vmatmul.mubr.bf16.gmra.mxu0 %v1692_v42  ;;  %801 = vmatmul.mubr.bf16.gmra.mxu1 %v1693_v43 }
  0x5e   : > { %744 = vmatprep.mubr.bf16.mxu0 %v1694_v44  ;;  %808 = vmatprep.mubr.bf16.mxu1 %v1696_v45 }
  0x65   : > { %745 = vmatmul.mubr.bf16.gmra.mxu0 %v1698_v46  ;;  %809 = vmatmul.mubr.bf16.gmra.mxu1 %v1699_v47 }
  0xed   : > { %v1500_v48 = vpop.f32.mrf.mxu0  ;;  %v1548_v49 = vpop.f32.mrf.mxu1 }
  0xef   : > { %v1501_v50 = vpop.f32.mrf.mxu0  ;;  %v1549_v51 = vpop.f32.mrf.mxu1 }
  0xf0   : > { %v1502_v52 = vadd.f32 %v1501_v50, %v1500_v48  ;;  %v1550_v54 = vadd.f32 %v1549_v51, %v1548_v49 }
  0xf1   : > { %v1503_v55 = vpop.f32.mrf.mxu0  ;;  %v1551_v56 = vpop.f32.mrf.mxu1 }
  0xf2   : > { %v923_v57 = vadd.f32 %v1502_v52, %v1853_v53  ;;  %v939_v58 = vadd.f32 %v1550_v54, %v1853_v53 }
  0xf3   : > { %v1504_v59 = vpop.f32.mrf.mxu0  ;;  %v1552_v60 = vpop.f32.mrf.mxu1 }
  0xf4   : > { %v1505_v61 = vadd.f32 %v1504_v59, %v1503_v55  ;;  %v1553_v62 = vadd.f32 %v1552_v60, %v1551_v56  ;;  %v955_v3 = vmax.f32 %v923_v57, 0.0  ;;  %v971_v4 = vmax.f32 %v939_v58, 0.0 }
  0xf5   : > { %v1506_v63 = vpop.f32.mrf.mxu0  ;;  %v1554_v0 = vpop.f32.mrf.mxu1 }
  0xf6   : > { %v924_v1 = vadd.f32 %v1505_v61, %v1853_v53  ;;  %v940_v2 = vadd.f32 %v1553_v62, %v1853_v53 }
  0xf7   : > { %v1507_v5 = vpop.f32.mrf.mxu0  ;;  %v1555_v6 = vpop.f32.mrf.mxu1 }
  0xf8   : > { %v956_v7 = vmax.f32 %v924_v1, 0.0  ;;  %v972_v8 = vmax.f32 %v940_v2, 0.0  ;;  %v1508_v9 = vadd.f32 %v1507_v5, %v1506_v63  ;;  %v1556_v10 = vadd.f32 %v1555_v6, %v1554_v0 }
  0xf9   : > { %v1509_v11 = vpop.f32.mrf.mxu0  ;;  %v1557_v12 = vpop.f32.mrf.mxu1 }
  0xfa   : > { %v1392_v13 = vpack.c.bf16 %v956_v7, %v955_v3  ;;  %v1432_v14 = vpack.c.bf16 %v972_v8, %v971_v4  ;;  %v925_v15 = vadd.f32 %v1508_v9, %v1853_v53  ;;  %v941_v16 = vadd.f32 %v1556_v10, %v1853_v53 }
  0xfb   : > { %v1510_v17 = vpop.f32.mrf.mxu0  ;;  %v1558_v18 = vpop.f32.mrf.mxu1 }
  0xfc   : > { %1393 = vst [vmem:[%s1863_s8] sm:$0xff] %v1392_v13   ;;  %1476 = vst [vmem:[%s1863_s8 + $0x40] sm:$0xff] %v1432_v14   ;;  %v1511_v19 = vadd.f32 %v1510_v17, %v1509_v11  ;;  %v1559_v20 = vadd.f32 %v1558_v18, %v1557_v12  ;;  %v957_v25 = vmax.f32 %v925_v15, 0.0  ;;  %v973_v26 = vmax.f32 %v941_v16, 0.0 }
  0xfd   : > { %v1512_v21 = vpop.f32.mrf.mxu0  ;;  %v1560_v22 = vpop.f32.mrf.mxu1 }
  0xfe   : > { %v926_v23 = vadd.f32 %v1511_v19, %v1853_v53  ;;  %v942_v24 = vadd.f32 %v1559_v20, %v1853_v53 }
  0xff   : > { %v1513_v27 = vpop.f32.mrf.mxu0  ;;  %v1561_v28 = vpop.f32.mrf.mxu1 }
 0x100   : > { %v958_v29 = vmax.f32 %v926_v23, 0.0  ;;  %v974_v30 = vmax.f32 %v942_v24, 0.0  ;;  %v1514_v31 = vadd.f32 %v1513_v27, %v1512_v21  ;;  %v1562_v32 = vadd.f32 %v1561_v28, %v1560_v22 }
 0x101   : > { %v1515_v33 = vpop.f32.mrf.mxu0  ;;  %v1563_v34 = vpop.f32.mrf.mxu1 }
 0x102   : > { %v1397_v35 = vpack.c.bf16 %v958_v29, %v957_v25  ;;  %v1437_v36 = vpack.c.bf16 %v974_v30, %v973_v26  ;;  %v927_v37 = vadd.f32 %v1514_v31, %v1853_v53  ;;  %v943_v38 = vadd.f32 %v1562_v32, %v1853_v53 }
 0x103   : > { %v1516_v39 = vpop.f32.mrf.mxu0  ;;  %v1564_v40 = vpop.f32.mrf.mxu1 }
 0x104   : > { %1469 = vst [vmem:[%s1863_s8 + $0x8] sm:$0xff] %v1397_v35   ;;  %1477 = vst [vmem:[%s1863_s8 + $0x48] sm:$0xff] %v1437_v36   ;;  %v1517_v41 = vadd.f32 %v1516_v39, %v1515_v33  ;;  %v1565_v42 = vadd.f32 %v1564_v40, %v1563_v34  ;;  %v959_v47 = vmax.f32 %v927_v37, 0.0  ;;  %v975_v48 = vmax.f32 %v943_v38, 0.0 }
 0x105   : > { %v1518_v43 = vpop.f32.mrf.mxu0  ;;  %v1566_v44 = vpop.f32.mrf.mxu1 }
 0x106   : > { %v928_v45 = vadd.f32 %v1517_v41, %v1853_v53  ;;  %v944_v46 = vadd.f32 %v1565_v42, %v1853_v53 }
 0x107   : > { %v1519_v49 = vpop.f32.mrf.mxu0  ;;  %v1567_v50 = vpop.f32.mrf.mxu1 }
 0x108   : > { %v960_v51 = vmax.f32 %v928_v45, 0.0  ;;  %v976_v52 = vmax.f32 %v944_v46, 0.0  ;;  %v1520_v54 = vadd.f32 %v1519_v49, %v1518_v43  ;;  %v1568_v55 = vadd.f32 %v1567_v50, %v1566_v44 }
 0x109   : > { %v1521_v56 = vpop.f32.mrf.mxu0  ;;  %v1569_v57 = vpop.f32.mrf.mxu1 }
 0x10a   : > { %v1402_v58 = vpack.c.bf16 %v960_v51, %v959_v47  ;;  %v1442_v59 = vpack.c.bf16 %v976_v52, %v975_v48  ;;  %v929_v60 = vadd.f32 %v1520_v54, %v1853_v53  ;;  %v945_v61 = vadd.f32 %v1568_v55, %v1853_v53 }
 0x10b   : > { %v1522_v62 = vpop.f32.mrf.mxu0  ;;  %v1570_v63 = vpop.f32.mrf.mxu1 }
 0x10c   : > { %1470 = vst [vmem:[%s1863_s8 + $0x10] sm:$0xff] %v1402_v58   ;;  %1478 = vst [vmem:[%s1863_s8 + $0x50] sm:$0xff] %v1442_v59   ;;  %v1523_v0 = vadd.f32 %v1522_v62, %v1521_v56  ;;  %v1571_v1 = vadd.f32 %v1570_v63, %v1569_v57  ;;  %v961_v6 = vmax.f32 %v929_v60, 0.0  ;;  %v977_v7 = vmax.f32 %v945_v61, 0.0 }
 0x10d   : > { %v1524_v2 = vpop.f32.mrf.mxu0  ;;  %v1572_v3 = vpop.f32.mrf.mxu1 }
 0x10e   : > { %v930_v4 = vadd.f32 %v1523_v0, %v1853_v53  ;;  %v946_v5 = vadd.f32 %v1571_v1, %v1853_v53 }
 0x10f   : > { %v1525_v8 = vpop.f32.mrf.mxu0  ;;  %v1573_v9 = vpop.f32.mrf.mxu1 }
 0x110   : > { %v962_v10 = vmax.f32 %v930_v4, 0.0  ;;  %v978_v11 = vmax.f32 %v946_v5, 0.0  ;;  %v1526_v12 = vadd.f32 %v1525_v8, %v1524_v2  ;;  %v1574_v13 = vadd.f32 %v1573_v9, %v1572_v3 }
 0x111   : > { %v1527_v14 = vpop.f32.mrf.mxu0  ;;  %v1575_v15 = vpop.f32.mrf.mxu1 }
 0x112   : > { %v1407_v16 = vpack.c.bf16 %v962_v10, %v961_v6  ;;  %v1447_v17 = vpack.c.bf16 %v978_v11, %v977_v7  ;;  %v931_v18 = vadd.f32 %v1526_v12, %v1853_v53  ;;  %v947_v19 = vadd.f32 %v1574_v13, %v1853_v53 }
 0x113   : > { %v1528_v20 = vpop.f32.mrf.mxu0  ;;  %v1576_v21 = vpop.f32.mrf.mxu1 }
 0x114   : > { %1471 = vst [vmem:[%s1863_s8 + $0x18] sm:$0xff] %v1407_v16   ;;  %1479 = vst [vmem:[%s1863_s8 + $0x58] sm:$0xff] %v1447_v17   ;;  %v1529_v22 = vadd.f32 %v1528_v20, %v1527_v14  ;;  %v1577_v23 = vadd.f32 %v1576_v21, %v1575_v15  ;;  %v963_v28 = vmax.f32 %v931_v18, 0.0  ;;  %v979_v29 = vmax.f32 %v947_v19, 0.0 }
 0x115   : > { %v1530_v24 = vpop.f32.mrf.mxu0  ;;  %v1578_v25 = vpop.f32.mrf.mxu1 }
 0x116   : > { %v932_v26 = vadd.f32 %v1529_v22, %v1853_v53  ;;  %v948_v27 = vadd.f32 %v1577_v23, %v1853_v53 }
 0x117   : > { %v1531_v30 = vpop.f32.mrf.mxu0  ;;  %v1579_v31 = vpop.f32.mrf.mxu1 }
 0x118   : > { %v964_v32 = vmax.f32 %v932_v26, 0.0  ;;  %v980_v33 = vmax.f32 %v948_v27, 0.0  ;;  %v1532_v34 = vadd.f32 %v1531_v30, %v1530_v24  ;;  %v1580_v35 = vadd.f32 %v1579_v31, %v1578_v25 }
 0x119   : > { %v1533_v36 = vpop.f32.mrf.mxu0  ;;  %v1581_v37 = vpop.f32.mrf.mxu1 }
 0x11a   : > { %v1412_v38 = vpack.c.bf16 %v964_v32, %v963_v28  ;;  %v1452_v39 = vpack.c.bf16 %v980_v33, %v979_v29  ;;  %v933_v40 = vadd.f32 %v1532_v34, %v1853_v53  ;;  %v949_v41 = vadd.f32 %v1580_v35, %v1853_v53 }
 0x11b   : > { %v1534_v42 = vpop.f32.mrf.mxu0  ;;  %v1582_v43 = vpop.f32.mrf.mxu1 }
 0x11c   : > { %1472 = vst [vmem:[%s1863_s8 + $0x20] sm:$0xff] %v1412_v38   ;;  %1480 = vst [vmem:[%s1863_s8 + $0x60] sm:$0xff] %v1452_v39   ;;  %v1535_v44 = vadd.f32 %v1534_v42, %v1533_v36  ;;  %v1583_v45 = vadd.f32 %v1582_v43, %v1581_v37  ;;  %v965_v50 = vmax.f32 %v933_v40, 0.0  ;;  %v981_v51 = vmax.f32 %v949_v41, 0.0 }
 0x11d   : > { %v1536_v46 = vpop.f32.mrf.mxu0  ;;  %v1584_v47 = vpop.f32.mrf.mxu1 }
 0x11e   : > { %v934_v48 = vadd.f32 %v1535_v44, %v1853_v53  ;;  %v950_v49 = vadd.f32 %v1583_v45, %v1853_v53 }
 0x11f   : > { %v1537_v52 = vpop.f32.mrf.mxu0  ;;  %v1585_v54 = vpop.f32.mrf.mxu1 }
 0x120   : > { %v966_v55 = vmax.f32 %v934_v48, 0.0  ;;  %v982_v56 = vmax.f32 %v950_v49, 0.0  ;;  %v1538_v57 = vadd.f32 %v1537_v52, %v1536_v46  ;;  %v1586_v58 = vadd.f32 %v1585_v54, %v1584_v47 }
 0x121   : > { %v1539_v59 = vpop.f32.mrf.mxu0  ;;  %v1587_v60 = vpop.f32.mrf.mxu1 }
 0x122   : > { %v1417_v61 = vpack.c.bf16 %v966_v55, %v965_v50  ;;  %v1457_v62 = vpack.c.bf16 %v982_v56, %v981_v51  ;;  %v935_v63 = vadd.f32 %v1538_v57, %v1853_v53  ;;  %v951_v0 = vadd.f32 %v1586_v58, %v1853_v53 }
 0x123   : > { %v1540_v1 = vpop.f32.mrf.mxu0  ;;  %v1588_v2 = vpop.f32.mrf.mxu1 }
 0x124   : > { %1473 = vst [vmem:[%s1863_s8 + $0x28] sm:$0xff] %v1417_v61   ;;  %1481 = vst [vmem:[%s1863_s8 + $0x68] sm:$0xff] %v1457_v62   ;;  %v1541_v3 = vadd.f32 %v1540_v1, %v1539_v59  ;;  %v1589_v4 = vadd.f32 %v1588_v2, %v1587_v60  ;;  %v967_v9 = vmax.f32 %v935_v63, 0.0  ;;  %v983_v10 = vmax.f32 %v951_v0, 0.0 }
 0x125   : > { %v1542_v5 = vpop.f32.mrf.mxu0  ;;  %v1590_v6 = vpop.f32.mrf.mxu1 }
 0x126   : > { %v936_v7 = vadd.f32 %v1541_v3, %v1853_v53  ;;  %v952_v8 = vadd.f32 %v1589_v4, %v1853_v53 }
 0x127   : > { %v1543_v11 = vpop.f32.mrf.mxu0  ;;  %v1591_v12 = vpop.f32.mrf.mxu1 }
 0x128   : > { %v968_v13 = vmax.f32 %v936_v7, 0.0  ;;  %v984_v14 = vmax.f32 %v952_v8, 0.0  ;;  %v1544_v15 = vadd.f32 %v1543_v11, %v1542_v5  ;;  %v1592_v16 = vadd.f32 %v1591_v12, %v1590_v6 }
 0x129   : > { %v1545_v17 = vpop.f32.mrf.mxu0  ;;  %v1593_v18 = vpop.f32.mrf.mxu1 }
 0x12a   : > { %v1422_v19 = vpack.c.bf16 %v968_v13, %v967_v9  ;;  %v1462_v20 = vpack.c.bf16 %v984_v14, %v983_v10  ;;  %v937_v23 = vadd.f32 %v1544_v15, %v1853_v53  ;;  %v953_v24 = vadd.f32 %v1592_v16, %v1853_v53 }
 0x12b   : > { %v1546_v21 = vpop.f32.mrf.mxu0  ;;  %v1594_v22 = vpop.f32.mrf.mxu1 }
 0x12c   : > { %1474 = vst [vmem:[%s1863_s8 + $0x30] sm:$0xff] %v1422_v19   ;;  %1482 = vst [vmem:[%s1863_s8 + $0x70] sm:$0xff] %v1462_v20   ;;  %v1547_v25 = vadd.f32 %v1546_v21, %v1545_v17  ;;  %v1595_v26 = vadd.f32 %v1594_v22, %v1593_v18  ;;  %v969_v29 = vmax.f32 %v937_v23, 0.0  ;;  %v985_v30 = vmax.f32 %v953_v24, 0.0 }
 0x12e   : > { %v938_v27 = vadd.f32 %v1547_v25, %v1853_v53  ;;  %v954_v28 = vadd.f32 %v1595_v26, %v1853_v53 }
 0x130   : > { %v970_v31 = vmax.f32 %v938_v27, 0.0  ;;  %v986_v32 = vmax.f32 %v954_v28, 0.0 }
 0x132   : > { %v1427_v33 = vpack.c.bf16 %v970_v31, %v969_v29  ;;  %v1467_v34 = vpack.c.bf16 %v986_v32, %v985_v30 }
 0x134   : > { %1475 = vst [vmem:[%s1863_s8 + $0x38] sm:$0xff] %v1427_v33   ;;  %1483 = vst [vmem:[%s1863_s8 + $0x78] sm:$0xff] %v1467_v34  }
 0x135 PF: > { %s13_s14 = sadd.s32 1, %s1722_s14   ;;  %s1922_s12 = smov %s1718_s13 }
 0x136   : > { %p10_p5 = scmp.ge.s32.totalorder %s13_s14, 4   ;;  %s1923_s13 = smov %s1925_s15 }
 0x138   :  { %12 = sbr.rel (!%p10_p5) target bundleno = 2 (0x2), region = 76 }

// kernel: img_encoder_resnet_forward.158
= control target key start
LH: loop header
LB: loop body
LE: loop exit
PB: predicated region body
PF: predicated region fallthrough
CT: control target
= control target key end

     0   :  { %s705_s1 = inlined_call_operand.vmem [shape: bf16[128,128], index: 1, kind: input, shape index: {}]   ;;  %s706_s0 = inlined_call_operand.vmem [shape: bf16[128,128], index: 0, kind: input, shape index: {}]   ;;  %s707_s2 = inlined_call_operand.vmem [shape: f32[1,128], index: 2, kind: input, shape index: {}]   ;;  %s708_s3 = inlined_call_operand.vmem [shape: bf16[128,128], index: 3, kind: output, shape index: {}]  }
   0x1   :  { %v594_v0 = vld [vmem:[%s705_s1 + $0x38] sm:$0xff]   ;;  %v595_v1 = vld [vmem:[%s705_s1 + $0x30] sm:$0xff]   ;;  %v596_v2 = vld [vmem:[%s705_s1 + $0x28] sm:$0xff]  }
   0x2   :  { %546 = vmatprep.subr.bf16.mxu0 %v594_v0  ;;  %578 = vmatprep.subr.bf16.mxu1 %v594_v0  ;;  %v597_v3 = vld [vmem:[%s705_s1 + $0x20] sm:$0xff]   ;;  %v598_v6 = vld [vmem:[%s705_s1 + $0x18] sm:$0xff]   ;;  %v599_v7 = vld [vmem:[%s705_s1 + $0x10] sm:$0xff]  }
   0x3   :  { %547 = vmatpush3.bf16.msra.mxu0 %v594_v0  ;;  %586 = vmatpush3.bf16.msra.mxu1 %v594_v0  ;;  %v602_v4 = vld [vmem:[%s706_s0] sm:$0xff]   ;;  %v600_v8 = vld [vmem:[%s705_s1 + $0x8] sm:$0xff]   ;;  %v606_v12 = vld [vmem:[%s706_s0 + $0x10] sm:$0xff]  }
   0x4   :  { %548 = vmatprep.subr.bf16.mxu0 %v595_v1  ;;  %579 = vmatprep.subr.bf16.mxu1 %v595_v1  ;;  %v603_v5 = vld [vmem:[%s706_s0 + $0x20] sm:$0xff]   ;;  %v604_v10 = vld [vmem:[%s706_s0 + $0x8] sm:$0xff]   ;;  %v607_v13 = vld [vmem:[%s706_s0 + $0x30] sm:$0xff]  }
   0x5   :  { %562 = vmatprep.mubr.bf16.mxu0 %v602_v4  ;;  %570 = vmatprep.mubr.bf16.mxu1 %v603_v5  ;;  %v601_v9 = vld [vmem:[%s705_s1] sm:$0xff]   ;;  %v605_v11 = vld [vmem:[%s706_s0 + $0x28] sm:$0xff]   ;;  %v608_v14 = vld [vmem:[%s706_s0 + $0x18] sm:$0xff]  }
   0x6   :  { %v609_v15 = vld [vmem:[%s706_s0 + $0x38] sm:$0xff]   ;;  %v450_v18 = vld [vmem:[%s707_s2] ss:$0 sm:$0xff] }
   0x7   :  { %549 = vmatpush3.bf16.msra.mxu0 %v595_v1  ;;  %587 = vmatpush3.bf16.msra.mxu1 %v595_v1 }
   0x8   :  { %550 = vmatprep.subr.bf16.mxu0 %v596_v2  ;;  %580 = vmatprep.subr.bf16.mxu1 %v596_v2 }
   0xb   :  { %551 = vmatpush3.bf16.msra.mxu0 %v596_v2  ;;  %588 = vmatpush3.bf16.msra.mxu1 %v596_v2 }
   0xc   :  { %552 = vmatprep.subr.bf16.mxu0 %v597_v3  ;;  %581 = vmatprep.subr.bf16.mxu1 %v597_v3 }
   0xf   :  { %553 = vmatpush3.bf16.msra.mxu0 %v597_v3  ;;  %589 = vmatpush3.bf16.msra.mxu1 %v597_v3 }
  0x10   :  { %554 = vmatprep.subr.bf16.mxu0 %v598_v6  ;;  %582 = vmatprep.subr.bf16.mxu1 %v598_v6 }
  0x13   :  { %555 = vmatpush3.bf16.msra.mxu0 %v598_v6  ;;  %590 = vmatpush3.bf16.msra.mxu1 %v598_v6 }
  0x14   :  { %556 = vmatprep.subr.bf16.mxu0 %v599_v7  ;;  %583 = vmatprep.subr.bf16.mxu1 %v599_v7 }
  0x17   :  { %557 = vmatpush3.bf16.msra.mxu0 %v599_v7  ;;  %591 = vmatpush3.bf16.msra.mxu1 %v599_v7 }
  0x18   :  { %558 = vmatprep.subr.bf16.mxu0 %v600_v8  ;;  %584 = vmatprep.subr.bf16.mxu1 %v600_v8 }
  0x1b   :  { %559 = vmatpush3.bf16.msra.mxu0 %v600_v8  ;;  %592 = vmatpush3.bf16.msra.mxu1 %v600_v8 }
  0x1c   :  { %560 = vmatprep.subr.bf16.mxu0 %v601_v9  ;;  %585 = vmatprep.subr.bf16.mxu1 %v601_v9 }
  0x1f   :  { %561 = vmatpush3.bf16.msra.mxu0 %v601_v9  ;;  %593 = vmatpush3.bf16.msra.mxu1 %v601_v9 }
  0x22   :  { %563 = vmatmul.mubr.bf16.vlgmr.msra.gmra.mxu0 %v604_v10  ;;  %571 = vmatmul.mubr.bf16.vlgmr.msra.gmra.mxu1 %v605_v11 }
  0x23   :  { %566 = vmatprep.mubr.bf16.mxu0 %v606_v12  ;;  %574 = vmatprep.mubr.bf16.mxu1 %v607_v13 }
  0x2a   :  { %567 = vmatmul.mubr.bf16.gmra.mxu0 %v608_v14  ;;  %575 = vmatmul.mubr.bf16.gmra.mxu1 %v609_v15 }
  0xe2   :  { %v564_v16 = vpop.f32.mrf.mxu0  ;;  %v572_v17 = vpop.f32.mrf.mxu1 }
  0xe3   :  { %v336_v23 = vadd.f32 %v564_v16, %v450_v18  ;;  %v344_v24 = vadd.f32 %v572_v17, %v450_v18 }
  0xe4   :  { %v213_v19 = vpop.f32.mrf.mxu0  ;;  %v245_v20 = vpop.f32.mrf.mxu1 }
  0xe5   :  { %v334_v27 = vadd.f32 %v450_v18, %v213_v19  ;;  %v342_v28 = vadd.f32 %v450_v18, %v245_v20 }
  0xe6   :  { %v565_v21 = vpop.f32.mrf.mxu0  ;;  %v573_v22 = vpop.f32.mrf.mxu1 }
  0xe7   :  { %v337_v25 = vadd.f32 %v565_v21, %v450_v18  ;;  %v345_v26 = vadd.f32 %v573_v22, %v450_v18 }
  0xe8   :  { %v216_v29 = vpop.f32.mrf.mxu0  ;;  %v248_v30 = vpop.f32.mrf.mxu1 }
  0xe9   :  { %v491_v31 = vpack.c.bf16 %v337_v25, %v336_v23  ;;  %v511_v32 = vpack.c.bf16 %v345_v26, %v344_v24  ;;  %v335_v33 = vadd.f32 %v450_v18, %v216_v29  ;;  %v343_v34 = vadd.f32 %v450_v18, %v248_v30 }
  0xea   :  { %v568_v35 = vpop.f32.mrf.mxu0  ;;  %v576_v36 = vpop.f32.mrf.mxu1 }
  0xeb   :  { %523 = vst [vmem:[%s708_s3 + $0x8] sm:$0xff] %v491_v31   ;;  %527 = vst [vmem:[%s708_s3 + $0x28] sm:$0xff] %v511_v32   ;;  %v486_v37 = vpack.c.bf16 %v335_v33, %v334_v27  ;;  %v506_v38 = vpack.c.bf16 %v343_v34, %v342_v28  ;;  %v340_v43 = vadd.f32 %v568_v35, %v450_v18 }
  0xec   :  { %v229_v39 = vpop.f32.mrf.mxu0  ;;  %v261_v40 = vpop.f32.mrf.mxu1  ;;  %v348_v44 = vadd.f32 %v576_v36, %v450_v18 }
  0xed   :  { %487 = vst [vmem:[%s708_s3] sm:$0xff] %v486_v37   ;;  %526 = vst [vmem:[%s708_s3 + $0x20] sm:$0xff] %v506_v38   ;;  %v338_v47 = vadd.f32 %v450_v18, %v229_v39  ;;  %v346_v48 = vadd.f32 %v450_v18, %v261_v40 }
  0xee   :  { %v569_v41 = vpop.f32.mrf.mxu0  ;;  %v577_v42 = vpop.f32.mrf.mxu1 }
  0xef   :  { %v341_v45 = vadd.f32 %v569_v41, %v450_v18  ;;  %v349_v46 = vadd.f32 %v577_v42, %v450_v18 }
  0xf0   :  { %v232_v49 = vpop.f32.mrf.mxu0  ;;  %v264_v50 = vpop.f32.mrf.mxu1 }
  0xf1   :  { %v501_v51 = vpack.c.bf16 %v341_v45, %v340_v43  ;;  %v521_v52 = vpack.c.bf16 %v349_v46, %v348_v44  ;;  %v339_v53 = vadd.f32 %v450_v18, %v232_v49  ;;  %v347_v54 = vadd.f32 %v450_v18, %v264_v50 }
  0xf3   :  { %525 = vst [vmem:[%s708_s3 + $0x18] sm:$0xff] %v501_v51   ;;  %529 = vst [vmem:[%s708_s3 + $0x38] sm:$0xff] %v521_v52   ;;  %v496_v55 = vpack.c.bf16 %v339_v53, %v338_v47  ;;  %v516_v56 = vpack.c.bf16 %v347_v54, %v346_v48 }
  0xf5   :  { %524 = vst [vmem:[%s708_s3 + $0x10] sm:$0xff] %v496_v55   ;;  %528 = vst [vmem:[%s708_s3 + $0x30] sm:$0xff] %v516_v56  }

// kernel: img_encoder_resnet_forward.161
= control target key start
LH: loop header
LB: loop body
LE: loop exit
PB: predicated region body
PF: predicated region fallthrough
CT: control target
= control target key end

     0   :  { %s874_s1 = inlined_call_operand.vmem [shape: bf16[128,128], index: 1, kind: input, shape index: {}]   ;;  %s875_s0 = inlined_call_operand.vmem [shape: bf16[128,128], index: 0, kind: input, shape index: {}]   ;;  %s876_s2 = inlined_call_operand.vmem [shape: f32[1,128], index: 2, kind: input, shape index: {}]   ;;  %s877_s3 = inlined_call_operand.vmem [shape: bf16[128,128], index: 3, kind: input, shape index: {}]   ;;  %s878_s4 = inlined_call_operand.vmem [shape: bf16[128,128], index: 4, kind: output, shape index: {}]  }
   0x1   :  { %v700_v0 = vld [vmem:[%s874_s1 + $0x38] sm:$0xff]   ;;  %v701_v1 = vld [vmem:[%s874_s1 + $0x30] sm:$0xff]   ;;  %v702_v2 = vld [vmem:[%s874_s1 + $0x28] sm:$0xff]  }
   0x2   :  { %652 = vmatprep.subr.bf16.mxu0 %v700_v0  ;;  %684 = vmatprep.subr.bf16.mxu1 %v700_v0  ;;  %v703_v3 = vld [vmem:[%s874_s1 + $0x20] sm:$0xff]   ;;  %v704_v6 = vld [vmem:[%s874_s1 + $0x18] sm:$0xff]   ;;  %v705_v7 = vld [vmem:[%s874_s1 + $0x10] sm:$0xff]  }
   0x3   :  { %653 = vmatpush3.bf16.msra.mxu0 %v700_v0  ;;  %692 = vmatpush3.bf16.msra.mxu1 %v700_v0  ;;  %v708_v4 = vld [vmem:[%s875_s0] sm:$0xff]   ;;  %v706_v8 = vld [vmem:[%s874_s1 + $0x8] sm:$0xff]   ;;  %v712_v12 = vld [vmem:[%s875_s0 + $0x10] sm:$0xff]  }
   0x4   :  { %654 = vmatprep.subr.bf16.mxu0 %v701_v1  ;;  %685 = vmatprep.subr.bf16.mxu1 %v701_v1  ;;  %v709_v5 = vld [vmem:[%s875_s0 + $0x20] sm:$0xff]   ;;  %v710_v10 = vld [vmem:[%s875_s0 + $0x8] sm:$0xff]   ;;  %v713_v13 = vld [vmem:[%s875_s0 + $0x30] sm:$0xff]  }
   0x5   :  { %668 = vmatprep.mubr.bf16.mxu0 %v708_v4  ;;  %676 = vmatprep.mubr.bf16.mxu1 %v709_v5  ;;  %v707_v9 = vld [vmem:[%s874_s1] sm:$0xff]   ;;  %v711_v11 = vld [vmem:[%s875_s0 + $0x28] sm:$0xff]   ;;  %v714_v14 = vld [vmem:[%s875_s0 + $0x18] sm:$0xff]  }
   0x6   :  { %v715_v15 = vld [vmem:[%s875_s0 + $0x38] sm:$0xff]   ;;  %v792_v16 = vld [vmem:[%s876_s2] ss:$0 sm:$0xff]  ;;  %v622_v17 = vld [vmem:[%s877_s3 + $0x8] sm:$0xff]  }
   0x7   :  { %655 = vmatpush3.bf16.msra.mxu0 %v701_v1  ;;  %693 = vmatpush3.bf16.msra.mxu1 %v701_v1  ;;  %v626_v18 = vld [vmem:[%s877_s3 + $0x28] sm:$0xff]   ;;  %v551_v21 = vld [vmem:[%s877_s3] sm:$0xff]   ;;  %v556_v24 = vunpack.c.l.bf16 %v622_v17  ;;  %v811_v29 = vld [vmem:[%s877_s3 + $0x18] sm:$0xff]   ;;  %v557_v38 = vunpack.c.h.bf16 %v622_v17 }
   0x8   :  { %656 = vmatprep.subr.bf16.mxu0 %v702_v2  ;;  %686 = vmatprep.subr.bf16.mxu1 %v702_v2  ;;  %v625_v22 = vld [vmem:[%s877_s3 + $0x20] sm:$0xff]   ;;  %v572_v26 = vunpack.c.l.bf16 %v626_v18  ;;  %v816_v30 = vld [vmem:[%s877_s3 + $0x38] sm:$0xff]   ;;  %v552_v32 = vunpack.c.l.bf16 %v551_v21  ;;  %v823_v35 = vld [vmem:[%s877_s3 + $0x10] sm:$0xff]   ;;  %v573_v40 = vunpack.c.h.bf16 %v626_v18  ;;  %v553_v41 = vunpack.c.h.bf16 %v551_v21 }
   0x9   :  { %v568_v34 = vunpack.c.l.bf16 %v625_v22  ;;  %v828_v36 = vld [vmem:[%s877_s3 + $0x30] sm:$0xff]   ;;  %v569_v42 = vunpack.c.h.bf16 %v625_v22  ;;  %v564_v45 = vunpack.c.l.bf16 %v811_v29  ;;  %v580_v46 = vunpack.c.l.bf16 %v816_v30 }
   0xa   :  { %v560_v51 = vunpack.c.l.bf16 %v823_v35  ;;  %v576_v52 = vunpack.c.l.bf16 %v828_v36  ;;  %v565_v61 = vunpack.c.h.bf16 %v811_v29  ;;  %v581_v62 = vunpack.c.h.bf16 %v816_v30 }
   0xb   :  { %657 = vmatpush3.bf16.msra.mxu0 %v702_v2  ;;  %694 = vmatpush3.bf16.msra.mxu1 %v702_v2  ;;  %v561_v22 = vunpack.c.h.bf16 %v823_v35 }
   0xc   :  { %658 = vmatprep.subr.bf16.mxu0 %v703_v3  ;;  %687 = vmatprep.subr.bf16.mxu1 %v703_v3 }
   0xf   :  { %659 = vmatpush3.bf16.msra.mxu0 %v703_v3  ;;  %695 = vmatpush3.bf16.msra.mxu1 %v703_v3 }
  0x10   :  { %660 = vmatprep.subr.bf16.mxu0 %v704_v6  ;;  %688 = vmatprep.subr.bf16.mxu1 %v704_v6 }
  0x13   :  { %661 = vmatpush3.bf16.msra.mxu0 %v704_v6  ;;  %696 = vmatpush3.bf16.msra.mxu1 %v704_v6 }
  0x14   :  { %662 = vmatprep.subr.bf16.mxu0 %v705_v7  ;;  %689 = vmatprep.subr.bf16.mxu1 %v705_v7 }
  0x17   :  { %663 = vmatpush3.bf16.msra.mxu0 %v705_v7  ;;  %697 = vmatpush3.bf16.msra.mxu1 %v705_v7 }
  0x18   :  { %664 = vmatprep.subr.bf16.mxu0 %v706_v8  ;;  %690 = vmatprep.subr.bf16.mxu1 %v706_v8 }
  0x1b   :  { %665 = vmatpush3.bf16.msra.mxu0 %v706_v8  ;;  %698 = vmatpush3.bf16.msra.mxu1 %v706_v8 }
  0x1c   :  { %666 = vmatprep.subr.bf16.mxu0 %v707_v9  ;;  %691 = vmatprep.subr.bf16.mxu1 %v707_v9 }
  0x1f   :  { %667 = vmatpush3.bf16.msra.mxu0 %v707_v9  ;;  %699 = vmatpush3.bf16.msra.mxu1 %v707_v9 }
  0x22   :  { %669 = vmatmul.mubr.bf16.vlgmr.msra.gmra.mxu0 %v710_v10  ;;  %677 = vmatmul.mubr.bf16.vlgmr.msra.gmra.mxu1 %v711_v11 }
  0x23   :  { %672 = vmatprep.mubr.bf16.mxu0 %v712_v12  ;;  %680 = vmatprep.mubr.bf16.mxu1 %v713_v13 }
  0x2a   :  { %673 = vmatmul.mubr.bf16.gmra.mxu0 %v714_v14  ;;  %681 = vmatmul.mubr.bf16.gmra.mxu1 %v715_v15 }
  0xe2   :  { %v670_v19 = vpop.f32.mrf.mxu0  ;;  %v678_v20 = vpop.f32.mrf.mxu1 }
  0xe3   :  { %v339_v23 = vadd.f32 %v670_v19, %v792_v16  ;;  %v347_v25 = vadd.f32 %v678_v20, %v792_v16 }
  0xe4   :  { %v216_v27 = vpop.f32.mrf.mxu0  ;;  %v248_v28 = vpop.f32.mrf.mxu1 }
  0xe5   :  { %v337_v31 = vadd.f32 %v792_v16, %v216_v27  ;;  %v345_v33 = vadd.f32 %v792_v16, %v248_v28  ;;  %v387_v43 = vadd.f32 %v556_v24, %v339_v23  ;;  %v395_v44 = vadd.f32 %v572_v26, %v347_v25 }
  0xe6   :  { %v671_v37 = vpop.f32.mrf.mxu0  ;;  %v679_v39 = vpop.f32.mrf.mxu1  ;;  %v577_v23 = vunpack.c.h.bf16 %v828_v36 }
  0xe7   :  { %v340_v47 = vadd.f32 %v671_v37, %v792_v16  ;;  %v348_v48 = vadd.f32 %v679_v39, %v792_v16  ;;  %v385_v53 = vadd.f32 %v552_v32, %v337_v31  ;;  %v393_v54 = vadd.f32 %v568_v34, %v345_v33 }
  0xe8   :  { %v219_v49 = vpop.f32.mrf.mxu0  ;;  %v251_v50 = vpop.f32.mrf.mxu1  ;;  %v403_v63 = vmax.f32 %v387_v43, 0.0  ;;  %v411_v0 = vmax.f32 %v395_v44, 0.0 }
  0xe9   :  { %v338_v55 = vadd.f32 %v792_v16, %v219_v49  ;;  %v346_v56 = vadd.f32 %v792_v16, %v251_v50  ;;  %v388_v57 = vadd.f32 %v557_v38, %v340_v47  ;;  %v396_v58 = vadd.f32 %v573_v40, %v348_v48 }
  0xea   :  { %v674_v59 = vpop.f32.mrf.mxu0  ;;  %v682_v60 = vpop.f32.mrf.mxu1  ;;  %v401_v9 = vmax.f32 %v385_v53, 0.0  ;;  %v409_v10 = vmax.f32 %v393_v54, 0.0 }
  0xeb   :  { %v386_v1 = vadd.f32 %v553_v41, %v338_v55  ;;  %v394_v2 = vadd.f32 %v569_v42, %v346_v56  ;;  %v404_v3 = vmax.f32 %v388_v57, 0.0  ;;  %v412_v4 = vmax.f32 %v396_v58, 0.0 }
  0xec   :  { %v343_v5 = vadd.f32 %v674_v59, %v792_v16  ;;  %v351_v6 = vadd.f32 %v682_v60, %v792_v16  ;;  %v232_v7 = vpop.f32.mrf.mxu0  ;;  %v264_v8 = vpop.f32.mrf.mxu1 }
  0xed   :  { %v402_v11 = vmax.f32 %v386_v1, 0.0  ;;  %v410_v12 = vmax.f32 %v394_v2, 0.0  ;;  %v590_v13 = vpack.c.bf16 %v404_v3, %v403_v63  ;;  %v610_v14 = vpack.c.bf16 %v412_v4, %v411_v0 }
  0xee   :  { %v341_v15 = vadd.f32 %v792_v16, %v232_v7  ;;  %v349_v17 = vadd.f32 %v792_v16, %v264_v8  ;;  %v675_v18 = vpop.f32.mrf.mxu0  ;;  %v683_v19 = vpop.f32.mrf.mxu1  ;;  %v391_v24 = vadd.f32 %v564_v45, %v343_v5  ;;  %v399_v25 = vadd.f32 %v580_v46, %v351_v6 }
  0xef   :  { %v585_v20 = vpack.c.bf16 %v402_v11, %v401_v9  ;;  %v605_v21 = vpack.c.bf16 %v410_v12, %v409_v10  ;;  %629 = vst [vmem:[%s878_s4 + $0x8] sm:$0xff] %v590_v13   ;;  %633 = vst [vmem:[%s878_s4 + $0x28] sm:$0xff] %v610_v14   ;;  %v344_v26 = vadd.f32 %v675_v18, %v792_v16 }
  0xf0   :  { %v352_v27 = vadd.f32 %v683_v19, %v792_v16  ;;  %v235_v28 = vpop.f32.mrf.mxu0  ;;  %v267_v29 = vpop.f32.mrf.mxu1  ;;  %v389_v30 = vadd.f32 %v560_v51, %v341_v15  ;;  %v397_v31 = vadd.f32 %v576_v52, %v349_v17  ;;  %v407_v38 = vmax.f32 %v391_v24, 0.0 }
  0xf1   :  { %586 = vst [vmem:[%s878_s4] sm:$0xff] %v585_v20   ;;  %632 = vst [vmem:[%s878_s4 + $0x20] sm:$0xff] %v605_v21   ;;  %v342_v32 = vadd.f32 %v792_v16, %v235_v28  ;;  %v350_v33 = vadd.f32 %v792_v16, %v267_v29  ;;  %v392_v34 = vadd.f32 %v565_v61, %v344_v26  ;;  %v415_v39 = vmax.f32 %v399_v25, 0.0 }
  0xf2   :  { %v400_v35 = vadd.f32 %v581_v62, %v352_v27  ;;  %v405_v42 = vmax.f32 %v389_v30, 0.0  ;;  %v413_v43 = vmax.f32 %v397_v31, 0.0 }
  0xf3   :  { %v390_v36 = vadd.f32 %v561_v22, %v342_v32  ;;  %v398_v37 = vadd.f32 %v577_v23, %v350_v33  ;;  %v408_v40 = vmax.f32 %v392_v34, 0.0 }
  0xf4   :  { %v416_v41 = vmax.f32 %v400_v35, 0.0 }
  0xf5   :  { %v406_v44 = vmax.f32 %v390_v36, 0.0  ;;  %v414_v45 = vmax.f32 %v398_v37, 0.0  ;;  %v600_v46 = vpack.c.bf16 %v408_v40, %v407_v38 }
  0xf6   :  { %v620_v47 = vpack.c.bf16 %v416_v41, %v415_v39 }
  0xf7   :  { %v595_v48 = vpack.c.bf16 %v406_v44, %v405_v42  ;;  %v615_v49 = vpack.c.bf16 %v414_v45, %v413_v43  ;;  %631 = vst [vmem:[%s878_s4 + $0x18] sm:$0xff] %v600_v46  }
  0xf8   :  { %635 = vst [vmem:[%s878_s4 + $0x38] sm:$0xff] %v620_v47  }
  0xf9   :  { %630 = vst [vmem:[%s878_s4 + $0x10] sm:$0xff] %v595_v48   ;;  %634 = vst [vmem:[%s878_s4 + $0x30] sm:$0xff] %v615_v49  }

// kernel: img_encoder_resnet_forward.170
= control target key start
LH: loop header
LB: loop body
LE: loop exit
PB: predicated region body
PF: predicated region fallthrough
CT: control target
= control target key end

     0   :  { %s477_s1 = inlined_call_operand.vmem [shape: bf16[256,128], index: 1, kind: input, shape index: {}]   ;;  %s478_s0 = inlined_call_operand.vmem [shape: bf16[32,256], index: 0, kind: input, shape index: {}]   ;;  %s479_s2 = inlined_call_operand.vmem [shape: f32[1,128], index: 2, kind: input, shape index: {}]   ;;  %s480_s3 = inlined_call_operand.vmem [shape: bf16[32,128], index: 3, kind: output, shape index: {}]  }
   0x1   :  { %v366_v0 = vld [vmem:[%s477_s1 + $0x78] sm:$0xff]   ;;  %v368_v2 = vld [vmem:[%s477_s1 + $0x70] sm:$0xff]   ;;  %v370_v4 = vld [vmem:[%s477_s1 + $0x68] sm:$0xff]  }
   0x2   :  { %v367_v1 = vld [vmem:[%s477_s1 + $0x38] sm:$0xff]   ;;  %322 = vmatprep.subr.bf16.mxu0 %v366_v0  ;;  %350 = vmatprep.subr.bf16.mxu1 %v366_v0  ;;  %v369_v3 = vld [vmem:[%s477_s1 + $0x30] sm:$0xff]   ;;  %v371_v5 = vld [vmem:[%s477_s1 + $0x28] sm:$0xff]  }
   0x3   :  { %323 = vmatpush3.bf16.msra.mxu0 %v367_v1  ;;  %358 = vmatpush3.bf16.msra.mxu1 %v367_v1  ;;  %v372_v6 = vld [vmem:[%s477_s1 + $0x60] sm:$0xff]   ;;  %v374_v8 = vld [vmem:[%s477_s1 + $0x58] sm:$0xff]   ;;  %v376_v10 = vld [vmem:[%s477_s1 + $0x50] sm:$0xff]  }
   0x4   :  { %324 = vmatprep.subr.bf16.mxu0 %v368_v2  ;;  %351 = vmatprep.subr.bf16.mxu1 %v368_v2  ;;  %v373_v7 = vld [vmem:[%s477_s1 + $0x20] sm:$0xff]   ;;  %v375_v9 = vld [vmem:[%s477_s1 + $0x18] sm:$0xff]   ;;  %v377_v13 = vld [vmem:[%s477_s1 + $0x10] sm:$0xff]  }
   0x5   :  { %v384_v11 = vld [vmem:[%s478_s0 + $0x4] ss:$8 sps:$4 sm:$0xff]   ;;  %v387_v12 = vld [vmem:[%s478_s0 + $0x14] ss:$8 sps:$4 sm:$0xff]   ;;  %v382_v18 = vld [vmem:[%s478_s0] ss:$8 sps:$4 sm:$0xff]  }
   0x6   :  { %v378_v14 = vld [vmem:[%s477_s1 + $0x48] sm:$0xff]   ;;  %211 = vmatprep.mubr.bf16.mxu0 %v384_v11  ;;  %219 = vmatprep.mubr.bf16.mxu1 %v387_v12  ;;  %v380_v16 = vld [vmem:[%s477_s1 + $0x40] sm:$0xff]   ;;  %v385_v19 = vld [vmem:[%s478_s0 + $0x10] ss:$8 sps:$4 sm:$0xff]  }
   0x7   :  { %325 = vmatpush3.bf16.msra.mxu0 %v369_v3  ;;  %359 = vmatpush3.bf16.msra.mxu1 %v369_v3  ;;  %v379_v15 = vld [vmem:[%s477_s1 + $0x8] sm:$0xff]   ;;  %v381_v17 = vld [vmem:[%s477_s1] sm:$0xff]  }
   0x8   :  { %326 = vmatprep.subr.bf16.mxu0 %v370_v4  ;;  %352 = vmatprep.subr.bf16.mxu1 %v370_v4  ;;  %v302_v26 = vld [vmem:[%s479_s2] ss:$0 sm:$0xff] }
   0xb   :  { %327 = vmatpush3.bf16.msra.mxu0 %v371_v5  ;;  %360 = vmatpush3.bf16.msra.mxu1 %v371_v5 }
   0xc   :  { %328 = vmatprep.subr.bf16.mxu0 %v372_v6  ;;  %353 = vmatprep.subr.bf16.mxu1 %v372_v6 }
   0xf   :  { %329 = vmatpush3.bf16.msra.mxu0 %v373_v7  ;;  %361 = vmatpush3.bf16.msra.mxu1 %v373_v7 }
  0x10   :  { %330 = vmatprep.subr.bf16.mxu0 %v374_v8  ;;  %354 = vmatprep.subr.bf16.mxu1 %v374_v8 }
  0x13   :  { %331 = vmatpush3.bf16.msra.mxu0 %v375_v9  ;;  %362 = vmatpush3.bf16.msra.mxu1 %v375_v9 }
  0x14   :  { %332 = vmatprep.subr.bf16.mxu0 %v376_v10  ;;  %355 = vmatprep.subr.bf16.mxu1 %v376_v10 }
  0x17   :  { %333 = vmatpush3.bf16.msra.mxu0 %v377_v13  ;;  %363 = vmatpush3.bf16.msra.mxu1 %v377_v13 }
  0x18   :  { %334 = vmatprep.subr.bf16.mxu0 %v378_v14  ;;  %356 = vmatprep.subr.bf16.mxu1 %v378_v14 }
  0x1b   :  { %335 = vmatpush3.bf16.msra.mxu0 %v379_v15  ;;  %364 = vmatpush3.bf16.msra.mxu1 %v379_v15 }
  0x1c   :  { %336 = vmatprep.subr.bf16.mxu0 %v380_v16  ;;  %357 = vmatprep.subr.bf16.mxu1 %v380_v16 }
  0x1f   :  { %337 = vmatpush3.bf16.msra.mxu0 %v381_v17  ;;  %365 = vmatpush3.bf16.msra.mxu1 %v381_v17 }
  0x22   :  { %212 = vmatmul.mubr.bf16.vlgmr.msra.gmra.mxu0 %v382_v18  ;;  %220 = vmatmul.mubr.bf16.vlgmr.msra.gmra.mxu1 %v385_v19 }
  0xe2   :  { %v338_v20 = vpop.f32.mrf.mxu0  ;;  %v344_v21 = vpop.f32.mrf.mxu1 }
  0xe4   :  { %v339_v22 = vpop.f32.mrf.mxu0  ;;  %v345_v23 = vpop.f32.mrf.mxu1 }
  0xe5   :  { %v340_v24 = vadd.f32 %v339_v22, %v338_v20  ;;  %v346_v25 = vadd.f32 %v345_v23, %v344_v21 }
  0xe6   :  { %v341_v27 = vpop.f32.mrf.mxu0  ;;  %v347_v28 = vpop.f32.mrf.mxu1 }
  0xe7   :  { %v250_v31 = vadd.f32 %v340_v24, %v302_v26  ;;  %v252_v32 = vadd.f32 %v346_v25, %v302_v26 }
  0xe8   :  { %v342_v29 = vpop.f32.mrf.mxu0  ;;  %v348_v30 = vpop.f32.mrf.mxu1 }
  0xe9   :  { %v343_v33 = vadd.f32 %v342_v29, %v341_v27  ;;  %v349_v34 = vadd.f32 %v348_v30, %v347_v28  ;;  %v254_v37 = vmax.f32 %v250_v31, 0.0  ;;  %v256_v38 = vmax.f32 %v252_v32, 0.0 }
  0xeb   :  { %v251_v35 = vadd.f32 %v343_v33, %v302_v26  ;;  %v253_v36 = vadd.f32 %v349_v34, %v302_v26 }
  0xed   :  { %v255_v39 = vmax.f32 %v251_v35, 0.0  ;;  %v257_v40 = vmax.f32 %v253_v36, 0.0 }
  0xef   :  { %v314_v41 = vpack.c.bf16 %v255_v39, %v254_v37  ;;  %v319_v42 = vpack.c.bf16 %v257_v40, %v256_v38 }
  0xf1   :  { %315 = vst [vmem:[%s480_s3] sm:$0xff] %v314_v41   ;;  %321 = vst [vmem:[%s480_s3 + $0x8] sm:$0xff] %v319_v42  }

// kernel: img_encoder_resnet_forward.168
= control target key start
LH: loop header
LB: loop body
LE: loop exit
PB: predicated region body
PF: predicated region fallthrough
CT: control target
= control target key end

     0   :  { %s335_s1 = inlined_call_operand.vmem [shape: bf16[128,128], index: 1, kind: input, shape index: {}]   ;;  %s336_s0 = inlined_call_operand.vmem [shape: bf16[32,128], index: 0, kind: input, shape index: {}]   ;;  %s337_s2 = inlined_call_operand.vmem [shape: f32[1,128], index: 2, kind: input, shape index: {}]   ;;  %s338_s3 = inlined_call_operand.vmem [shape: bf16[32,128], index: 3, kind: output, shape index: {}]  }
   0x1   :  { %v266_v0 = vld [vmem:[%s335_s1 + $0x38] sm:$0xff]   ;;  %v267_v1 = vld [vmem:[%s335_s1 + $0x30] sm:$0xff]   ;;  %v268_v2 = vld [vmem:[%s335_s1 + $0x28] sm:$0xff]  }
   0x2   :  { %246 = vmatprep.subr.bf16.mxu0 %v266_v0  ;;  %v269_v3 = vld [vmem:[%s335_s1 + $0x20] sm:$0xff]   ;;  %v270_v5 = vld [vmem:[%s335_s1 + $0x18] sm:$0xff]   ;;  %v271_v6 = vld [vmem:[%s335_s1 + $0x10] sm:$0xff]  }
   0x3   :  { %247 = vmatpush3.bf16.msra.mxu0 %v266_v0  ;;  %v274_v4 = vld [vmem:[%s336_s0] sm:$0xff]   ;;  %v272_v7 = vld [vmem:[%s335_s1 + $0x8] sm:$0xff]  }
   0x4   :  { %248 = vmatprep.subr.bf16.mxu0 %v267_v1  ;;  %262 = vmatprep.mubr.bf16.mxu0 %v274_v4  ;;  %v273_v8 = vld [vmem:[%s335_s1] sm:$0xff]   ;;  %v275_v9 = vld [vmem:[%s336_s0 + $0x8] sm:$0xff]  }
   0x5   :  { %v216_v11 = vld [vmem:[%s337_s2] ss:$0 sm:$0xff] }
   0x7   :  { %249 = vmatpush3.bf16.msra.mxu0 %v267_v1 }
   0x8   :  { %250 = vmatprep.subr.bf16.mxu0 %v268_v2 }
   0xb   :  { %251 = vmatpush3.bf16.msra.mxu0 %v268_v2 }
   0xc   :  { %252 = vmatprep.subr.bf16.mxu0 %v269_v3 }
   0xf   :  { %253 = vmatpush3.bf16.msra.mxu0 %v269_v3 }
  0x10   :  { %254 = vmatprep.subr.bf16.mxu0 %v270_v5 }
  0x13   :  { %255 = vmatpush3.bf16.msra.mxu0 %v270_v5 }
  0x14   :  { %256 = vmatprep.subr.bf16.mxu0 %v271_v6 }
  0x17   :  { %257 = vmatpush3.bf16.msra.mxu0 %v271_v6 }
  0x18   :  { %258 = vmatprep.subr.bf16.mxu0 %v272_v7 }
  0x1b   :  { %259 = vmatpush3.bf16.msra.mxu0 %v272_v7 }
  0x1c   :  { %260 = vmatprep.subr.bf16.mxu0 %v273_v8 }
  0x1f   :  { %261 = vmatpush3.bf16.msra.mxu0 %v273_v8 }
  0x22   :  { %263 = vmatmul.mubr.bf16.vlgmr.msra.gmra.mxu0 %v275_v9 }
  0xe2   :  { %v264_v10 = vpop.f32.mrf.mxu0 }
  0xe3   :  { %v180_v14 = vadd.f32 %v264_v10, %v216_v11 }
  0xe4   :  { %v141_v12 = vpop.f32.mrf.mxu0 }
  0xe5   :  { %v178_v17 = vadd.f32 %v216_v11, %v141_v12 }
  0xe6   :  { %v265_v13 = vpop.f32.mrf.mxu0 }
  0xe7   :  { %v181_v15 = vadd.f32 %v265_v13, %v216_v11 }
  0xe8   :  { %v144_v16 = vpop.f32.mrf.mxu0 }
  0xe9   :  { %v233_v18 = vpack.c.bf16 %v181_v15, %v180_v14  ;;  %v179_v19 = vadd.f32 %v216_v11, %v144_v16 }
  0xeb   :  { %235 = vst [vmem:[%s338_s3 + $0x8] sm:$0xff] %v233_v18   ;;  %v228_v20 = vpack.c.bf16 %v179_v19, %v178_v17 }
  0xed   :  { %229 = vst [vmem:[%s338_s3] sm:$0xff] %v228_v20  }

// kernel: img_encoder_resnet_forward.172
= control target key start
LH: loop header
LB: loop body
LE: loop exit
PB: predicated region body
PF: predicated region fallthrough
CT: control target
= control target key end

     0   :  { %s339_s1 = inlined_call_operand.vmem [shape: bf16[128,128], index: 1, kind: input, shape index: {}]   ;;  %s340_s0 = inlined_call_operand.vmem [shape: bf16[32,128], index: 0, kind: input, shape index: {}]   ;;  %s341_s2 = inlined_call_operand.vmem [shape: f32[1,128], index: 2, kind: input, shape index: {}]   ;;  %s342_s3 = inlined_call_operand.vmem [shape: bf16[32,128], index: 3, kind: output, shape index: {}]  }
   0x1   :  { %v270_v0 = vld [vmem:[%s339_s1 + $0x38] sm:$0xff]   ;;  %v271_v1 = vld [vmem:[%s339_s1 + $0x30] sm:$0xff]   ;;  %v272_v2 = vld [vmem:[%s339_s1 + $0x28] sm:$0xff]  }
   0x2   :  { %250 = vmatprep.subr.bf16.mxu0 %v270_v0  ;;  %v273_v3 = vld [vmem:[%s339_s1 + $0x20] sm:$0xff]   ;;  %v274_v5 = vld [vmem:[%s339_s1 + $0x18] sm:$0xff]   ;;  %v275_v6 = vld [vmem:[%s339_s1 + $0x10] sm:$0xff]  }
   0x3   :  { %251 = vmatpush3.bf16.msra.mxu0 %v270_v0  ;;  %v278_v4 = vld [vmem:[%s340_s0] sm:$0xff]   ;;  %v276_v7 = vld [vmem:[%s339_s1 + $0x8] sm:$0xff]  }
   0x4   :  { %252 = vmatprep.subr.bf16.mxu0 %v271_v1  ;;  %266 = vmatprep.mubr.bf16.mxu0 %v278_v4  ;;  %v277_v8 = vld [vmem:[%s339_s1] sm:$0xff]   ;;  %v279_v9 = vld [vmem:[%s340_s0 + $0x8] sm:$0xff]  }
   0x5   :  { %v220_v11 = vld [vmem:[%s341_s2] ss:$0 sm:$0xff] }
   0x7   :  { %253 = vmatpush3.bf16.msra.mxu0 %v271_v1 }
   0x8   :  { %254 = vmatprep.subr.bf16.mxu0 %v272_v2 }
   0xb   :  { %255 = vmatpush3.bf16.msra.mxu0 %v272_v2 }
   0xc   :  { %256 = vmatprep.subr.bf16.mxu0 %v273_v3 }
   0xf   :  { %257 = vmatpush3.bf16.msra.mxu0 %v273_v3 }
  0x10   :  { %258 = vmatprep.subr.bf16.mxu0 %v274_v5 }
  0x13   :  { %259 = vmatpush3.bf16.msra.mxu0 %v274_v5 }
  0x14   :  { %260 = vmatprep.subr.bf16.mxu0 %v275_v6 }
  0x17   :  { %261 = vmatpush3.bf16.msra.mxu0 %v275_v6 }
  0x18   :  { %262 = vmatprep.subr.bf16.mxu0 %v276_v7 }
  0x1b   :  { %263 = vmatpush3.bf16.msra.mxu0 %v276_v7 }
  0x1c   :  { %264 = vmatprep.subr.bf16.mxu0 %v277_v8 }
  0x1f   :  { %265 = vmatpush3.bf16.msra.mxu0 %v277_v8 }
  0x22   :  { %267 = vmatmul.mubr.bf16.vlgmr.msra.gmra.mxu0 %v279_v9 }
  0xe2   :  { %v268_v10 = vpop.f32.mrf.mxu0 }
  0xe3   :  { %v180_v13 = vadd.f32 %v268_v10, %v220_v11 }
  0xe4   :  { %v141_v12 = vpop.f32.mrf.mxu0 }
  0xe5   :  { %v178_v15 = vadd.f32 %v220_v11, %v141_v12  ;;  %v184_v18 = vmax.f32 %v180_v13, 0.0 }
  0xe6   :  { %v269_v14 = vpop.f32.mrf.mxu0 }
  0xe7   :  { %v181_v16 = vadd.f32 %v269_v14, %v220_v11  ;;  %v182_v21 = vmax.f32 %v178_v15, 0.0 }
  0xe8   :  { %v144_v17 = vpop.f32.mrf.mxu0 }
  0xe9   :  { %v185_v19 = vmax.f32 %v181_v16, 0.0  ;;  %v179_v20 = vadd.f32 %v220_v11, %v144_v17 }
  0xeb   :  { %v237_v22 = vpack.c.bf16 %v185_v19, %v184_v18  ;;  %v183_v23 = vmax.f32 %v179_v20, 0.0 }
  0xed   :  { %239 = vst [vmem:[%s342_s3 + $0x8] sm:$0xff] %v237_v22   ;;  %v232_v24 = vpack.c.bf16 %v183_v23, %v182_v21 }
  0xef   :  { %233 = vst [vmem:[%s342_s3] sm:$0xff] %v232_v24  }

// kernel: img_encoder_resnet_forward.171
= control target key start
LH: loop header
LB: loop body
LE: loop exit
PB: predicated region body
PF: predicated region fallthrough
CT: control target
= control target key end

     0   :  { %s374_s1 = inlined_call_operand.vmem [shape: bf16[128,128], index: 1, kind: input, shape index: {}]   ;;  %s375_s0 = inlined_call_operand.vmem [shape: bf16[32,128], index: 0, kind: input, shape index: {}]   ;;  %s376_s2 = inlined_call_operand.vmem [shape: f32[1,128], index: 2, kind: input, shape index: {}]   ;;  %s377_s3 = inlined_call_operand.vmem [shape: bf16[32,128], index: 3, kind: input, shape index: {}]   ;;  %s378_s4 = inlined_call_operand.vmem [shape: bf16[32,128], index: 4, kind: output, shape index: {}]  }
   0x1   :  { %v294_v0 = vld [vmem:[%s374_s1 + $0x38] sm:$0xff]   ;;  %v295_v1 = vld [vmem:[%s374_s1 + $0x30] sm:$0xff]   ;;  %v296_v2 = vld [vmem:[%s374_s1 + $0x28] sm:$0xff]  }
   0x2   :  { %274 = vmatprep.subr.bf16.mxu0 %v294_v0  ;;  %v297_v3 = vld [vmem:[%s374_s1 + $0x20] sm:$0xff]   ;;  %v298_v5 = vld [vmem:[%s374_s1 + $0x18] sm:$0xff]   ;;  %v299_v6 = vld [vmem:[%s374_s1 + $0x10] sm:$0xff]  }
   0x3   :  { %275 = vmatpush3.bf16.msra.mxu0 %v294_v0  ;;  %v302_v4 = vld [vmem:[%s375_s0] sm:$0xff]   ;;  %v300_v7 = vld [vmem:[%s374_s1 + $0x8] sm:$0xff]  }
   0x4   :  { %276 = vmatprep.subr.bf16.mxu0 %v295_v1  ;;  %290 = vmatprep.mubr.bf16.mxu0 %v302_v4  ;;  %v301_v8 = vld [vmem:[%s374_s1] sm:$0xff]   ;;  %v303_v9 = vld [vmem:[%s375_s0 + $0x8] sm:$0xff]  }
   0x5   :  { %v235_v10 = vld [vmem:[%s376_s2] ss:$0 sm:$0xff]  ;;  %v262_v11 = vld [vmem:[%s377_s3 + $0x8] sm:$0xff]  }
   0x6   :  { %v245_v13 = vld [vmem:[%s377_s3] sm:$0xff]   ;;  %v250_v15 = vunpack.c.l.bf16 %v262_v11  ;;  %v251_v19 = vunpack.c.h.bf16 %v262_v11 }
   0x7   :  { %277 = vmatpush3.bf16.msra.mxu0 %v295_v1  ;;  %v246_v18 = vunpack.c.l.bf16 %v245_v13  ;;  %v247_v23 = vunpack.c.h.bf16 %v245_v13 }
   0x8   :  { %278 = vmatprep.subr.bf16.mxu0 %v296_v2 }
   0xb   :  { %279 = vmatpush3.bf16.msra.mxu0 %v296_v2 }
   0xc   :  { %280 = vmatprep.subr.bf16.mxu0 %v297_v3 }
   0xf   :  { %281 = vmatpush3.bf16.msra.mxu0 %v297_v3 }
  0x10   :  { %282 = vmatprep.subr.bf16.mxu0 %v298_v5 }
  0x13   :  { %283 = vmatpush3.bf16.msra.mxu0 %v298_v5 }
  0x14   :  { %284 = vmatprep.subr.bf16.mxu0 %v299_v6 }
  0x17   :  { %285 = vmatpush3.bf16.msra.mxu0 %v299_v6 }
  0x18   :  { %286 = vmatprep.subr.bf16.mxu0 %v300_v7 }
  0x1b   :  { %287 = vmatpush3.bf16.msra.mxu0 %v300_v7 }
  0x1c   :  { %288 = vmatprep.subr.bf16.mxu0 %v301_v8 }
  0x1f   :  { %289 = vmatpush3.bf16.msra.mxu0 %v301_v8 }
  0x22   :  { %291 = vmatmul.mubr.bf16.vlgmr.msra.gmra.mxu0 %v303_v9 }
  0xe2   :  { %v292_v12 = vpop.f32.mrf.mxu0 }
  0xe3   :  { %v183_v14 = vadd.f32 %v292_v12, %v235_v10 }
  0xe4   :  { %v144_v16 = vpop.f32.mrf.mxu0 }
  0xe5   :  { %v181_v17 = vadd.f32 %v235_v10, %v144_v16  ;;  %v195_v21 = vadd.f32 %v250_v15, %v183_v14 }
  0xe6   :  { %v293_v20 = vpop.f32.mrf.mxu0 }
  0xe7   :  { %v184_v22 = vadd.f32 %v293_v20, %v235_v10  ;;  %v193_v25 = vadd.f32 %v246_v18, %v181_v17  ;;  %v199_v28 = vmax.f32 %v195_v21, 0.0 }
  0xe8   :  { %v147_v24 = vpop.f32.mrf.mxu0 }
  0xe9   :  { %v196_v26 = vadd.f32 %v251_v19, %v184_v22  ;;  %v182_v27 = vadd.f32 %v235_v10, %v147_v24  ;;  %v197_v31 = vmax.f32 %v193_v25, 0.0 }
  0xeb   :  { %v200_v29 = vmax.f32 %v196_v26, 0.0  ;;  %v194_v30 = vadd.f32 %v247_v23, %v182_v27 }
  0xed   :  { %v260_v32 = vpack.c.bf16 %v200_v29, %v199_v28  ;;  %v198_v33 = vmax.f32 %v194_v30, 0.0 }
  0xef   :  { %263 = vst [vmem:[%s378_s4 + $0x8] sm:$0xff] %v260_v32   ;;  %v255_v34 = vpack.c.bf16 %v198_v33, %v197_v31 }
  0xf1   :  { %256 = vst [vmem:[%s378_s4] sm:$0xff] %v255_v34  }

// kernel: img_encoder_resnet_forward.195
= control target key start
LH: loop header
LB: loop body
LE: loop exit
PB: predicated region body
PF: predicated region fallthrough
CT: control target
= control target key end

     0   :  { %v435_v0 = vmov 0.0   ;;  %vm436_vm0 = vmmov 0   ;;  %s541_s1 = inlined_call_operand.vmem [shape: bf16[384,128], index: 1, kind: input, shape index: {}]   ;;  %s542_s0 = inlined_call_operand.vmem [shape: bf16[8,384], index: 0, kind: input, shape index: {}]   ;;  %s543_s2 = inlined_call_operand.vmem [shape: f32[1,128], index: 2, kind: input, shape index: {}]   ;;  %s544_s3 = inlined_call_operand.vmem [shape: bf16[8,128], index: 3, kind: output, shape index: {}]  }
   0x1   :  { %386 = vmatprep.subr.bf16.mxu1 %v435_v0  ;;  %v408_v1 = vld [vmem:[%s541_s1 + $0x78] sm:$0xff]   ;;  %402 = vmatprep.mubr.msk.bf16.mxu1 %vm436_vm0, %v435_v0  ;;  %v411_v4 = vld [vmem:[%s541_s1 + $0x70] sm:$0xff]   ;;  %v414_v7 = vld [vmem:[%s541_s1 + $0x68] sm:$0xff]  }
   0x2   :  { %v409_v2 = vld [vmem:[%s541_s1 + $0xb8] sm:$0xff]   ;;  %355 = vmatprep.subr.bf16.mxu0 %v408_v1  ;;  %v412_v5 = vld [vmem:[%s541_s1 + $0xb0] sm:$0xff]   ;;  %v415_v8 = vld [vmem:[%s541_s1 + $0xa8] sm:$0xff]  }
   0x3   :  { %v410_v3 = vld [vmem:[%s541_s1 + $0x38] sm:$0xff]   ;;  %387 = vmatpush3.bf16.msra.mxu1 %v409_v2  ;;  %v413_v6 = vld [vmem:[%s541_s1 + $0x30] sm:$0xff]   ;;  %v416_v9 = vld [vmem:[%s541_s1 + $0x28] sm:$0xff]  }
   0x4   :  { %356 = vmatpush3.bf16.msra.mxu0 %v410_v3  ;;  %388 = vmatprep.subr.bf16.mxu1 %v435_v0  ;;  %v417_v10 = vld [vmem:[%s541_s1 + $0x60] sm:$0xff]   ;;  %v420_v13 = vld [vmem:[%s541_s1 + $0x58] sm:$0xff]   ;;  %v423_v16 = vld [vmem:[%s541_s1 + $0x50] sm:$0xff]  }
   0x5   :  { %357 = vmatprep.subr.bf16.mxu0 %v411_v4  ;;  %v418_v11 = vld [vmem:[%s541_s1 + $0xa0] sm:$0xff]   ;;  %v421_v14 = vld [vmem:[%s541_s1 + $0x98] sm:$0xff]   ;;  %v424_v17 = vld [vmem:[%s541_s1 + $0x90] sm:$0xff]  }
   0x6   :  { %v419_v12 = vld [vmem:[%s541_s1 + $0x20] sm:$0xff]   ;;  %v422_v15 = vld [vmem:[%s541_s1 + $0x18] sm:$0xff]   ;;  %v425_v18 = vld [vmem:[%s541_s1 + $0x10] sm:$0xff]  }
   0x7   :  { %389 = vmatpush3.bf16.msra.mxu1 %v412_v5  ;;  %v426_v19 = vld [vmem:[%s541_s1 + $0x48] sm:$0xff]   ;;  %v21_v22 = vld [vmem:[%s542_s0] sm:$0xff] }
   0x8   :  { %358 = vmatpush3.bf16.msra.mxu0 %v413_v6  ;;  %390 = vmatprep.subr.bf16.mxu1 %v435_v0  ;;  %v427_v20 = vld [vmem:[%s541_s1 + $0x88] sm:$0xff]   ;;  %v429_v23 = vld [vmem:[%s541_s1 + $0x40] sm:$0xff]   ;;  %v328_v24 = vcombine.high %v21_v22, %v21_v22  ;;  %v327_v28 = vcombine.low %v21_v22, %v21_v22 }
   0x9   :  { %359 = vmatprep.subr.bf16.mxu0 %v414_v7  ;;  %v428_v21 = vld [vmem:[%s541_s1 + $0x8] sm:$0xff]   ;;  %v430_v25 = vld [vmem:[%s541_s1 + $0x80] sm:$0xff]  }
   0xa   :  { %258 = vmatprep.mubr.bf16.mxu0 %v328_v24  ;;  %v431_v26 = vld [vmem:[%s541_s1] sm:$0xff]   ;;  %v434_v27 = vld [vmem:[%s542_s0 + $0x8] ss:$0 sps:$4 sm:$0xff]  }
   0xb   :  { %391 = vmatpush3.bf16.msra.mxu1 %v415_v8  ;;  %v354_v35 = vld [vmem:[%s543_s2] ss:$0 sm:$0xff] }
   0xc   :  { %360 = vmatpush3.bf16.msra.mxu0 %v416_v9  ;;  %392 = vmatprep.subr.bf16.mxu1 %v435_v0 }
   0xd   :  { %361 = vmatprep.subr.bf16.mxu0 %v417_v10 }
   0xf   :  { %393 = vmatpush3.bf16.msra.mxu1 %v418_v11 }
  0x10   :  { %362 = vmatpush3.bf16.msra.mxu0 %v419_v12  ;;  %394 = vmatprep.subr.bf16.mxu1 %v435_v0 }
  0x11   :  { %363 = vmatprep.subr.bf16.mxu0 %v420_v13 }
  0x13   :  { %395 = vmatpush3.bf16.msra.mxu1 %v421_v14 }
  0x14   :  { %364 = vmatpush3.bf16.msra.mxu0 %v422_v15  ;;  %396 = vmatprep.subr.bf16.mxu1 %v435_v0 }
  0x15   :  { %365 = vmatprep.subr.bf16.mxu0 %v423_v16 }
  0x17   :  { %397 = vmatpush3.bf16.msra.mxu1 %v424_v17 }
  0x18   :  { %366 = vmatpush3.bf16.msra.mxu0 %v425_v18  ;;  %398 = vmatprep.subr.bf16.mxu1 %v435_v0 }
  0x19   :  { %367 = vmatprep.subr.bf16.mxu0 %v426_v19 }
  0x1b   :  { %399 = vmatpush3.bf16.msra.mxu1 %v427_v20 }
  0x1c   :  { %368 = vmatpush3.bf16.msra.mxu0 %v428_v21  ;;  %400 = vmatprep.subr.bf16.mxu1 %v435_v0 }
  0x1d   :  { %369 = vmatprep.subr.bf16.mxu0 %v429_v23 }
  0x1f   :  { %401 = vmatpush3.bf16.msra.mxu1 %v430_v25 }
  0x20   :  { %370 = vmatpush3.bf16.msra.mxu0 %v431_v26 }
  0x22   :  { %403 = vmatmul.mubr.bf16.vlgmr.msra.gmra.mxu1 %v434_v27 }
  0x23   :  { %259 = vmatmul.mubr.bf16.vlgmr.msra.gmra.mxu0 %v327_v28 }
  0xe2   :  { %v300_v29 = vpop.f32.mrf.mxu1 }
  0xe3   :  { %v371_v30 = vpop.f32.mrf.mxu0 }
  0xe4   :  { %v404_v31 = vpop.f32.mrf.mxu1 }
  0xe5   :  { %v372_v32 = vpop.f32.mrf.mxu0 }
  0xe6   :  { %v373_v33 = vadd.f32 %v372_v32, %v371_v30  ;;  %v303_v34 = vpop.f32.mrf.mxu1 }
  0xe7   :  { %v374_v36 = vpop.f32.mrf.mxu0 }
  0xe8   :  { %v301_v37 = vadd.f32 %v373_v33, %v300_v29  ;;  %v405_v38 = vpop.f32.mrf.mxu1 }
  0xe9   :  { %v375_v39 = vpop.f32.mrf.mxu0 }
  0xea   :  { %v319_v40 = vadd.f32 %v354_v35, %v301_v37 }
  0xec   :  { %v320_v41 = vmax.f32 %v319_v40, 0.0 }
  0xee   :  { %v321_v42 = vpack.c.bf16 %v320_v41, %v320_v41 }
  0xf0   :  { %322 = vst [vmem:[%s544_s3] sm:$0xf] %v321_v42 }

// kernel: img_encoder_resnet_forward.193
= control target key start
LH: loop header
LB: loop body
LE: loop exit
PB: predicated region body
PF: predicated region fallthrough
CT: control target
= control target key end

     0   :  { %v194_v0 = vmov 0.0   ;;  %vm195_vm0 = vmmov 0   ;;  %s249_s1 = inlined_call_operand.vmem [shape: bf16[128,128], index: 1, kind: input, shape index: {}]   ;;  %s250_s0 = inlined_call_operand.vmem [shape: bf16[8,128], index: 0, kind: input, shape index: {}]   ;;  %s251_s2 = inlined_call_operand.vmem [shape: f32[1,128], index: 2, kind: input, shape index: {}]   ;;  %s252_s3 = inlined_call_operand.vmem [shape: bf16[8,128], index: 3, kind: output, shape index: {}]  }
   0x1   :  { %164 = vmatprep.subr.bf16.mxu0 %v194_v0  ;;  %v186_v1 = vld [vmem:[%s249_s1 + $0x38] sm:$0xff]   ;;  %180 = vmatprep.mubr.msk.bf16.mxu0 %vm195_vm0, %v194_v0  ;;  %v187_v2 = vld [vmem:[%s249_s1 + $0x30] sm:$0xff]   ;;  %v188_v3 = vld [vmem:[%s249_s1 + $0x28] sm:$0xff]  }
   0x2   :  { %165 = vmatpush3.bf16.msra.mxu0 %v186_v1  ;;  %v189_v4 = vld [vmem:[%s249_s1 + $0x20] sm:$0xff]   ;;  %v190_v5 = vld [vmem:[%s249_s1 + $0x18] sm:$0xff]   ;;  %v191_v6 = vld [vmem:[%s249_s1 + $0x10] sm:$0xff]  }
   0x3   :  { %166 = vmatprep.subr.bf16.mxu0 %v194_v0  ;;  %v192_v7 = vld [vmem:[%s249_s1 + $0x8] sm:$0xff]   ;;  %v193_v8 = vld [vmem:[%s249_s1] sm:$0xff]  }
   0x4   :  { %v21_v9 = vld [vmem:[%s250_s0] sm:$0xf] }
   0x5   :  { %v154_v10 = vld [vmem:[%s251_s2] ss:$0 sm:$0xff] }
   0x6   :  { %167 = vmatpush3.bf16.msra.mxu0 %v187_v2 }
   0x7   :  { %168 = vmatprep.subr.bf16.mxu0 %v194_v0 }
   0xa   :  { %169 = vmatpush3.bf16.msra.mxu0 %v188_v3 }
   0xb   :  { %170 = vmatprep.subr.bf16.mxu0 %v194_v0 }
   0xe   :  { %171 = vmatpush3.bf16.msra.mxu0 %v189_v4 }
   0xf   :  { %172 = vmatprep.subr.bf16.mxu0 %v194_v0 }
  0x12   :  { %173 = vmatpush3.bf16.msra.mxu0 %v190_v5 }
  0x13   :  { %174 = vmatprep.subr.bf16.mxu0 %v194_v0 }
  0x16   :  { %175 = vmatpush3.bf16.msra.mxu0 %v191_v6 }
  0x17   :  { %176 = vmatprep.subr.bf16.mxu0 %v194_v0 }
  0x1a   :  { %177 = vmatpush3.bf16.msra.mxu0 %v192_v7 }
  0x1b   :  { %178 = vmatprep.subr.bf16.mxu0 %v194_v0 }
  0x1e   :  { %179 = vmatpush3.bf16.msra.mxu0 %v193_v8 }
  0x21   :  { %181 = vmatmul.mubr.bf16.vlgmr.msra.gmra.mxu0 %v21_v9 }
  0xe1   :  { %v120_v11 = vpop.f32.mrf.mxu0 }
  0xe2   :  { %v139_v12 = vadd.f32 %v154_v10, %v120_v11 }
  0xe3   :  { %v182_v13 = vpop.f32.mrf.mxu0 }
  0xe4   :  { %v140_v14 = vpack.c.bf16 %v139_v12, %v139_v12 }
  0xe5   :  { %v123_v15 = vpop.f32.mrf.mxu0 }
  0xe6   :  { %141 = vst [vmem:[%s252_s3] sm:$0xf] %v140_v14 }
  0xe7   :  { %v183_v16 = vpop.f32.mrf.mxu0 }

// kernel: img_encoder_resnet_forward.196
= control target key start
LH: loop header
LB: loop body
LE: loop exit
PB: predicated region body
PF: predicated region fallthrough
CT: control target
= control target key end

     0   :  { %v201_v0 = vmov 0.0   ;;  %vm202_vm0 = vmmov 0   ;;  %s264_s1 = inlined_call_operand.vmem [shape: bf16[128,128], index: 1, kind: input, shape index: {}]   ;;  %s265_s0 = inlined_call_operand.vmem [shape: bf16[8,128], index: 0, kind: input, shape index: {}]   ;;  %s266_s3 = inlined_call_operand.vmem [shape: bf16[8,128], index: 3, kind: input, shape index: {}]   ;;  %s267_s2 = inlined_call_operand.vmem [shape: f32[1,128], index: 2, kind: input, shape index: {}]   ;;  %s268_s4 = inlined_call_operand.vmem [shape: bf16[8,128], index: 4, kind: output, shape index: {}]  }
   0x1   :  { %171 = vmatprep.subr.bf16.mxu0 %v201_v0  ;;  %v193_v1 = vld [vmem:[%s264_s1 + $0x38] sm:$0xff]   ;;  %187 = vmatprep.mubr.msk.bf16.mxu0 %vm202_vm0, %v201_v0  ;;  %v194_v2 = vld [vmem:[%s264_s1 + $0x30] sm:$0xff]   ;;  %v195_v3 = vld [vmem:[%s264_s1 + $0x28] sm:$0xff]  }
   0x2   :  { %172 = vmatpush3.bf16.msra.mxu0 %v193_v1  ;;  %v196_v4 = vld [vmem:[%s264_s1 + $0x20] sm:$0xff]   ;;  %v197_v5 = vld [vmem:[%s264_s1 + $0x18] sm:$0xff]   ;;  %v198_v6 = vld [vmem:[%s264_s1 + $0x10] sm:$0xff]  }
   0x3   :  { %173 = vmatprep.subr.bf16.mxu0 %v201_v0  ;;  %v199_v7 = vld [vmem:[%s264_s1 + $0x8] sm:$0xff]   ;;  %v200_v8 = vld [vmem:[%s264_s1] sm:$0xff]  }
   0x4   :  { %v24_v9 = vld [vmem:[%s265_s0] sm:$0xf] }
   0x5   :  { %v143_v10 = vld [vmem:[%s266_s3] sm:$0xf] }
   0x6   :  { %174 = vmatpush3.bf16.msra.mxu0 %v194_v2  ;;  %v161_v11 = vld [vmem:[%s267_s2] ss:$0 sm:$0xff]  ;;  %v144_v12 = vunpack.c.l.bf16 %v143_v10 }
   0x7   :  { %175 = vmatprep.subr.bf16.mxu0 %v201_v0 }
   0xa   :  { %176 = vmatpush3.bf16.msra.mxu0 %v195_v3 }
   0xb   :  { %177 = vmatprep.subr.bf16.mxu0 %v201_v0 }
   0xe   :  { %178 = vmatpush3.bf16.msra.mxu0 %v196_v4 }
   0xf   :  { %179 = vmatprep.subr.bf16.mxu0 %v201_v0 }
  0x12   :  { %180 = vmatpush3.bf16.msra.mxu0 %v197_v5 }
  0x13   :  { %181 = vmatprep.subr.bf16.mxu0 %v201_v0 }
  0x16   :  { %182 = vmatpush3.bf16.msra.mxu0 %v198_v6 }
  0x17   :  { %183 = vmatprep.subr.bf16.mxu0 %v201_v0 }
  0x1a   :  { %184 = vmatpush3.bf16.msra.mxu0 %v199_v7 }
  0x1b   :  { %185 = vmatprep.subr.bf16.mxu0 %v201_v0 }
  0x1e   :  { %186 = vmatpush3.bf16.msra.mxu0 %v200_v8 }
  0x21   :  { %188 = vmatmul.mubr.bf16.vlgmr.msra.gmra.mxu0 %v24_v9 }
  0xe1   :  { %v123_v13 = vpop.f32.mrf.mxu0 }
  0xe2   :  { %v142_v14 = vadd.f32 %v161_v11, %v123_v13 }
  0xe3   :  { %v189_v15 = vpop.f32.mrf.mxu0 }
  0xe4   :  { %v145_v16 = vadd.f32 %v144_v12, %v142_v14 }
  0xe5   :  { %v126_v17 = vpop.f32.mrf.mxu0 }
  0xe6   :  { %v146_v18 = vmax.f32 %v145_v16, 0.0 }
  0xe7   :  { %v190_v19 = vpop.f32.mrf.mxu0 }
  0xe8   :  { %v147_v20 = vpack.c.bf16 %v146_v18, %v146_v18 }
  0xea   :  { %148 = vst [vmem:[%s268_s4] sm:$0xf] %v147_v20 }

// kernel: img_encoder_resnet_forward.197
= control target key start
LH: loop header
LB: loop body
LE: loop exit
PB: predicated region body
PF: predicated region fallthrough
CT: control target
= control target key end

     0   :  { %v195_v0 = vmov 0.0   ;;  %vm196_vm0 = vmmov 0   ;;  %s250_s1 = inlined_call_operand.vmem [shape: bf16[128,128], index: 1, kind: input, shape index: {}]   ;;  %s251_s0 = inlined_call_operand.vmem [shape: bf16[8,128], index: 0, kind: input, shape index: {}]   ;;  %s252_s2 = inlined_call_operand.vmem [shape: f32[1,128], index: 2, kind: input, shape index: {}]   ;;  %s253_s3 = inlined_call_operand.vmem [shape: bf16[8,128], index: 3, kind: output, shape index: {}]  }
   0x1   :  { %165 = vmatprep.subr.bf16.mxu0 %v195_v0  ;;  %v187_v1 = vld [vmem:[%s250_s1 + $0x38] sm:$0xff]   ;;  %181 = vmatprep.mubr.msk.bf16.mxu0 %vm196_vm0, %v195_v0  ;;  %v188_v2 = vld [vmem:[%s250_s1 + $0x30] sm:$0xff]   ;;  %v189_v3 = vld [vmem:[%s250_s1 + $0x28] sm:$0xff]  }
   0x2   :  { %166 = vmatpush3.bf16.msra.mxu0 %v187_v1  ;;  %v190_v4 = vld [vmem:[%s250_s1 + $0x20] sm:$0xff]   ;;  %v191_v5 = vld [vmem:[%s250_s1 + $0x18] sm:$0xff]   ;;  %v192_v6 = vld [vmem:[%s250_s1 + $0x10] sm:$0xff]  }
   0x3   :  { %167 = vmatprep.subr.bf16.mxu0 %v195_v0  ;;  %v193_v7 = vld [vmem:[%s250_s1 + $0x8] sm:$0xff]   ;;  %v194_v8 = vld [vmem:[%s250_s1] sm:$0xff]  }
   0x4   :  { %v21_v9 = vld [vmem:[%s251_s0] sm:$0xf] }
   0x5   :  { %v155_v10 = vld [vmem:[%s252_s2] ss:$0 sm:$0xff] }
   0x6   :  { %168 = vmatpush3.bf16.msra.mxu0 %v188_v2 }
   0x7   :  { %169 = vmatprep.subr.bf16.mxu0 %v195_v0 }
   0xa   :  { %170 = vmatpush3.bf16.msra.mxu0 %v189_v3 }
   0xb   :  { %171 = vmatprep.subr.bf16.mxu0 %v195_v0 }
   0xe   :  { %172 = vmatpush3.bf16.msra.mxu0 %v190_v4 }
   0xf   :  { %173 = vmatprep.subr.bf16.mxu0 %v195_v0 }
  0x12   :  { %174 = vmatpush3.bf16.msra.mxu0 %v191_v5 }
  0x13   :  { %175 = vmatprep.subr.bf16.mxu0 %v195_v0 }
  0x16   :  { %176 = vmatpush3.bf16.msra.mxu0 %v192_v6 }
  0x17   :  { %177 = vmatprep.subr.bf16.mxu0 %v195_v0 }
  0x1a   :  { %178 = vmatpush3.bf16.msra.mxu0 %v193_v7 }
  0x1b   :  { %179 = vmatprep.subr.bf16.mxu0 %v195_v0 }
  0x1e   :  { %180 = vmatpush3.bf16.msra.mxu0 %v194_v8 }
  0x21   :  { %182 = vmatmul.mubr.bf16.vlgmr.msra.gmra.mxu0 %v21_v9 }
  0xe1   :  { %v120_v11 = vpop.f32.mrf.mxu0 }
  0xe2   :  { %v139_v12 = vadd.f32 %v155_v10, %v120_v11 }
  0xe3   :  { %v183_v13 = vpop.f32.mrf.mxu0 }
  0xe4   :  { %v140_v14 = vmax.f32 %v139_v12, 0.0 }
  0xe5   :  { %v123_v15 = vpop.f32.mrf.mxu0 }
  0xe6   :  { %v141_v16 = vpack.c.bf16 %v140_v14, %v140_v14 }
  0xe7   :  { %v184_v17 = vpop.f32.mrf.mxu0 }
  0xe8   :  { %142 = vst [vmem:[%s253_s3] sm:$0xf] %v141_v16 }

// kernel: img_encoder_resnet_forward.304
= control target key start
LH: loop header
LB: loop body
LE: loop exit
PB: predicated region body
PF: predicated region fallthrough
CT: control target
= control target key end

     0   :  { %s622_s12 = smov 0   ;;  %s624_s13 = smov 0   ;;  %s671_s0 = inlined_call_operand.vmem [shape: bf16[8,640], index: 0, kind: input, shape index: {}]   ;;  %s672_s1 = inlined_call_operand.vmem [shape: bf16[640,128], index: 1, kind: input, shape index: {}]   ;;  %s673_s2 = inlined_call_operand.vmem [shape: f32[1,128], index: 2, kind: input, shape index: {}]   ;;  %s674_s3 = inlined_call_operand.vmem [shape: bf16[8,128], index: 3, kind: output, shape index: {}]  }
   0x1   :  { %s626_s14 = smov 0  }
   0x2 LB: > { %s25_s15 = sadd.s32 1, %s593_s13  ;;  %p493_p0 = scmp.ge.s32.totalorder %s597_s14, 1  ;;  %s597_s14 = sphi %s626_s14, %s13_s14   ;;  %s593_s13 = sphi %s624_s13, %s676_s13   ;;  %s589_s12 = sphi %s622_s12, %s675_s12  }
   0x3   : > { %p26_p1 = scmp.ge.s32.totalorder %s25_s15, 5  ;;  %p187_p2 = scmp.lt.s32.totalorder %s597_s14, 6 }
   0x5   : > { %s678_s15 = smov (%p26_p1, %s25_s15), 0  ;;  %p188_p3 = pnand %p493_p0, %p187_p2 }
   0x6   : > { %p229_p4 = scmp.lt.s32.totalorder (!%p188_p3), %s589_s12, 4  ;;  %s495_s16 = sshll.u32 (!%p188_p3), %s589_s12, 4 }
   0x7   : > { %191 = sbr.rel (%p188_p3) target bundleno = 263 (0x107), region = 32  ;;  %p236_p5 = scmp.lt.s32.totalorder (!%p188_p3), %s495_s16, 79 }
   0x8   : > { %p497_p6 = scmp.ne.s32.totalorder (!%p188_p3), %s589_s12, 0 }
   0xc   : > { %s230_s17 = scalar_select %p229_p4, %s589_s12, 4 }
   0xd   : > { %s680_s16 = smov (!%p236_p5, %s495_s16), 79  ;;  %258 = sbr.rel (%p497_p6) target bundleno = 20 (0x14), region = 36 }
   0xe   : > { %s494_s18 = sshll.u32 %s230_s17, 2  ;;  %s496_s22 = sshll.u32 %s680_s16, 2 }
   0xf   : > { %s648_s21 = scalar_lea.vmem %s671_s0, %s494_s18  ;;  %s242_s25 = scalar_lea.vmem %s672_s1, %s496_s22 }
  0x12   : > { %v599_v0 = vmov 0.0  }
  0x13   : > { %259 = vst [vmem:[#allocation2] sm:$0xff] %v599_v0 }
  0x14 PF: > { %v567_v1 = vld [vmem:[%s242_s25 + $0x38] sm:$0xff]   ;;  %v600_v2 = vmov 0.0   ;;  %v568_v3 = vld [vmem:[%s242_s25 + $0x30] sm:$0xff]   ;;  %vm601_vm0 = vmmov 0   ;;  %v569_v4 = vld [vmem:[%s242_s25 + $0x28] sm:$0xff]   ;;  %p506_p7 = scmp.ne.s32.totalorder %s589_s12, 4 }
  0x15   : > { %520 = vmatprep.subr.bf16.mxu0 %v600_v2  ;;  %536 = vmatprep.mubr.msk.bf16.mxu0 %vm601_vm0, %v600_v2  ;;  %v570_v5 = vld [vmem:[%s242_s25 + $0x20] sm:$0xff]   ;;  %v571_v6 = vld [vmem:[%s242_s25 + $0x18] sm:$0xff]   ;;  %v572_v7 = vld [vmem:[%s242_s25 + $0x10] sm:$0xff]  }
  0x16   : > { %521 = vmatpush3.bf16.msra.mxu0 %v567_v1  ;;  %v573_v8 = vld [vmem:[%s242_s25 + $0x8] sm:$0xff]   ;;  %v574_v9 = vld [vmem:[%s242_s25] sm:$0xff]  }
  0x17   : > { %522 = vmatprep.subr.bf16.mxu0 %v600_v2  ;;  %v261_v10 = vld [vmem:[%s648_s21] sm:$0xf] }
  0x1a   : > { %523 = vmatpush3.bf16.msra.mxu0 %v568_v3  ;;  %v260_v11 = vld [vmem:[#allocation2] sm:$0xff] }
  0x1b   : > { %524 = vmatprep.subr.bf16.mxu0 %v600_v2 }
  0x1e   : > { %525 = vmatpush3.bf16.msra.mxu0 %v569_v4 }
  0x1f   : > { %526 = vmatprep.subr.bf16.mxu0 %v600_v2 }
  0x22   : > { %527 = vmatpush3.bf16.msra.mxu0 %v570_v5 }
  0x23   : > { %528 = vmatprep.subr.bf16.mxu0 %v600_v2 }
  0x26   : > { %529 = vmatpush3.bf16.msra.mxu0 %v571_v6 }
  0x27   : > { %530 = vmatprep.subr.bf16.mxu0 %v600_v2 }
  0x2a   : > { %531 = vmatpush3.bf16.msra.mxu0 %v572_v7 }
  0x2b   : > { %532 = vmatprep.subr.bf16.mxu0 %v600_v2 }
  0x2e   : > { %533 = vmatpush3.bf16.msra.mxu0 %v573_v8 }
  0x2f   : > { %534 = vmatprep.subr.bf16.mxu0 %v600_v2 }
  0x32   : > { %535 = vmatpush3.bf16.msra.mxu0 %v574_v9 }
  0x35   : > { %537 = vmatmul.mubr.bf16.vlgmr.msra.gmra.mxu0 %v261_v10 }
  0xf5   : > { %v360_v12 = vpop.f32.mrf.mxu0 }
  0xf6   : > { %v366_v13 = vadd.f32 %v360_v12, %v260_v11 }
  0xf7   : > { %v538_v14 = vpop.f32.mrf.mxu0  ;;  %371 = sbr.rel (%p506_p7) target bundleno = 263 (0x107), region = 40 }
  0xf8   : > { %367 = vst [vmem:[#allocation2] sm:$0xff] %v366_v13 }
  0xf9   : > { %v363_v15 = vpop.f32.mrf.mxu0 }
  0xfb   : > { %v539_v16 = vpop.f32.mrf.mxu0 }
  0xfc   : > { %v507_v18 = vld [vmem:[%s673_s2] ss:$0 sm:$0xff] }
  0xff   : > { %v372_v17 = vld [vmem:[#allocation2] sm:$0xff] }
 0x100   : > { %v380_v19 = vadd.f32 %v507_v18, %v372_v17 }
 0x102   : > { %v381_v20 = vmax.f32 %v380_v19, 0.0 }
 0x104   : > { %v382_v21 = vpack.c.bf16 %v381_v20, %v381_v20 }
 0x106   : > { %383 = vst [vmem:[%s674_s3] sm:$0xf] %v382_v21 }
 0x107 PF: > { %s13_s14 = sadd.s32 1, %s597_s14   ;;  %s675_s12 = smov %s593_s13 }
 0x108   : > { %p10_p8 = scmp.ge.s32.totalorder %s13_s14, 7   ;;  %s676_s13 = smov %s678_s15 }
 0x10a   :  { %12 = sbr.rel (!%p10_p8) target bundleno = 2 (0x2), region = 76 }

// kernel: img_encoder_resnet_forward.305
= control target key start
LH: loop header
LB: loop body
LE: loop exit
PB: predicated region body
PF: predicated region fallthrough
CT: control target
= control target key end

     0   :  { %s841_s15 = smov 0   ;;  %s843_s16 = smov 0   ;;  %s934_s0 = inlined_call_operand.vmem [shape: bf16[8,128], index: 0, kind: input, shape index: {}]   ;;  %s935_s1 = inlined_call_operand.vmem [shape: bf16[128,256], index: 1, kind: input, shape index: {}]   ;;  %s936_s2 = inlined_call_operand.vmem [shape: f32[1,256], index: 2, kind: input, shape index: {}]   ;;  %s937_s3 = inlined_call_operand.vmem [shape: bf16[8,256], index: 3, kind: input, shape index: {}]   ;;  %s938_s4 = inlined_call_operand.vmem [shape: bf16[8,256], index: 4, kind: output, shape index: {}]  }
   0x1   :  { %s845_s17 = smov 0   ;;  %s847_s18 = smov 0  }
   0x2   :  { %s849_s19 = smov 0  }
   0x3 LB: > { %s29_s20 = sadd.s32 1, %s808_s18  ;;  %p77_p1 = scmp.ne.s32.totalorder %s800_s16, %s796_s15  ;;  %s812_s19 = sphi %s849_s19, %s14_s19   ;;  %s808_s18 = sphi %s847_s18, %s942_s18   ;;  %s804_s17 = sphi %s845_s17, %s941_s17   ;;  %s800_s16 = sphi %s843_s16, %s940_s16   ;;  %s796_s15 = sphi %s841_s15, %s939_s15  }
   0x4   : > { %p31_p0 = scmp.ge.s32.totalorder %s29_s20, 2  ;;  %p78_p2 = scmp.eq.s32.totalorder %s812_s19, 0 }
   0x5   : > { %s70_s22 = sadd.s32 1, %s800_s16  ;;  %p677_p5 = scmp.ge.s32.totalorder %s812_s19, 2 }
   0x6   : > { %s944_s20 = smov (%p31_p0, %s29_s20), 0  ;;  %p79_p3 = por %p78_p2, %p77_p1 }
   0x7   : > { %s66_s21 = ssub.s32 %s808_s18, %s944_s20  ;;  %195 = sbr.rel (%p677_p5) target bundleno = 26 (0x1a), region = 20 }
   0x8   : > { %p68_p4 = scmp.eq.s32.totalorder %s66_s21, 0 }
   0xa   : > { %s876_s23 = scalar_select %p68_p4, %s800_s16, %s70_s22  }
   0xc   : > { %198 = sbr.rel (!%p79_p3) target bundleno = 26 (0x1a), region = 24  ;;  %s200_s24 = sand.u32 (%p79_p3), 1, %s800_s16  }
   0xd   : > { %s679_s25 = sshll.u32 (%p79_p3), %s808_s18, 2  ;;  %s678_s26 = sshll.u32 (%p79_p3), %s200_s24, 6 }
   0xe   : > { %s884_s29 = scalar_lea.vmem (%p79_p3), %s935_s1, %s679_s25  ;;  %s202_s30 = scalar_lea.vmem (%p79_p3), [#allocation3], %s678_s26 }
   0xf   : > { %v224_v0 = vld [vmem:[%s884_s29] sm:$0xf] (%p79_p3)  ;;  %v226_v1 = vld [vmem:[%s884_s29 + $0x8] sm:$0xf] (%p79_p3)  ;;  %v228_v2 = vld [vmem:[%s884_s29 + $0x10] sm:$0xf] (%p79_p3) }
  0x10   : > { %225 = vst [vmem:[%s202_s30] sm:$0xf] (%p79_p3), %v224_v0  ;;  %227 = vst [vmem:[%s202_s30 + $0x4] sm:$0xf] (%p79_p3), %v226_v1  ;;  %v230_v3 = vld [vmem:[%s884_s29 + $0x18] sm:$0xf] (%p79_p3) }
  0x11   : > { %v232_v4 = vld [vmem:[%s884_s29 + $0x20] sm:$0xf]  ;;  %229 = vst [vmem:[%s202_s30 + $0x8] sm:$0xf] %v228_v2  ;;  %231 = vst [vmem:[%s202_s30 + $0xc] sm:$0xf] %v230_v3 }
  0x12   : > { %233 = vst [vmem:[%s202_s30 + $0x10] sm:$0xf] %v232_v4  ;;  %v234_v5 = vld [vmem:[%s884_s29 + $0x28] sm:$0xf]  ;;  %v236_v6 = vld [vmem:[%s884_s29 + $0x30] sm:$0xf] }
  0x13   : > { %v238_v7 = vld [vmem:[%s884_s29 + $0x38] sm:$0xf]  ;;  %235 = vst [vmem:[%s202_s30 + $0x14] sm:$0xf] %v234_v5  ;;  %237 = vst [vmem:[%s202_s30 + $0x18] sm:$0xf] %v236_v6 }
  0x14   : > { %239 = vst [vmem:[%s202_s30 + $0x1c] sm:$0xf] %v238_v7  ;;  %v240_v8 = vld [vmem:[%s884_s29 + $0x40] sm:$0xf]  ;;  %v242_v9 = vld [vmem:[%s884_s29 + $0x48] sm:$0xf] }
  0x15   : > { %v244_v10 = vld [vmem:[%s884_s29 + $0x50] sm:$0xf]  ;;  %241 = vst [vmem:[%s202_s30 + $0x20] sm:$0xf] %v240_v8  ;;  %243 = vst [vmem:[%s202_s30 + $0x24] sm:$0xf] %v242_v9 }
  0x16   : > { %245 = vst [vmem:[%s202_s30 + $0x28] sm:$0xf] %v244_v10  ;;  %v246_v11 = vld [vmem:[%s884_s29 + $0x58] sm:$0xf]  ;;  %v248_v12 = vld [vmem:[%s884_s29 + $0x60] sm:$0xf] }
  0x17   : > { %v250_v13 = vld [vmem:[%s884_s29 + $0x68] sm:$0xf]  ;;  %247 = vst [vmem:[%s202_s30 + $0x2c] sm:$0xf] %v246_v11  ;;  %249 = vst [vmem:[%s202_s30 + $0x30] sm:$0xf] %v248_v12 }
  0x18   : > { %251 = vst [vmem:[%s202_s30 + $0x34] sm:$0xf] %v250_v13  ;;  %v252_v14 = vld [vmem:[%s884_s29 + $0x70] sm:$0xf]  ;;  %v254_v15 = vld [vmem:[%s884_s29 + $0x78] sm:$0xf] }
  0x19   : > { %253 = vst [vmem:[%s202_s30 + $0x38] sm:$0xf] %v252_v14  ;;  %255 = vst [vmem:[%s202_s30 + $0x3c] sm:$0xf] %v254_v15 }
  0x1a PF: > { %p680_p6 = scmp.ge.s32.totalorder %s812_s19, 1  ;;  %p327_p7 = scmp.lt.s32.totalorder %s812_s19, 3 }
  0x1c   : > { %p328_p8 = pnand %p680_p6, %p327_p7 }
  0x1d   : > { %s334_s5 = sand.u32 (!%p328_p8), 1, %s796_s15   ;;  %p388_p9 = scmp.lt.s32.totalorder (!%p328_p8), %s804_s17, 1 }
  0x1e   : > { %331 = sbr.rel (%p328_p8) target bundleno = 270 (0x10e), region = 73  ;;  %s681_s6 = sshll.u32 (!%p328_p8), %s334_s5, 6 }
  0x1f   : > { %s336_s7 = scalar_lea.vmem (!%p328_p8), [#allocation3], %s681_s6 }
  0x23   : > { %v814_v16 = vmov 0.0   ;;  %vm815_vm0 = vmmov 0   ;;  %v766_v17 = vld [vmem:[%s336_s7 + $0x38] sm:$0xff]   ;;  %v767_v18 = vld [vmem:[%s336_s7 + $0x30] sm:$0xff]   ;;  %v768_v19 = vld [vmem:[%s336_s7 + $0x28] sm:$0xff]   ;;  %s946_s17 = smov (!%p388_p9, %s804_s17), 1 }
  0x24   : > { %704 = vmatprep.subr.bf16.mxu0 %v814_v16  ;;  %720 = vmatprep.mubr.msk.bf16.mxu0 %vm815_vm0, %v814_v16  ;;  %v769_v20 = vld [vmem:[%s336_s7 + $0x20] sm:$0xff]   ;;  %v770_v21 = vld [vmem:[%s336_s7 + $0x18] sm:$0xff]   ;;  %v771_v22 = vld [vmem:[%s336_s7 + $0x10] sm:$0xff]   ;;  %s682_s10 = sshll.u32 %s946_s17, 2  ;;  %s390_s21 = scalar_lea.vmem %s936_s2, %s946_s17 }
  0x25   : > { %705 = vmatpush3.bf16.msra.mxu0 %v766_v17  ;;  %v772_v23 = vld [vmem:[%s336_s7 + $0x8] sm:$0xff]   ;;  %v773_v24 = vld [vmem:[%s336_s7] sm:$0xff]   ;;  %s398_s13 = scalar_lea.vmem %s937_s3, %s682_s10  ;;  %s406_s25 = scalar_lea.vmem %s938_s4, %s682_s10 }
  0x26   : > { %706 = vmatprep.subr.bf16.mxu0 %v814_v16  ;;  %v414_v25 = vld [vmem:[%s934_s0] sm:$0xf] }
  0x27   : > { %v533_v26 = vld [vmem:[%s398_s13] sm:$0xf] }
  0x28   : > { %v692_v27 = vld [vmem:[%s390_s21] ss:$0 sm:$0xff]  ;;  %v534_v28 = vunpack.c.l.bf16 %v533_v26 }
  0x29   : > { %707 = vmatpush3.bf16.msra.mxu0 %v767_v18 }
  0x2a   : > { %708 = vmatprep.subr.bf16.mxu0 %v814_v16 }
  0x2d   : > { %709 = vmatpush3.bf16.msra.mxu0 %v768_v19 }
  0x2e   : > { %710 = vmatprep.subr.bf16.mxu0 %v814_v16 }
  0x31   : > { %711 = vmatpush3.bf16.msra.mxu0 %v769_v20 }
  0x32   : > { %712 = vmatprep.subr.bf16.mxu0 %v814_v16 }
  0x35   : > { %713 = vmatpush3.bf16.msra.mxu0 %v770_v21 }
  0x36   : > { %714 = vmatprep.subr.bf16.mxu0 %v814_v16 }
  0x39   : > { %715 = vmatpush3.bf16.msra.mxu0 %v771_v22 }
  0x3a   : > { %716 = vmatprep.subr.bf16.mxu0 %v814_v16 }
  0x3d   : > { %717 = vmatpush3.bf16.msra.mxu0 %v772_v23 }
  0x3e   : > { %718 = vmatprep.subr.bf16.mxu0 %v814_v16 }
  0x41   : > { %719 = vmatpush3.bf16.msra.mxu0 %v773_v24 }
  0x44   : > { %721 = vmatmul.mubr.bf16.vlgmr.msra.gmra.mxu0 %v414_v25 }
 0x104   : > { %v513_v29 = vpop.f32.mrf.mxu0 }
 0x105   : > { %v532_v30 = vadd.f32 %v692_v27, %v513_v29 }
 0x106   : > { %v722_v31 = vpop.f32.mrf.mxu0 }
 0x107   : > { %v535_v32 = vadd.f32 %v534_v28, %v532_v30 }
 0x108   : > { %v516_v33 = vpop.f32.mrf.mxu0 }
 0x109   : > { %v536_v34 = vmax.f32 %v535_v32, 0.0 }
 0x10a   : > { %v723_v35 = vpop.f32.mrf.mxu0 }
 0x10b   : > { %v537_v36 = vpack.c.bf16 %v536_v34, %v536_v34 }
 0x10d   : > { %538 = vst [vmem:[%s406_s25] sm:$0xf] %v537_v36 }
 0x10e PF: > { %s14_s19 = sadd.s32 1, %s812_s19   ;;  %s939_s15 = smov %s800_s16 }
 0x10f   : > { %p11_p10 = scmp.ge.s32.totalorder %s14_s19, 4   ;;  %s940_s16 = smov %s876_s23 }
 0x110   : > { %s941_s17 = smov %s808_s18  ;;  %s942_s18 = smov %s944_s20 }
 0x111   :  { %13 = sbr.rel (!%p11_p10) target bundleno = 3 (0x3), region = 129 }

// kernel: img_encoder_resnet_forward.302
= control target key start
LH: loop header
LB: loop body
LE: loop exit
PB: predicated region body
PF: predicated region fallthrough
CT: control target
= control target key end

     0   :  { %s755_s12 = smov 0   ;;  %s757_s13 = smov 0   ;;  %s845_s0 = inlined_call_operand.vmem [shape: bf16[8,128], index: 0, kind: input, shape index: {}]   ;;  %s846_s1 = inlined_call_operand.vmem [shape: bf16[128,256], index: 1, kind: input, shape index: {}]   ;;  %s847_s2 = inlined_call_operand.vmem [shape: f32[1,256], index: 2, kind: input, shape index: {}]   ;;  %s848_s3 = inlined_call_operand.vmem [shape: bf16[8,256], index: 3, kind: output, shape index: {}]  }
   0x1   :  { %s759_s14 = smov 0   ;;  %s761_s15 = smov 0  }
   0x2   :  { %s763_s16 = smov 0  }
   0x3 LB: > { %s28_s17 = sadd.s32 1, %s727_s15  ;;  %p76_p1 = scmp.ne.s32.totalorder %s719_s13, %s715_s12  ;;  %s731_s16 = sphi %s763_s16, %s13_s16   ;;  %s727_s15 = sphi %s761_s15, %s852_s15   ;;  %s723_s14 = sphi %s759_s14, %s851_s14   ;;  %s719_s13 = sphi %s757_s13, %s850_s13   ;;  %s715_s12 = sphi %s755_s12, %s849_s12  }
   0x4   : > { %p30_p0 = scmp.ge.s32.totalorder %s28_s17, 2  ;;  %p77_p2 = scmp.eq.s32.totalorder %s731_s16, 0 }
   0x5   : > { %s69_s19 = sadd.s32 1, %s719_s13  ;;  %p597_p5 = scmp.ge.s32.totalorder %s731_s16, 2 }
   0x6   : > { %s854_s17 = smov (%p30_p0, %s28_s17), 0  ;;  %p78_p3 = por %p77_p2, %p76_p1 }
   0x7   : > { %s65_s18 = ssub.s32 %s727_s15, %s854_s17  ;;  %166 = sbr.rel (%p597_p5) target bundleno = 26 (0x1a), region = 20 }
   0x8   : > { %p67_p4 = scmp.eq.s32.totalorder %s65_s18, 0 }
   0xa   : > { %s790_s20 = scalar_select %p67_p4, %s719_s13, %s69_s19  }
   0xc   : > { %169 = sbr.rel (!%p78_p3) target bundleno = 26 (0x1a), region = 24  ;;  %s171_s21 = sand.u32 (%p78_p3), 1, %s719_s13  }
   0xd   : > { %s599_s22 = sshll.u32 (%p78_p3), %s727_s15, 2  ;;  %s598_s23 = sshll.u32 (%p78_p3), %s171_s21, 6 }
   0xe   : > { %s798_s26 = scalar_lea.vmem (%p78_p3), %s846_s1, %s599_s22  ;;  %s173_s27 = scalar_lea.vmem (%p78_p3), [#allocation3], %s598_s23 }
   0xf   : > { %v195_v0 = vld [vmem:[%s798_s26] sm:$0xf] (%p78_p3)  ;;  %v197_v1 = vld [vmem:[%s798_s26 + $0x8] sm:$0xf] (%p78_p3)  ;;  %v199_v2 = vld [vmem:[%s798_s26 + $0x10] sm:$0xf] (%p78_p3) }
  0x10   : > { %196 = vst [vmem:[%s173_s27] sm:$0xf] (%p78_p3), %v195_v0  ;;  %198 = vst [vmem:[%s173_s27 + $0x4] sm:$0xf] (%p78_p3), %v197_v1  ;;  %v201_v3 = vld [vmem:[%s798_s26 + $0x18] sm:$0xf] (%p78_p3) }
  0x11   : > { %v203_v4 = vld [vmem:[%s798_s26 + $0x20] sm:$0xf]  ;;  %200 = vst [vmem:[%s173_s27 + $0x8] sm:$0xf] %v199_v2  ;;  %202 = vst [vmem:[%s173_s27 + $0xc] sm:$0xf] %v201_v3 }
  0x12   : > { %204 = vst [vmem:[%s173_s27 + $0x10] sm:$0xf] %v203_v4  ;;  %v205_v5 = vld [vmem:[%s798_s26 + $0x28] sm:$0xf]  ;;  %v207_v6 = vld [vmem:[%s798_s26 + $0x30] sm:$0xf] }
  0x13   : > { %v209_v7 = vld [vmem:[%s798_s26 + $0x38] sm:$0xf]  ;;  %206 = vst [vmem:[%s173_s27 + $0x14] sm:$0xf] %v205_v5  ;;  %208 = vst [vmem:[%s173_s27 + $0x18] sm:$0xf] %v207_v6 }
  0x14   : > { %210 = vst [vmem:[%s173_s27 + $0x1c] sm:$0xf] %v209_v7  ;;  %v211_v8 = vld [vmem:[%s798_s26 + $0x40] sm:$0xf]  ;;  %v213_v9 = vld [vmem:[%s798_s26 + $0x48] sm:$0xf] }
  0x15   : > { %v215_v10 = vld [vmem:[%s798_s26 + $0x50] sm:$0xf]  ;;  %212 = vst [vmem:[%s173_s27 + $0x20] sm:$0xf] %v211_v8  ;;  %214 = vst [vmem:[%s173_s27 + $0x24] sm:$0xf] %v213_v9 }
  0x16   : > { %216 = vst [vmem:[%s173_s27 + $0x28] sm:$0xf] %v215_v10  ;;  %v217_v11 = vld [vmem:[%s798_s26 + $0x58] sm:$0xf]  ;;  %v219_v12 = vld [vmem:[%s798_s26 + $0x60] sm:$0xf] }
  0x17   : > { %v221_v13 = vld [vmem:[%s798_s26 + $0x68] sm:$0xf]  ;;  %218 = vst [vmem:[%s173_s27 + $0x2c] sm:$0xf] %v217_v11  ;;  %220 = vst [vmem:[%s173_s27 + $0x30] sm:$0xf] %v219_v12 }
  0x18   : > { %222 = vst [vmem:[%s173_s27 + $0x34] sm:$0xf] %v221_v13  ;;  %v223_v14 = vld [vmem:[%s798_s26 + $0x70] sm:$0xf]  ;;  %v225_v15 = vld [vmem:[%s798_s26 + $0x78] sm:$0xf] }
  0x19   : > { %224 = vst [vmem:[%s173_s27 + $0x38] sm:$0xf] %v223_v14  ;;  %226 = vst [vmem:[%s173_s27 + $0x3c] sm:$0xf] %v225_v15 }
  0x1a PF: > { %p600_p6 = scmp.ge.s32.totalorder %s731_s16, 1  ;;  %p287_p7 = scmp.lt.s32.totalorder %s731_s16, 3 }
  0x1c   : > { %p288_p8 = pnand %p600_p6, %p287_p7 }
  0x1d   : > { %s294_s28 = sand.u32 (!%p288_p8), 1, %s715_s12   ;;  %p338_p9 = scmp.lt.s32.totalorder (!%p288_p8), %s723_s14, 1 }
  0x1e   : > { %291 = sbr.rel (%p288_p8) target bundleno = 267 (0x10b), region = 69  ;;  %s601_s29 = sshll.u32 (!%p288_p8), %s294_s28, 6 }
  0x1f   : > { %s296_s30 = scalar_lea.vmem (!%p288_p8), [#allocation3], %s601_s29 }
  0x23   : > { %v733_v16 = vmov 0.0   ;;  %vm734_vm0 = vmmov 0   ;;  %v685_v17 = vld [vmem:[%s296_s30 + $0x38] sm:$0xff]   ;;  %v686_v18 = vld [vmem:[%s296_s30 + $0x30] sm:$0xff]   ;;  %v687_v19 = vld [vmem:[%s296_s30 + $0x28] sm:$0xff]   ;;  %s856_s14 = smov (!%p338_p9, %s723_s14), 1 }
  0x24   : > { %623 = vmatprep.subr.bf16.mxu0 %v733_v16  ;;  %639 = vmatprep.mubr.msk.bf16.mxu0 %vm734_vm0, %v733_v16  ;;  %v688_v20 = vld [vmem:[%s296_s30 + $0x20] sm:$0xff]   ;;  %v689_v21 = vld [vmem:[%s296_s30 + $0x18] sm:$0xff]   ;;  %v690_v22 = vld [vmem:[%s296_s30 + $0x10] sm:$0xff]   ;;  %s340_s8 = scalar_lea.vmem %s847_s2, %s856_s14  ;;  %s602_s9 = sshll.u32 %s856_s14, 2 }
  0x25   : > { %624 = vmatpush3.bf16.msra.mxu0 %v685_v17  ;;  %v691_v23 = vld [vmem:[%s296_s30 + $0x8] sm:$0xff]   ;;  %v692_v24 = vld [vmem:[%s296_s30] sm:$0xff]   ;;  %s348_s12 = scalar_lea.vmem %s848_s3, %s602_s9 }
  0x26   : > { %625 = vmatprep.subr.bf16.mxu0 %v733_v16  ;;  %v356_v25 = vld [vmem:[%s845_s0] sm:$0xf] }
  0x27   : > { %v611_v26 = vld [vmem:[%s340_s8] ss:$0 sm:$0xff] }
  0x29   : > { %626 = vmatpush3.bf16.msra.mxu0 %v686_v18 }
  0x2a   : > { %627 = vmatprep.subr.bf16.mxu0 %v733_v16 }
  0x2d   : > { %628 = vmatpush3.bf16.msra.mxu0 %v687_v19 }
  0x2e   : > { %629 = vmatprep.subr.bf16.mxu0 %v733_v16 }
  0x31   : > { %630 = vmatpush3.bf16.msra.mxu0 %v688_v20 }
  0x32   : > { %631 = vmatprep.subr.bf16.mxu0 %v733_v16 }
  0x35   : > { %632 = vmatpush3.bf16.msra.mxu0 %v689_v21 }
  0x36   : > { %633 = vmatprep.subr.bf16.mxu0 %v733_v16 }
  0x39   : > { %634 = vmatpush3.bf16.msra.mxu0 %v690_v22 }
  0x3a   : > { %635 = vmatprep.subr.bf16.mxu0 %v733_v16 }
  0x3d   : > { %636 = vmatpush3.bf16.msra.mxu0 %v691_v23 }
  0x3e   : > { %637 = vmatprep.subr.bf16.mxu0 %v733_v16 }
  0x41   : > { %638 = vmatpush3.bf16.msra.mxu0 %v692_v24 }
  0x44   : > { %640 = vmatmul.mubr.bf16.vlgmr.msra.gmra.mxu0 %v356_v25 }
 0x104   : > { %v455_v27 = vpop.f32.mrf.mxu0 }
 0x105   : > { %v474_v28 = vadd.f32 %v611_v26, %v455_v27 }
 0x106   : > { %v641_v29 = vpop.f32.mrf.mxu0 }
 0x107   : > { %v475_v30 = vpack.c.bf16 %v474_v28, %v474_v28 }
 0x108   : > { %v458_v31 = vpop.f32.mrf.mxu0 }
 0x109   : > { %476 = vst [vmem:[%s348_s12] sm:$0xf] %v475_v30 }
 0x10a   : > { %v642_v32 = vpop.f32.mrf.mxu0 }
 0x10b PF: > { %s13_s16 = sadd.s32 1, %s731_s16   ;;  %s849_s12 = smov %s719_s13 }
 0x10c   : > { %p10_p10 = scmp.ge.s32.totalorder %s13_s16, 4   ;;  %s850_s13 = smov %s790_s20 }
 0x10d   : > { %s851_s14 = smov %s727_s15  ;;  %s852_s15 = smov %s854_s17 }
 0x10e   :  { %12 = sbr.rel (!%p10_p10) target bundleno = 3 (0x3), region = 122 }

// kernel: img_encoder_resnet_forward.306
= control target key start
LH: loop header
LB: loop body
LE: loop exit
PB: predicated region body
PF: predicated region fallthrough
CT: control target
= control target key end

     0   :  { %s354_s1 = inlined_call_operand.vmem [shape: bf16[256,128], index: 1, kind: input, shape index: {}]   ;;  %s355_s0 = inlined_call_operand.vmem [shape: bf16[8,256], index: 0, kind: input, shape index: {}]   ;;  %s356_s2 = inlined_call_operand.vmem [shape: f32[1,128], index: 2, kind: input, shape index: {}]   ;;  %s357_s3 = inlined_call_operand.vmem [shape: bf16[8,128], index: 3, kind: output, shape index: {}]  }
   0x1   :  { %v259_v0 = vld [vmem:[%s354_s1 + $0x78] sm:$0xff]   ;;  %v261_v2 = vld [vmem:[%s354_s1 + $0x70] sm:$0xff]   ;;  %v263_v4 = vld [vmem:[%s354_s1 + $0x68] sm:$0xff]  }
   0x2   :  { %v260_v1 = vld [vmem:[%s354_s1 + $0x38] sm:$0xff]   ;;  %237 = vmatprep.subr.bf16.mxu0 %v259_v0  ;;  %v262_v3 = vld [vmem:[%s354_s1 + $0x30] sm:$0xff]   ;;  %v264_v5 = vld [vmem:[%s354_s1 + $0x28] sm:$0xff]  }
   0x3   :  { %238 = vmatpush3.bf16.msra.mxu0 %v260_v1  ;;  %v265_v6 = vld [vmem:[%s354_s1 + $0x60] sm:$0xff]   ;;  %v267_v8 = vld [vmem:[%s354_s1 + $0x58] sm:$0xff]   ;;  %v269_v10 = vld [vmem:[%s354_s1 + $0x50] sm:$0xff]  }
   0x4   :  { %239 = vmatprep.subr.bf16.mxu0 %v261_v2  ;;  %v266_v7 = vld [vmem:[%s354_s1 + $0x20] sm:$0xff]   ;;  %v268_v9 = vld [vmem:[%s354_s1 + $0x18] sm:$0xff]   ;;  %v270_v13 = vld [vmem:[%s354_s1 + $0x10] sm:$0xff]  }
   0x5   :  { %v21_v11 = vld [vmem:[%s355_s0] sm:$0xff]  ;;  %v271_v14 = vld [vmem:[%s354_s1 + $0x48] sm:$0xff]  }
   0x6   :  { %v219_v12 = vcombine.high %v21_v11, %v21_v11  ;;  %v272_v15 = vld [vmem:[%s354_s1 + $0x8] sm:$0xff]   ;;  %v273_v16 = vld [vmem:[%s354_s1 + $0x40] sm:$0xff]   ;;  %v218_v18 = vcombine.low %v21_v11, %v21_v11 }
   0x7   :  { %240 = vmatpush3.bf16.msra.mxu0 %v262_v3  ;;  %v274_v17 = vld [vmem:[%s354_s1] sm:$0xff]  }
   0x8   :  { %241 = vmatprep.subr.bf16.mxu0 %v263_v4  ;;  %189 = vmatprep.mubr.bf16.mxu0 %v219_v12  ;;  %v236_v21 = vld [vmem:[%s356_s2] ss:$0 sm:$0xff] }
   0xb   :  { %242 = vmatpush3.bf16.msra.mxu0 %v264_v5 }
   0xc   :  { %243 = vmatprep.subr.bf16.mxu0 %v265_v6 }
   0xf   :  { %244 = vmatpush3.bf16.msra.mxu0 %v266_v7 }
  0x10   :  { %245 = vmatprep.subr.bf16.mxu0 %v267_v8 }
  0x13   :  { %246 = vmatpush3.bf16.msra.mxu0 %v268_v9 }
  0x14   :  { %247 = vmatprep.subr.bf16.mxu0 %v269_v10 }
  0x17   :  { %248 = vmatpush3.bf16.msra.mxu0 %v270_v13 }
  0x18   :  { %249 = vmatprep.subr.bf16.mxu0 %v271_v14 }
  0x1b   :  { %250 = vmatpush3.bf16.msra.mxu0 %v272_v15 }
  0x1c   :  { %251 = vmatprep.subr.bf16.mxu0 %v273_v16 }
  0x1f   :  { %252 = vmatpush3.bf16.msra.mxu0 %v274_v17 }
  0x22   :  { %190 = vmatmul.mubr.bf16.vlgmr.msra.gmra.mxu0 %v218_v18 }
  0xe2   :  { %v253_v19 = vpop.f32.mrf.mxu0 }
  0xe4   :  { %v254_v20 = vpop.f32.mrf.mxu0 }
  0xe5   :  { %v255_v22 = vadd.f32 %v254_v20, %v253_v19 }
  0xe6   :  { %v256_v23 = vpop.f32.mrf.mxu0 }
  0xe7   :  { %v210_v24 = vadd.f32 %v255_v22, %v236_v21 }
  0xe8   :  { %v257_v25 = vpop.f32.mrf.mxu0 }
  0xe9   :  { %v211_v26 = vmax.f32 %v210_v24, 0.0 }
  0xeb   :  { %v212_v27 = vpack.c.bf16 %v211_v26, %v211_v26 }
  0xed   :  { %213 = vst [vmem:[%s357_s3] sm:$0xf] %v212_v27 }

// kernel: img_encoder_resnet_forward.312
= control target key start
LH: loop header
LB: loop body
LE: loop exit
PB: predicated region body
PF: predicated region fallthrough
CT: control target
= control target key end

     0   :  { %s352_s1 = inlined_call_operand.vmem [shape: bf16[256,128], index: 1, kind: input, shape index: {}]   ;;  %s353_s0 = inlined_call_operand.vmem [shape: bf16[8,256], index: 0, kind: input, shape index: {}]   ;;  %s354_s2 = inlined_call_operand.vmem [shape: f32[1,128], index: 2, kind: input, shape index: {}]   ;;  %s355_s3 = inlined_call_operand.vmem [shape: f32[8,128], index: 3, kind: output, shape index: {}]  }
   0x1   :  { %v257_v0 = vld [vmem:[%s352_s1 + $0x78] sm:$0xff]   ;;  %v259_v2 = vld [vmem:[%s352_s1 + $0x70] sm:$0xff]   ;;  %v261_v4 = vld [vmem:[%s352_s1 + $0x68] sm:$0xff]  }
   0x2   :  { %v258_v1 = vld [vmem:[%s352_s1 + $0x38] sm:$0xff]   ;;  %235 = vmatprep.subr.bf16.mxu0 %v257_v0  ;;  %v260_v3 = vld [vmem:[%s352_s1 + $0x30] sm:$0xff]   ;;  %v262_v5 = vld [vmem:[%s352_s1 + $0x28] sm:$0xff]  }
   0x3   :  { %236 = vmatpush3.bf16.msra.mxu0 %v258_v1  ;;  %v263_v6 = vld [vmem:[%s352_s1 + $0x60] sm:$0xff]   ;;  %v265_v8 = vld [vmem:[%s352_s1 + $0x58] sm:$0xff]   ;;  %v267_v10 = vld [vmem:[%s352_s1 + $0x50] sm:$0xff]  }
   0x4   :  { %237 = vmatprep.subr.bf16.mxu0 %v259_v2  ;;  %v264_v7 = vld [vmem:[%s352_s1 + $0x20] sm:$0xff]   ;;  %v266_v9 = vld [vmem:[%s352_s1 + $0x18] sm:$0xff]   ;;  %v268_v13 = vld [vmem:[%s352_s1 + $0x10] sm:$0xff]  }
   0x5   :  { %v21_v11 = vld [vmem:[%s353_s0] sm:$0xff]  ;;  %v269_v14 = vld [vmem:[%s352_s1 + $0x48] sm:$0xff]  }
   0x6   :  { %v217_v12 = vcombine.high %v21_v11, %v21_v11  ;;  %v270_v15 = vld [vmem:[%s352_s1 + $0x8] sm:$0xff]   ;;  %v271_v16 = vld [vmem:[%s352_s1 + $0x40] sm:$0xff]   ;;  %v216_v18 = vcombine.low %v21_v11, %v21_v11 }
   0x7   :  { %238 = vmatpush3.bf16.msra.mxu0 %v260_v3  ;;  %v272_v17 = vld [vmem:[%s352_s1] sm:$0xff]  }
   0x8   :  { %239 = vmatprep.subr.bf16.mxu0 %v261_v4  ;;  %189 = vmatprep.mubr.bf16.mxu0 %v217_v12  ;;  %v234_v21 = vld [vmem:[%s354_s2] ss:$0 sm:$0xff] }
   0xb   :  { %240 = vmatpush3.bf16.msra.mxu0 %v262_v5 }
   0xc   :  { %241 = vmatprep.subr.bf16.mxu0 %v263_v6 }
   0xf   :  { %242 = vmatpush3.bf16.msra.mxu0 %v264_v7 }
  0x10   :  { %243 = vmatprep.subr.bf16.mxu0 %v265_v8 }
  0x13   :  { %244 = vmatpush3.bf16.msra.mxu0 %v266_v9 }
  0x14   :  { %245 = vmatprep.subr.bf16.mxu0 %v267_v10 }
  0x17   :  { %246 = vmatpush3.bf16.msra.mxu0 %v268_v13 }
  0x18   :  { %247 = vmatprep.subr.bf16.mxu0 %v269_v14 }
  0x1b   :  { %248 = vmatpush3.bf16.msra.mxu0 %v270_v15 }
  0x1c   :  { %249 = vmatprep.subr.bf16.mxu0 %v271_v16 }
  0x1f   :  { %250 = vmatpush3.bf16.msra.mxu0 %v272_v17 }
  0x22   :  { %190 = vmatmul.mubr.bf16.vlgmr.msra.gmra.mxu0 %v216_v18 }
  0xe2   :  { %v251_v19 = vpop.f32.mrf.mxu0 }
  0xe4   :  { %v252_v20 = vpop.f32.mrf.mxu0 }
  0xe5   :  { %v253_v22 = vadd.f32 %v252_v20, %v251_v19 }
  0xe6   :  { %v254_v23 = vpop.f32.mrf.mxu0 }
  0xe7   :  { %v210_v24 = vadd.f32 %v253_v22, %v234_v21 }
  0xe8   :  { %v255_v25 = vpop.f32.mrf.mxu0 }
  0xe9   :  { %211 = vst [vmem:[%s355_s3] sm:$0xff] %v210_v24 }

// kernel: img_encoder_resnet_forward.313
= control target key start
LH: loop header
LB: loop body
LE: loop exit
PB: predicated region body
PF: predicated region fallthrough
CT: control target
= control target key end

     0   :  { %vm11_vm0 = vcmask 254976   ;;  %s75_s0 = inlined_call_operand.vmem [shape: f32[2,32], index: 0, kind: input, shape index: {}]   ;;  %s76_s1 = inlined_call_operand.hbm [shape: f32[2,32], index: 1, kind: output, shape index: {}]  }
   0x1   :  { %v9_v0 = vld [vmem:[%s75_s0] sm:$0x3] }
   0x2   :  { %6 = vsyncpa [#allocation3], 0  ;;  %v10_v1 = vmul.f32 %v9_v0, %v9_v0  ;;  %s58_s8 = smov [#allocation2]  }
   0x3   :  { %s25_s9 = sshll.u32 %s58_s8, 4  ;;  %s26_s9 = int_to_ptr.vmem [resolvable:$true] %s25_s9 }
   0x4   :  { %v12_v2 = vsel %vm11_vm0, %v10_v1, 0.0  ;;  %s36_s10 = scalar_lea.vmem %s26_s9, 32  ;;  %p41_p1 = scmp.lt.s32.totalorder %s26_s9, %s26_s9 }
   0x5   :  { %13 = vadd.xlane.f32.xlu0 %v12_v2  ;;  %p37_p0 = scmp.ne.s32.totalorder %s26_s9, %s36_s10  ;;  %p42_p2 = scmp.lt.s32.totalorder %s36_s10, %s36_s10 }
   0x7   :  { %p43_p3 = por %p42_p2, %p41_p1 }
   0x9   :  { %p44_p4 = pnand %p43_p3, %p37_p0 }
  0x8e   :  { %v14_v3 = vpop.xlane.xlu0 %13 }
  0x8f   :  { %v15_v4 = vmax.f32 %v14_v3, 1e-24 }
  0x91   :  { %34 = vrsqrt.f32 %v15_v4 }
  0x9e   :  { %v35_v5 = vpop.eup %34 }
  0x9f   :  { %v17_v6 = vmul.f32 %v35_v5, %v9_v0 }
  0xa1   :  { %18 = vst.msk [vmem:[#allocation2] sm:$0x3] %vm11_vm0, %v17_v6 }
  0xa2   :  { %47 = shalt.err (!%p44_p4)
}
  0xa3   :  { %28 = dma.vmem_to_hbm [thread:$0]  %s26_s9, 32, %s76_s1, [#allocation3]  }
  0xa4   :  { %56 = dma.done.wait [#allocation3], 32  }
  0xa5   :  { %57 = vsyncadd [#allocation3], 4294967264 }
  0xa6   :  { %32 = vsyncpa [#allocation3], 1 }

</bundles_post_ra>
